<compile_context>
chip_gen: v5e
topology: v5e:2x2
jax: 0.10.0
libtpu: 0.0.40
codegen_flags: <defaults>
</compile_context>

<pallas_src>
import numpy as np
import jax
import jax.numpy as jnp
from jax.experimental import pallas as pl
from jax.experimental.pallas import tpu as pltpu

KLD_SCALE = 10.0          # matches dvq VQVAEQuantize.kld_scale
_VMEM_LIMIT = 32 * 1024 * 1024


def _rpad(n):
    """Physical row count: round up to a multiple of 8 (min 8) for f32 sublane tiles."""
    return max(8, -(-n // 8) * 8)


def _cparams():
    return pltpu.CompilerParams(dimension_semantics=("parallel",),
                                vmem_limit_bytes=_VMEM_LIMIT)


def _pinned(a):
    """BlockSpec for a weight pinned across the batch grid (full array, constant index)."""
    zeros = (0,) * a.ndim
    return pl.BlockSpec(a.shape, lambda b: zeros)


# --------------------- conv -> (row-selector, lane-mixer) lowering ---------------------

def _prep_conv(w, b, H, W, stride, pad, rows_in, transpose=False):
    """Lower Conv2d / ConvTranspose2d to:  out = sum_k (R[k] @ X) @ G[k] + b_row
    with X in (rows_in, W*Cin) layout (channels fastest along lanes).
    Returns (R (kh, rows_out, rows_in) f32, G (kh, W*Cin, Wo*Cout) bf16,
             b_row (1, Wo*Cout) f32, Ho, Wo, rows_out)."""
    w = jnp.asarray(w, jnp.float32)
    if transpose:
        Cin, Cout, kh, kw = w.shape
        Ho = (H - 1) * stride - 2 * pad + kh
        Wo = (W - 1) * stride - 2 * pad + kw
        rows_out = _rpad(Ho)
        R = np.zeros((kh, rows_out, rows_in), np.float32)
        for k in range(kh):
            for i in range(H):
                o = i * stride - pad + k
                if 0 <= o < Ho:
                    R[k, o, i] = 1.0
        P = np.zeros((kw, W, Wo), np.float32)
        for d in range(kw):
            for i in range(W):
                o = i * stride - pad + d
                if 0 <= o < Wo:
                    P[d, i, o] = 1.0
        G = jnp.einsum("dio,cukd->kicou", jnp.asarray(P), w)
        G = G.reshape(kh, W * Cin, Wo * Cout)
    else:
        Cout, Cin, kh, kw = w.shape
        Ho = (H + 2 * pad - kh) // stride + 1
        Wo = (W + 2 * pad - kw) // stride + 1
        rows_out = _rpad(Ho)
        R = np.zeros((kh, rows_out, rows_in), np.float32)
        for k in range(kh):
            for o in range(Ho):
                i = o * stride + k - pad
                if 0 <= i < H:
                    R[k, o, i] = 1.0
        P = np.zeros((kw, W, Wo), np.float32)
        for d in range(kw):
            for o in range(Wo):
                i = o * stride + d - pad
                if 0 <= i < W:
                    P[d, i, o] = 1.0
        G = jnp.einsum("dio,uckd->kicou", jnp.asarray(P), w)
        G = G.reshape(kh, W * Cin, Wo * Cout)
    b_row = jnp.tile(jnp.asarray(b, jnp.float32), Wo).reshape(1, Wo * Cout)
    return (jnp.asarray(R, jnp.float32), G.astype(jnp.bfloat16), b_row,
            Ho, Wo, rows_out)


def _prep_1x1(w, b, W):
    """1x1 conv (row-preserving): block-diagonal lane mixer G (W*Cin, W*Cout)."""
    Cout, Cin = int(w.shape[0]), int(w.shape[1])
    wm = jnp.asarray(w, jnp.float32).reshape(Cout, Cin)
    eye = jnp.asarray(np.eye(W, dtype=np.float32))
    G = jnp.einsum("vw,uc->vcwu", eye, wm).reshape(W * Cin, W * Cout)
    b_row = jnp.tile(jnp.asarray(b, jnp.float32), W).reshape(1, W * Cout)
    return G.astype(jnp.bfloat16), b_row


def _prep_proj(w, b, Hq, Wq, rows_in):
    """1x1 projection emitted directly in token-row layout (Hq*Wq, D):
    ze = sum_w (Rw[w] @ X) @ Gw[w] + b."""
    D, Cin = int(w.shape[0]), int(w.shape[1])
    wm = jnp.asarray(w, jnp.float32).reshape(D, Cin)
    Rw = np.zeros((Wq, Hq * Wq, rows_in), np.float32)
    for wc in range(Wq):
        for h in range(Hq):
            Rw[wc, h * Wq + wc, h] = 1.0
    eye = jnp.asarray(np.eye(Wq, dtype=np.float32))
    Gw = jnp.einsum("wv,dc->wvcd", eye, wm).reshape(Wq, Wq * Cin, D)
    b_row = jnp.asarray(b, jnp.float32).reshape(1, D)
    return jnp.asarray(Rw, jnp.float32), Gw.astype(jnp.bfloat16), b_row


# ----------------------------- in-kernel building blocks ------------------------------

def _conv_apply(x, r_ref, g_ref, b_ref, relu):
    """out = sum_k (R[k] @ x) @ G[k] + b ; all matmuls f32-accumulated."""
    acc = None
    for k in range(r_ref.shape[0]):
        xs = jnp.dot(r_ref[k], x, preferred_element_type=jnp.float32)
        t = jnp.dot(xs, g_ref[k].astype(jnp.float32),
                    preferred_element_type=jnp.float32)
        acc = t if acc is None else acc + t
    y = acc + b_ref[...]
    return jnp.maximum(y, 0.0) if relu else y


def _resblock_apply(x, r_ref, g1_ref, b1_ref, g2_ref, b2_ref):
    """x + Conv1x1(ReLU(Conv3x3(ReLU(x))))."""
    h = _conv_apply(jnp.maximum(x, 0.0), r_ref, g1_ref, b1_ref, relu=True)
    y = jnp.dot(h, g2_ref[...].astype(jnp.float32),
                preferred_element_type=jnp.float32)
    return x + y + b2_ref[...]


# ------------------------------------ kernels ------------------------------------------

def _encoder_vq_kernel(
    x_ref,
    r1, g1, b1, r2, g2, b2, r3, g3, b3,
    rr1, ga1, ba1, gb1, bb1,
    rr2, ga2, ba2, gb2, bb2,
    rw, gw, bp, e_ref, et_ref, esq_ref,
    zq_ref, ind_ref, diff_ref,
):
    x = x_ref[0]                                      # (H, W*C) f32
    h = _conv_apply(x, r1, g1, b1, relu=True)         # conv 4x4 /2
    h = _conv_apply(h, r2, g2, b2, relu=True)         # conv 4x4 /2
    h = _conv_apply(h, r3, g3, b3, relu=True)         # conv 3x3
    h = _resblock_apply(h, rr1, ga1, ba1, gb1, bb1)
    h = _resblock_apply(h, rr2, ga2, ba2, gb2, bb2)

    # 1x1 projection emitted directly in token-row layout (Hq*Wq, D)
    ze = None
    for wc in range(rw.shape[0]):
        xs = jnp.dot(rw[wc], h, preferred_element_type=jnp.float32)
        t = jnp.dot(xs, gw[wc].astype(jnp.float32),
                    preferred_element_type=jnp.float32)
        ze = t if ze is None else ze + t
    ze = ze + bp[...]                                  # (T, D) f32

    # nearest-codebook lookup (f32; ||ze||^2 dropped -> argmin-invariant)
    e = e_ref[...]                                     # (K, D)
    cross = jnp.dot(ze, et_ref[...], preferred_element_type=jnp.float32)   # (T, K)
    dist = esq_ref[...] - 2.0 * cross
    mind = jnp.min(dist, axis=1, keepdims=True)
    iota = jax.lax.broadcasted_iota(jnp.int32, dist.shape, 1)
    n_embed = e.shape[0]
    ind = jnp.min(jnp.where(dist == mind, iota, n_embed),
                  axis=1, keepdims=True).astype(jnp.int32)                 # first min
    onehot = (iota == ind).astype(jnp.float32)
    zq = jnp.dot(onehot, e, preferred_element_type=jnp.float32)            # (T, D)

    zq_ref[0] = zq
    ind_ref[0] = ind

    d2 = (zq - ze) ** 2
    s = jnp.sum(jnp.sum(d2, axis=1, keepdims=True), axis=0, keepdims=True)  # (1, 1)
    diff_ref[0] = jnp.broadcast_to(s, (1, 128))        # per-batch partial sum (lane-dense)


def _decoder_mse_kernel(
    zq_ref, xt_ref,
    rd, gd, bd,
    rr1, ga1, ba1, gb1, bb1,
    rr2, ga2, ba2, gb2, bb2,
    rt1, gt1, bt1, rt2, gt2, bt2,
    xhat_ref, mse_ref,
):
    z = zq_ref[0]                                      # (rows_q, Wq*D) f32
    h = _conv_apply(z, rd, gd, bd, relu=True)          # conv 3x3
    h = _resblock_apply(h, rr1, ga1, ba1, gb1, bb1)
    h = _resblock_apply(h, rr2, ga2, ba2, gb2, bb2)
    h = _conv_apply(h, rt1, gt1, bt1, relu=True)       # ConvTranspose2d 4x4 /2 + ReLU
    y = _conv_apply(h, rt2, gt2, bt2, relu=False)      # ConvTranspose2d 4x4 /2
    xhat_ref[0] = y

    d = y - xt_ref[0]
    s = jnp.sum(jnp.sum(d * d, axis=1, keepdims=True), axis=0, keepdims=True)
    mse_ref[0] = jnp.broadcast_to(s, (1, 128))         # per-batch partial SSE


# ----------------------------------- call wrappers -------------------------------------

def _encoder_vq_call(xf, enc_args, B, T, D):
    in_specs = [pl.BlockSpec((1,) + xf.shape[1:], lambda b: (b, 0, 0))]
    in_specs += [_pinned(a) for a in enc_args]
    out_specs = (
        pl.BlockSpec((1, T, D), lambda b: (b, 0, 0)),
        pl.BlockSpec((1, T, 1), lambda b: (b, 0, 0)),
        pl.BlockSpec((1, 1, 128), lambda b: (b, 0, 0)),
    )
    out_shape = (
        jax.ShapeDtypeStruct((B, T, D), jnp.float32),
        jax.ShapeDtypeStruct((B, T, 1), jnp.int32),
        jax.ShapeDtypeStruct((B, 1, 128), jnp.float32),
    )
    return pl.pallas_call(
        _encoder_vq_kernel,
        grid=(B,),
        in_specs=in_specs,
        out_specs=out_specs,
        out_shape=out_shape,
        compiler_params=_cparams(),
    )(xf, *enc_args)


def _decoder_mse_call(zq_wide, xf, dec_args, B, H, W, C):
    in_specs = [
        pl.BlockSpec((1,) + zq_wide.shape[1:], lambda b: (b, 0, 0)),
        pl.BlockSpec((1,) + xf.shape[1:], lambda b: (b, 0, 0)),
    ]
    in_specs += [_pinned(a) for a in dec_args]
    out_specs = (
        pl.BlockSpec((1, H, W * C), lambda b: (b, 0, 0)),
        pl.BlockSpec((1, 1, 128), lambda b: (b, 0, 0)),
    )
    out_shape = (
        jax.ShapeDtypeStruct((B, H, W * C), jnp.float32),
        jax.ShapeDtypeStruct((B, 1, 128), jnp.float32),
    )
    return pl.pallas_call(
        _decoder_mse_kernel,
        grid=(B,),
        in_specs=in_specs,
        out_specs=out_specs,
        out_shape=out_shape,
        compiler_params=_cparams(),
    )(zq_wide, xf, *dec_args)


# ------------------------------------ VQVAE forward ------------------------------------

def vqvae_forward(params, x):
    """x: (B, C, H, W) float32 (PyTorch NCHW). Returns (x_hat, loss, ind)."""
    p = params
    B, C, H, W = x.shape
    Hq, Wq = H // 4, W // 4
    K, D = p["embed"].shape
    T = Hq * Wq

    # NHWC once, as a (H, W*C) slab per batch element.
    xf = jnp.transpose(x, (0, 2, 3, 1)).astype(jnp.float32).reshape(B, H, W * C)

    # ---------------- encoder + VQ (one pallas_call) ----------------
    r1, g1, b1, H1, W1, rows1 = _prep_conv(p["enc_w1"], p["enc_b1"], H, W, 2, 1, H)
    r2, g2, b2, H2, W2, rows2 = _prep_conv(p["enc_w2"], p["enc_b2"], H1, W1, 2, 1, rows1)
    r3, g3, b3, H3, W3, rows3 = _prep_conv(p["enc_w3"], p["enc_b3"], H2, W2, 1, 1, rows2)
    rr1, ga1, ba1, _, _, _ = _prep_conv(p["enc_rb1_w1"], p["enc_rb1_b1"], H3, W3, 1, 1, rows3)
    gb1, bb1 = _prep_1x1(p["enc_rb1_w2"], p["enc_rb1_b2"], W3)
    rr2, ga2, ba2, _, _, _ = _prep_conv(p["enc_rb2_w1"], p["enc_rb2_b1"], H3, W3, 1, 1, rows3)
    gb2, bb2 = _prep_1x1(p["enc_rb2_w2"], p["enc_rb2_b2"], W3)
    rw, gw, bp = _prep_proj(p["proj_w"], p["proj_b"], H3, W3, rows3)
    e = p["embed"].astype(jnp.float32)
    et = jnp.transpose(e)
    esq = jnp.sum(e * e, axis=1).reshape(1, K)

    enc_args = [r1, g1, b1, r2, g2, b2, r3, g3, b3,
                rr1, ga1, ba1, gb1, bb1, rr2, ga2, ba2, gb2, bb2,
                rw, gw, bp, e, et, esq]
    zq_tok, ind_tok, diff_p = _encoder_vq_call(xf, enc_args, B, T, D)

    diff = (KLD_SCALE * 1.25 / float(B * T * D)) * jnp.sum(diff_p[:, 0, 0])
    ind = ind_tok[:, :, 0].reshape(B, Hq, Wq)

    # ---------------- decoder + MSE (one pallas_call) ----------------
    rows_q = _rpad(Hq)
    zq_wide = zq_tok.reshape(B, Hq, Wq * D)
    if rows_q > Hq:
        zq_wide = jnp.pad(zq_wide, ((0, 0), (0, rows_q - Hq), (0, 0)))

    rd, gd, bd, _, _, rows_d = _prep_conv(p["dec_w1"], p["dec_b1"], Hq, Wq, 1, 1, rows_q)
    dr1, dga1, dba1, _, _, _ = _prep_conv(p["dec_rb1_w1"], p["dec_rb1_b1"], Hq, Wq, 1, 1, rows_d)
    dgb1, dbb1 = _prep_1x1(p["dec_rb1_w2"], p["dec_rb1_b2"], Wq)
    dr2, dga2, dba2, _, _, _ = _prep_conv(p["dec_rb2_w1"], p["dec_rb2_b1"], Hq, Wq, 1, 1, rows_d)
    dgb2, dbb2 = _prep_1x1(p["dec_rb2_w2"], p["dec_rb2_b2"], Wq)
    rt1, gt1, bt1, Hd1, Wd1, rows_t1 = _prep_conv(p["dec_w2"], p["dec_b2"], Hq, Wq, 2, 1,
                                                  rows_d, transpose=True)
    rt2, gt2, bt2, Hd2, Wd2, _ = _prep_conv(p["dec_w3"], p["dec_b3"], Hd1, Wd1, 2, 1,
                                            rows_t1, transpose=True)

    dec_args = [rd, gd, bd,
                dr1, dga1, dba1, dgb1, dbb1,
                dr2, dga2, dba2, dgb2, dbb2,
                rt1, gt1, bt1, rt2, gt2, bt2]
    xhat_flat, mse_p = _decoder_mse_call(zq_wide, xf, dec_args, B, H, W, C)

    mse = jnp.sum(mse_p[:, 0, 0]) / float(B * C * H * W)
    x_hat = jnp.transpose(xhat_flat.reshape(B, H, W, C), (0, 3, 1, 2))
    loss = diff + mse
    return x_hat, loss, ind


# ------------------------------------ parameter init ------------------------------------

def init_params(key, input_channels):
    C = input_channels
    n_hid = C // 4
    c2 = 2 * n_hid                      # == C // 2 (encoder output channels)
    rb_hid = max(c2 // 4, 1)
    emb_dim, n_embed = 64, 512
    keys = iter(jax.random.split(key, 64))

    def conv_p(cout, cin, k):
        k1, k2 = jax.random.split(next(keys))
        bound = 1.0 / float((cin * k * k) ** 0.5)
        w = jax.random.uniform(k1, (cout, cin, k, k), jnp.float32, -bound, bound)
        b = jax.random.uniform(k2, (cout,), jnp.float32, -bound, bound)
        return w, b

    def convT_p(cin, cout, k):
        k1, k2 = jax.random.split(next(keys))
        bound = 1.0 / float((cout * k * k) ** 0.5)
        w = jax.random.uniform(k1, (cin, cout, k, k), jnp.float32, -bound, bound)
        b = jax.random.uniform(k2, (cout,), jnp.float32, -bound, bound)
        return w, b

    p = {}
    # DeepMindEncoder
    p["enc_w1"], p["enc_b1"] = conv_p(n_hid, C, 4)
    p["enc_w2"], p["enc_b2"] = conv_p(c2, n_hid, 4)
    p["enc_w3"], p["enc_b3"] = conv_p(c2, c2, 3)
    for name in ("enc_rb1", "enc_rb2"):
        p[name + "_w1"], p[name + "_b1"] = conv_p(rb_hid, c2, 3)
        p[name + "_w2"], p[name + "_b2"] = conv_p(c2, rb_hid, 1)
    # VQVAEQuantize
    p["proj_w"], p["proj_b"] = conv_p(emb_dim, c2, 1)
    p["embed"] = jax.random.normal(next(keys), (n_embed, emb_dim), jnp.float32)
    # DeepMindDecoder
    p["dec_w1"], p["dec_b1"] = conv_p(c2, emb_dim, 3)
    for name in ("dec_rb1", "dec_rb2"):
        p[name + "_w1"], p[name + "_b1"] = conv_p(rb_hid, c2, 3)
        p[name + "_w2"], p[name + "_b2"] = conv_p(c2, rb_hid, 1)
    p["dec_w2"], p["dec_b2"] = convT_p(c2, n_hid, 4)
    p["dec_w3"], p["dec_b3"] = convT_p(n_hid, C, 4)
    return p


# ----------------------------------------- main -----------------------------------------

if __name__ == "__main__":
    key = jax.random.PRNGKey(0)
    kx, kp = jax.random.split(key)
    B, C, H, W = 2, 16, 16, 16
    x = jax.random.normal(kx, (B, C, H, W), jnp.float32)
    params = init_params(kp, C)

    fwd = jax.jit(vqvae_forward)
    x_hat, loss, ind = fwd(params, x)
    jax.block_until_ready((x_hat, loss, ind))

    assert x_hat.shape == (B, C, H, W) and x_hat.dtype == jnp.float32
    assert loss.shape == () and bool(jnp.isfinite(loss))
    assert ind.shape == (B, H // 4, W // 4) and ind.dtype == jnp.int32
    print("KERNEL_OK")
</pallas_src>

<mosaic_0001>
module attributes {stable_mosaic.version = 11 : i64} {
  func.func @_encoder_vq_kernel(%arg0: i32, %arg1: memref<1x16x256xf32, #tpu.memory_space<vmem>>, %arg2: memref<4x8x16xf32, #tpu.memory_space<vmem>>, %arg3: memref<4x256x32xbf16, #tpu.memory_space<vmem>>, %arg4: memref<1x32xf32, #tpu.memory_space<vmem>>, %arg5: memref<4x8x8xf32, #tpu.memory_space<vmem>>, %arg6: memref<4x32x32xbf16, #tpu.memory_space<vmem>>, %arg7: memref<1x32xf32, #tpu.memory_space<vmem>>, %arg8: memref<3x8x8xf32, #tpu.memory_space<vmem>>, %arg9: memref<3x32x32xbf16, #tpu.memory_space<vmem>>, %arg10: memref<1x32xf32, #tpu.memory_space<vmem>>, %arg11: memref<3x8x8xf32, #tpu.memory_space<vmem>>, %arg12: memref<3x32x8xbf16, #tpu.memory_space<vmem>>, %arg13: memref<1x8xf32, #tpu.memory_space<vmem>>, %arg14: memref<8x32xbf16, #tpu.memory_space<vmem>>, %arg15: memref<1x32xf32, #tpu.memory_space<vmem>>, %arg16: memref<3x8x8xf32, #tpu.memory_space<vmem>>, %arg17: memref<3x32x8xbf16, #tpu.memory_space<vmem>>, %arg18: memref<1x8xf32, #tpu.memory_space<vmem>>, %arg19: memref<8x32xbf16, #tpu.memory_space<vmem>>, %arg20: memref<1x32xf32, #tpu.memory_space<vmem>>, %arg21: memref<4x16x8xf32, #tpu.memory_space<vmem>>, %arg22: memref<4x32x64xbf16, #tpu.memory_space<vmem>>, %arg23: memref<1x64xf32, #tpu.memory_space<vmem>>, %arg24: memref<512x64xf32, #tpu.memory_space<vmem>>, %arg25: memref<64x512xf32, #tpu.memory_space<vmem>>, %arg26: memref<1x512xf32, #tpu.memory_space<vmem>>, %arg27: memref<1x16x64xf32, #tpu.memory_space<vmem>>, %arg28: memref<1x16x1xi32, #tpu.memory_space<vmem>>, %arg29: memref<1x1x128xf32, #tpu.memory_space<vmem>>) attributes {dimension_semantics = [#tpu.dimension_semantics<parallel>], iteration_bounds = array<i64: 2>, scalar_prefetch = 0 : i64, scratch_operands = 0 : i64, tpu.core_type = #tpu.core_type<tc>, window_params = [{transform_indices = @transform_0, window_bounds = array<i64: 1, 16, 256>}, {pipeline_mode = #tpu.pipeline_mode<synchronous>, transform_indices = @transform_1, window_bounds = array<i64: 4, 8, 16>}, {pipeline_mode = #tpu.pipeline_mode<synchronous>, transform_indices = @transform_2, window_bounds = array<i64: 4, 256, 32>}, {pipeline_mode = #tpu.pipeline_mode<synchronous>, transform_indices = @transform_3, window_bounds = array<i64: 1, 32>}, {pipeline_mode = #tpu.pipeline_mode<synchronous>, transform_indices = @transform_4, window_bounds = array<i64: 4, 8, 8>}, {pipeline_mode = #tpu.pipeline_mode<synchronous>, transform_indices = @transform_5, window_bounds = array<i64: 4, 32, 32>}, {pipeline_mode = #tpu.pipeline_mode<synchronous>, transform_indices = @transform_6, window_bounds = array<i64: 1, 32>}, {pipeline_mode = #tpu.pipeline_mode<synchronous>, transform_indices = @transform_7, window_bounds = array<i64: 3, 8, 8>}, {pipeline_mode = #tpu.pipeline_mode<synchronous>, transform_indices = @transform_8, window_bounds = array<i64: 3, 32, 32>}, {pipeline_mode = #tpu.pipeline_mode<synchronous>, transform_indices = @transform_9, window_bounds = array<i64: 1, 32>}, {pipeline_mode = #tpu.pipeline_mode<synchronous>, transform_indices = @transform_10, window_bounds = array<i64: 3, 8, 8>}, {pipeline_mode = #tpu.pipeline_mode<synchronous>, transform_indices = @transform_11, window_bounds = array<i64: 3, 32, 8>}, {pipeline_mode = #tpu.pipeline_mode<synchronous>, transform_indices = @transform_12, window_bounds = array<i64: 1, 8>}, {pipeline_mode = #tpu.pipeline_mode<synchronous>, transform_indices = @transform_13, window_bounds = array<i64: 8, 32>}, {pipeline_mode = #tpu.pipeline_mode<synchronous>, transform_indices = @transform_14, window_bounds = array<i64: 1, 32>}, {pipeline_mode = #tpu.pipeline_mode<synchronous>, transform_indices = @transform_15, window_bounds = array<i64: 3, 8, 8>}, {pipeline_mode = #tpu.pipeline_mode<synchronous>, transform_indices = @transform_16, window_bounds = array<i64: 3, 32, 8>}, {pipeline_mode = #tpu.pipeline_mode<synchronous>, transform_indices = @transform_17, window_bounds = array<i64: 1, 8>}, {pipeline_mode = #tpu.pipeline_mode<synchronous>, transform_indices = @transform_18, window_bounds = array<i64: 8, 32>}, {pipeline_mode = #tpu.pipeline_mode<synchronous>, transform_indices = @transform_19, window_bounds = array<i64: 1, 32>}, {pipeline_mode = #tpu.pipeline_mode<synchronous>, transform_indices = @transform_20, window_bounds = array<i64: 4, 16, 8>}, {pipeline_mode = #tpu.pipeline_mode<synchronous>, transform_indices = @transform_21, window_bounds = array<i64: 4, 32, 64>}, {pipeline_mode = #tpu.pipeline_mode<synchronous>, transform_indices = @transform_22, window_bounds = array<i64: 1, 64>}, {pipeline_mode = #tpu.pipeline_mode<synchronous>, transform_indices = @transform_23, window_bounds = array<i64: 512, 64>}, {pipeline_mode = #tpu.pipeline_mode<synchronous>, transform_indices = @transform_24, window_bounds = array<i64: 64, 512>}, {pipeline_mode = #tpu.pipeline_mode<synchronous>, transform_indices = @transform_25, window_bounds = array<i64: 1, 512>}, {transform_indices = @transform_26, window_bounds = array<i64: 1, 16, 64>}, {transform_indices = @transform_27, window_bounds = array<i64: 1, 16, 1>}, {transform_indices = @transform_28, window_bounds = array<i64: 1, 1, 128>}]} {
    %c0 = arith.constant 0 : index
    %c0_0 = arith.constant 0 : index
    %c0_1 = arith.constant 0 : index
    %0 = vector.load %arg1[%c0, %c0_0, %c0_1] : memref<1x16x256xf32, #tpu.memory_space<vmem>>, vector<1x16x256xf32>
    %1 = vector.shape_cast %0 : vector<1x16x256xf32> to vector<16x256xf32>
    %c0_2 = arith.constant 0 : index
    %c0_3 = arith.constant 0 : index
    %c0_4 = arith.constant 0 : index
    %2 = vector.load %arg2[%c0_2, %c0_3, %c0_4] : memref<4x8x16xf32, #tpu.memory_space<vmem>>, vector<1x8x16xf32>
    %3 = vector.shape_cast %2 : vector<1x8x16xf32> to vector<8x16xf32>
    %cst = arith.constant dense<0.000000e+00> : vector<8x256xf32>
    %4 = tpu.matmul %3, %1, %cst {dimension_numbers = #tpu.dot_dimension_numbers<[1], [0], [0], [1], [0, 0, 1, 1], [], []>} : vector<8x16xf32>, vector<16x256xf32>, vector<8x256xf32> -> vector<8x256xf32>
    %c0_5 = arith.constant 0 : index
    %c0_6 = arith.constant 0 : index
    %c0_7 = arith.constant 0 : index
    %5 = vector.load %arg3[%c0_5, %c0_6, %c0_7] : memref<4x256x32xbf16, #tpu.memory_space<vmem>>, vector<1x256x32xbf16>
    %6 = vector.shape_cast %5 : vector<1x256x32xbf16> to vector<256x32xbf16>
    %7 = arith.extf %6 : vector<256x32xbf16> to vector<256x32xf32>
    %cst_8 = arith.constant dense<0.000000e+00> : vector<8x32xf32>
    %8 = tpu.matmul %4, %7, %cst_8 {dimension_numbers = #tpu.dot_dimension_numbers<[1], [0], [0], [1], [0, 0, 1, 1], [], []>} : vector<8x256xf32>, vector<256x32xf32>, vector<8x32xf32> -> vector<8x32xf32>
    %c1 = arith.constant 1 : index
    %c0_9 = arith.constant 0 : index
    %c0_10 = arith.constant 0 : index
    %9 = vector.load %arg2[%c1, %c0_9, %c0_10] : memref<4x8x16xf32, #tpu.memory_space<vmem>>, vector<1x8x16xf32>
    %10 = vector.shape_cast %9 : vector<1x8x16xf32> to vector<8x16xf32>
    %cst_11 = arith.constant dense<0.000000e+00> : vector<8x256xf32>
    %11 = tpu.matmul %10, %1, %cst_11 {dimension_numbers = #tpu.dot_dimension_numbers<[1], [0], [0], [1], [0, 0, 1, 1], [], []>} : vector<8x16xf32>, vector<16x256xf32>, vector<8x256xf32> -> vector<8x256xf32>
    %c1_12 = arith.constant 1 : index
    %c0_13 = arith.constant 0 : index
    %c0_14 = arith.constant 0 : index
    %12 = vector.load %arg3[%c1_12, %c0_13, %c0_14] : memref<4x256x32xbf16, #tpu.memory_space<vmem>>, vector<1x256x32xbf16>
    %13 = vector.shape_cast %12 : vector<1x256x32xbf16> to vector<256x32xbf16>
    %14 = arith.extf %13 : vector<256x32xbf16> to vector<256x32xf32>
    %cst_15 = arith.constant dense<0.000000e+00> : vector<8x32xf32>
    %15 = tpu.matmul %11, %14, %cst_15 {dimension_numbers = #tpu.dot_dimension_numbers<[1], [0], [0], [1], [0, 0, 1, 1], [], []>} : vector<8x256xf32>, vector<256x32xf32>, vector<8x32xf32> -> vector<8x32xf32>
    %16 = arith.addf %8, %15 : vector<8x32xf32>
    %c2 = arith.constant 2 : index
    %c0_16 = arith.constant 0 : index
    %c0_17 = arith.constant 0 : index
    %17 = vector.load %arg2[%c2, %c0_16, %c0_17] : memref<4x8x16xf32, #tpu.memory_space<vmem>>, vector<1x8x16xf32>
    %18 = vector.shape_cast %17 : vector<1x8x16xf32> to vector<8x16xf32>
    %cst_18 = arith.constant dense<0.000000e+00> : vector<8x256xf32>
    %19 = tpu.matmul %18, %1, %cst_18 {dimension_numbers = #tpu.dot_dimension_numbers<[1], [0], [0], [1], [0, 0, 1, 1], [], []>} : vector<8x16xf32>, vector<16x256xf32>, vector<8x256xf32> -> vector<8x256xf32>
    %c2_19 = arith.constant 2 : index
    %c0_20 = arith.constant 0 : index
    %c0_21 = arith.constant 0 : index
    %20 = vector.load %arg3[%c2_19, %c0_20, %c0_21] : memref<4x256x32xbf16, #tpu.memory_space<vmem>>, vector<1x256x32xbf16>
    %21 = vector.shape_cast %20 : vector<1x256x32xbf16> to vector<256x32xbf16>
    %22 = arith.extf %21 : vector<256x32xbf16> to vector<256x32xf32>
    %cst_22 = arith.constant dense<0.000000e+00> : vector<8x32xf32>
    %23 = tpu.matmul %19, %22, %cst_22 {dimension_numbers = #tpu.dot_dimension_numbers<[1], [0], [0], [1], [0, 0, 1, 1], [], []>} : vector<8x256xf32>, vector<256x32xf32>, vector<8x32xf32> -> vector<8x32xf32>
    %24 = arith.addf %16, %23 : vector<8x32xf32>
    %c3 = arith.constant 3 : index
    %c0_23 = arith.constant 0 : index
    %c0_24 = arith.constant 0 : index
    %25 = vector.load %arg2[%c3, %c0_23, %c0_24] : memref<4x8x16xf32, #tpu.memory_space<vmem>>, vector<1x8x16xf32>
    %26 = vector.shape_cast %25 : vector<1x8x16xf32> to vector<8x16xf32>
    %cst_25 = arith.constant dense<0.000000e+00> : vector<8x256xf32>
    %27 = tpu.matmul %26, %1, %cst_25 {dimension_numbers = #tpu.dot_dimension_numbers<[1], [0], [0], [1], [0, 0, 1, 1], [], []>} : vector<8x16xf32>, vector<16x256xf32>, vector<8x256xf32> -> vector<8x256xf32>
    %c3_26 = arith.constant 3 : index
    %c0_27 = arith.constant 0 : index
    %c0_28 = arith.constant 0 : index
    %28 = vector.load %arg3[%c3_26, %c0_27, %c0_28] : memref<4x256x32xbf16, #tpu.memory_space<vmem>>, vector<1x256x32xbf16>
    %29 = vector.shape_cast %28 : vector<1x256x32xbf16> to vector<256x32xbf16>
    %30 = arith.extf %29 : vector<256x32xbf16> to vector<256x32xf32>
    %cst_29 = arith.constant dense<0.000000e+00> : vector<8x32xf32>
    %31 = tpu.matmul %27, %30, %cst_29 {dimension_numbers = #tpu.dot_dimension_numbers<[1], [0], [0], [1], [0, 0, 1, 1], [], []>} : vector<8x256xf32>, vector<256x32xf32>, vector<8x32xf32> -> vector<8x32xf32>
    %32 = arith.addf %24, %31 : vector<8x32xf32>
    %c0_30 = arith.constant 0 : index
    %c0_31 = arith.constant 0 : index
    %33 = vector.load %arg4[%c0_30, %c0_31] : memref<1x32xf32, #tpu.memory_space<vmem>>, vector<1x32xf32>
    %34 = vector.broadcast %33 : vector<1x32xf32> to vector<8x32xf32>
    %35 = arith.addf %32, %34 : vector<8x32xf32>
    %cst_32 = arith.constant 0.000000e+00 : f32
    %36 = vector.broadcast %cst_32 : f32 to vector<8x32xf32>
    %37 = arith.maximumf %35, %36 : vector<8x32xf32>
    %c0_33 = arith.constant 0 : index
    %c0_34 = arith.constant 0 : index
    %c0_35 = arith.constant 0 : index
    %38 = vector.load %arg5[%c0_33, %c0_34, %c0_35] : memref<4x8x8xf32, #tpu.memory_space<vmem>>, vector<1x8x8xf32>
    %39 = vector.shape_cast %38 : vector<1x8x8xf32> to vector<8x8xf32>
    %cst_36 = arith.constant dense<0.000000e+00> : vector<8x32xf32>
    %40 = tpu.matmul %39, %37, %cst_36 {dimension_numbers = #tpu.dot_dimension_numbers<[1], [0], [0], [1], [0, 0, 1, 1], [], []>} : vector<8x8xf32>, vector<8x32xf32>, vector<8x32xf32> -> vector<8x32xf32>
    %c0_37 = arith.constant 0 : index
    %c0_38 = arith.constant 0 : index
    %c0_39 = arith.constant 0 : index
    %41 = vector.load %arg6[%c0_37, %c0_38, %c0_39] : memref<4x32x32xbf16, #tpu.memory_space<vmem>>, vector<1x32x32xbf16>
    %42 = vector.shape_cast %41 : vector<1x32x32xbf16> to vector<32x32xbf16>
    %43 = arith.extf %42 : vector<32x32xbf16> to vector<32x32xf32>
    %cst_40 = arith.constant dense<0.000000e+00> : vector<8x32xf32>
    %44 = tpu.matmul %40, %43, %cst_40 {dimension_numbers = #tpu.dot_dimension_numbers<[1], [0], [0], [1], [0, 0, 1, 1], [], []>} : vector<8x32xf32>, vector<32x32xf32>, vector<8x32xf32> -> vector<8x32xf32>
    %c1_41 = arith.constant 1 : index
    %c0_42 = arith.constant 0 : index
    %c0_43 = arith.constant 0 : index
    %45 = vector.load %arg5[%c1_41, %c0_42, %c0_43] : memref<4x8x8xf32, #tpu.memory_space<vmem>>, vector<1x8x8xf32>
    %46 = vector.shape_cast %45 : vector<1x8x8xf32> to vector<8x8xf32>
    %cst_44 = arith.constant dense<0.000000e+00> : vector<8x32xf32>
    %47 = tpu.matmul %46, %37, %cst_44 {dimension_numbers = #tpu.dot_dimension_numbers<[1], [0], [0], [1], [0, 0, 1, 1], [], []>} : vector<8x8xf32>, vector<8x32xf32>, vector<8x32xf32> -> vector<8x32xf32>
    %c1_45 = arith.constant 1 : index
    %c0_46 = arith.constant 0 : index
    %c0_47 = arith.constant 0 : index
    %48 = vector.load %arg6[%c1_45, %c0_46, %c0_47] : memref<4x32x32xbf16, #tpu.memory_space<vmem>>, vector<1x32x32xbf16>
    %49 = vector.shape_cast %48 : vector<1x32x32xbf16> to vector<32x32xbf16>
    %50 = arith.extf %49 : vector<32x32xbf16> to vector<32x32xf32>
    %cst_48 = arith.constant dense<0.000000e+00> : vector<8x32xf32>
    %51 = tpu.matmul %47, %50, %cst_48 {dimension_numbers = #tpu.dot_dimension_numbers<[1], [0], [0], [1], [0, 0, 1, 1], [], []>} : vector<8x32xf32>, vector<32x32xf32>, vector<8x32xf32> -> vector<8x32xf32>
    %52 = arith.addf %44, %51 : vector<8x32xf32>
    %c2_49 = arith.constant 2 : index
    %c0_50 = arith.constant 0 : index
    %c0_51 = arith.constant 0 : index
    %53 = vector.load %arg5[%c2_49, %c0_50, %c0_51] : memref<4x8x8xf32, #tpu.memory_space<vmem>>, vector<1x8x8xf32>
    %54 = vector.shape_cast %53 : vector<1x8x8xf32> to vector<8x8xf32>
    %cst_52 = arith.constant dense<0.000000e+00> : vector<8x32xf32>
    %55 = tpu.matmul %54, %37, %cst_52 {dimension_numbers = #tpu.dot_dimension_numbers<[1], [0], [0], [1], [0, 0, 1, 1], [], []>} : vector<8x8xf32>, vector<8x32xf32>, vector<8x32xf32> -> vector<8x32xf32>
    %c2_53 = arith.constant 2 : index
    %c0_54 = arith.constant 0 : index
    %c0_55 = arith.constant 0 : index
    %56 = vector.load %arg6[%c2_53, %c0_54, %c0_55] : memref<4x32x32xbf16, #tpu.memory_space<vmem>>, vector<1x32x32xbf16>
    %57 = vector.shape_cast %56 : vector<1x32x32xbf16> to vector<32x32xbf16>
    %58 = arith.extf %57 : vector<32x32xbf16> to vector<32x32xf32>
    %cst_56 = arith.constant dense<0.000000e+00> : vector<8x32xf32>
    %59 = tpu.matmul %55, %58, %cst_56 {dimension_numbers = #tpu.dot_dimension_numbers<[1], [0], [0], [1], [0, 0, 1, 1], [], []>} : vector<8x32xf32>, vector<32x32xf32>, vector<8x32xf32> -> vector<8x32xf32>
    %60 = arith.addf %52, %59 : vector<8x32xf32>
    %c3_57 = arith.constant 3 : index
    %c0_58 = arith.constant 0 : index
    %c0_59 = arith.constant 0 : index
    %61 = vector.load %arg5[%c3_57, %c0_58, %c0_59] : memref<4x8x8xf32, #tpu.memory_space<vmem>>, vector<1x8x8xf32>
    %62 = vector.shape_cast %61 : vector<1x8x8xf32> to vector<8x8xf32>
    %cst_60 = arith.constant dense<0.000000e+00> : vector<8x32xf32>
    %63 = tpu.matmul %62, %37, %cst_60 {dimension_numbers = #tpu.dot_dimension_numbers<[1], [0], [0], [1], [0, 0, 1, 1], [], []>} : vector<8x8xf32>, vector<8x32xf32>, vector<8x32xf32> -> vector<8x32xf32>
    %c3_61 = arith.constant 3 : index
    %c0_62 = arith.constant 0 : index
    %c0_63 = arith.constant 0 : index
    %64 = vector.load %arg6[%c3_61, %c0_62, %c0_63] : memref<4x32x32xbf16, #tpu.memory_space<vmem>>, vector<1x32x32xbf16>
    %65 = vector.shape_cast %64 : vector<1x32x32xbf16> to vector<32x32xbf16>
    %66 = arith.extf %65 : vector<32x32xbf16> to vector<32x32xf32>
    %cst_64 = arith.constant dense<0.000000e+00> : vector<8x32xf32>
    %67 = tpu.matmul %63, %66, %cst_64 {dimension_numbers = #tpu.dot_dimension_numbers<[1], [0], [0], [1], [0, 0, 1, 1], [], []>} : vector<8x32xf32>, vector<32x32xf32>, vector<8x32xf32> -> vector<8x32xf32>
    %68 = arith.addf %60, %67 : vector<8x32xf32>
    %c0_65 = arith.constant 0 : index
    %c0_66 = arith.constant 0 : index
    %69 = vector.load %arg7[%c0_65, %c0_66] : memref<1x32xf32, #tpu.memory_space<vmem>>, vector<1x32xf32>
    %70 = vector.broadcast %69 : vector<1x32xf32> to vector<8x32xf32>
    %71 = arith.addf %68, %70 : vector<8x32xf32>
    %cst_67 = arith.constant 0.000000e+00 : f32
    %72 = vector.broadcast %cst_67 : f32 to vector<8x32xf32>
    %73 = arith.maximumf %71, %72 : vector<8x32xf32>
    %c0_68 = arith.constant 0 : index
    %c0_69 = arith.constant 0 : index
    %c0_70 = arith.constant 0 : index
    %74 = vector.load %arg8[%c0_68, %c0_69, %c0_70] : memref<3x8x8xf32, #tpu.memory_space<vmem>>, vector<1x8x8xf32>
    %75 = vector.shape_cast %74 : vector<1x8x8xf32> to vector<8x8xf32>
    %cst_71 = arith.constant dense<0.000000e+00> : vector<8x32xf32>
    %76 = tpu.matmul %75, %73, %cst_71 {dimension_numbers = #tpu.dot_dimension_numbers<[1], [0], [0], [1], [0, 0, 1, 1], [], []>} : vector<8x8xf32>, vector<8x32xf32>, vector<8x32xf32> -> vector<8x32xf32>
    %c0_72 = arith.constant 0 : index
    %c0_73 = arith.constant 0 : index
    %c0_74 = arith.constant 0 : index
    %77 = vector.load %arg9[%c0_72, %c0_73, %c0_74] : memref<3x32x32xbf16, #tpu.memory_space<vmem>>, vector<1x32x32xbf16>
    %78 = vector.shape_cast %77 : vector<1x32x32xbf16> to vector<32x32xbf16>
    %79 = arith.extf %78 : vector<32x32xbf16> to vector<32x32xf32>
    %cst_75 = arith.constant dense<0.000000e+00> : vector<8x32xf32>
    %80 = tpu.matmul %76, %79, %cst_75 {dimension_numbers = #tpu.dot_dimension_numbers<[1], [0], [0], [1], [0, 0, 1, 1], [], []>} : vector<8x32xf32>, vector<32x32xf32>, vector<8x32xf32> -> vector<8x32xf32>
    %c1_76 = arith.constant 1 : index
    %c0_77 = arith.constant 0 : index
    %c0_78 = arith.constant 0 : index
    %81 = vector.load %arg8[%c1_76, %c0_77, %c0_78] : memref<3x8x8xf32, #tpu.memory_space<vmem>>, vector<1x8x8xf32>
    %82 = vector.shape_cast %81 : vector<1x8x8xf32> to vector<8x8xf32>
    %cst_79 = arith.constant dense<0.000000e+00> : vector<8x32xf32>
    %83 = tpu.matmul %82, %73, %cst_79 {dimension_numbers = #tpu.dot_dimension_numbers<[1], [0], [0], [1], [0, 0, 1, 1], [], []>} : vector<8x8xf32>, vector<8x32xf32>, vector<8x32xf32> -> vector<8x32xf32>
    %c1_80 = arith.constant 1 : index
    %c0_81 = arith.constant 0 : index
    %c0_82 = arith.constant 0 : index
    %84 = vector.load %arg9[%c1_80, %c0_81, %c0_82] : memref<3x32x32xbf16, #tpu.memory_space<vmem>>, vector<1x32x32xbf16>
    %85 = vector.shape_cast %84 : vector<1x32x32xbf16> to vector<32x32xbf16>
    %86 = arith.extf %85 : vector<32x32xbf16> to vector<32x32xf32>
    %cst_83 = arith.constant dense<0.000000e+00> : vector<8x32xf32>
    %87 = tpu.matmul %83, %86, %cst_83 {dimension_numbers = #tpu.dot_dimension_numbers<[1], [0], [0], [1], [0, 0, 1, 1], [], []>} : vector<8x32xf32>, vector<32x32xf32>, vector<8x32xf32> -> vector<8x32xf32>
    %88 = arith.addf %80, %87 : vector<8x32xf32>
    %c2_84 = arith.constant 2 : index
    %c0_85 = arith.constant 0 : index
    %c0_86 = arith.constant 0 : index
    %89 = vector.load %arg8[%c2_84, %c0_85, %c0_86] : memref<3x8x8xf32, #tpu.memory_space<vmem>>, vector<1x8x8xf32>
    %90 = vector.shape_cast %89 : vector<1x8x8xf32> to vector<8x8xf32>
    %cst_87 = arith.constant dense<0.000000e+00> : vector<8x32xf32>
    %91 = tpu.matmul %90, %73, %cst_87 {dimension_numbers = #tpu.dot_dimension_numbers<[1], [0], [0], [1], [0, 0, 1, 1], [], []>} : vector<8x8xf32>, vector<8x32xf32>, vector<8x32xf32> -> vector<8x32xf32>
    %c2_88 = arith.constant 2 : index
    %c0_89 = arith.constant 0 : index
    %c0_90 = arith.constant 0 : index
    %92 = vector.load %arg9[%c2_88, %c0_89, %c0_90] : memref<3x32x32xbf16, #tpu.memory_space<vmem>>, vector<1x32x32xbf16>
    %93 = vector.shape_cast %92 : vector<1x32x32xbf16> to vector<32x32xbf16>
    %94 = arith.extf %93 : vector<32x32xbf16> to vector<32x32xf32>
    %cst_91 = arith.constant dense<0.000000e+00> : vector<8x32xf32>
    %95 = tpu.matmul %91, %94, %cst_91 {dimension_numbers = #tpu.dot_dimension_numbers<[1], [0], [0], [1], [0, 0, 1, 1], [], []>} : vector<8x32xf32>, vector<32x32xf32>, vector<8x32xf32> -> vector<8x32xf32>
    %96 = arith.addf %88, %95 : vector<8x32xf32>
    %c0_92 = arith.constant 0 : index
    %c0_93 = arith.constant 0 : index
    %97 = vector.load %arg10[%c0_92, %c0_93] : memref<1x32xf32, #tpu.memory_space<vmem>>, vector<1x32xf32>
    %98 = vector.broadcast %97 : vector<1x32xf32> to vector<8x32xf32>
    %99 = arith.addf %96, %98 : vector<8x32xf32>
    %cst_94 = arith.constant 0.000000e+00 : f32
    %100 = vector.broadcast %cst_94 : f32 to vector<8x32xf32>
    %101 = arith.maximumf %99, %100 : vector<8x32xf32>
    %cst_95 = arith.constant 0.000000e+00 : f32
    %102 = vector.broadcast %cst_95 : f32 to vector<8x32xf32>
    %103 = arith.maximumf %101, %102 : vector<8x32xf32>
    %c0_96 = arith.constant 0 : index
    %c0_97 = arith.constant 0 : index
    %c0_98 = arith.constant 0 : index
    %104 = vector.load %arg11[%c0_96, %c0_97, %c0_98] : memref<3x8x8xf32, #tpu.memory_space<vmem>>, vector<1x8x8xf32>
    %105 = vector.shape_cast %104 : vector<1x8x8xf32> to vector<8x8xf32>
    %cst_99 = arith.constant dense<0.000000e+00> : vector<8x32xf32>
    %106 = tpu.matmul %105, %103, %cst_99 {dimension_numbers = #tpu.dot_dimension_numbers<[1], [0], [0], [1], [0, 0, 1, 1], [], []>} : vector<8x8xf32>, vector<8x32xf32>, vector<8x32xf32> -> vector<8x32xf32>
    %c0_100 = arith.constant 0 : index
    %c0_101 = arith.constant 0 : index
    %c0_102 = arith.constant 0 : index
    %107 = vector.load %arg12[%c0_100, %c0_101, %c0_102] : memref<3x32x8xbf16, #tpu.memory_space<vmem>>, vector<1x32x8xbf16>
    %108 = vector.shape_cast %107 : vector<1x32x8xbf16> to vector<32x8xbf16>
    %109 = arith.extf %108 : vector<32x8xbf16> to vector<32x8xf32>
    %cst_103 = arith.constant dense<0.000000e+00> : vector<8x8xf32>
    %110 = tpu.matmul %106, %109, %cst_103 {dimension_numbers = #tpu.dot_dimension_numbers<[1], [0], [0], [1], [0, 0, 1, 1], [], []>} : vector<8x32xf32>, vector<32x8xf32>, vector<8x8xf32> -> vector<8x8xf32>
    %c1_104 = arith.constant 1 : index
    %c0_105 = arith.constant 0 : index
    %c0_106 = arith.constant 0 : index
    %111 = vector.load %arg11[%c1_104, %c0_105, %c0_106] : memref<3x8x8xf32, #tpu.memory_space<vmem>>, vector<1x8x8xf32>
    %112 = vector.shape_cast %111 : vector<1x8x8xf32> to vector<8x8xf32>
    %cst_107 = arith.constant dense<0.000000e+00> : vector<8x32xf32>
    %113 = tpu.matmul %112, %103, %cst_107 {dimension_numbers = #tpu.dot_dimension_numbers<[1], [0], [0], [1], [0, 0, 1, 1], [], []>} : vector<8x8xf32>, vector<8x32xf32>, vector<8x32xf32> -> vector<8x32xf32>
    %c1_108 = arith.constant 1 : index
    %c0_109 = arith.constant 0 : index
    %c0_110 = arith.constant 0 : index
    %114 = vector.load %arg12[%c1_108, %c0_109, %c0_110] : memref<3x32x8xbf16, #tpu.memory_space<vmem>>, vector<1x32x8xbf16>
    %115 = vector.shape_cast %114 : vector<1x32x8xbf16> to vector<32x8xbf16>
    %116 = arith.extf %115 : vector<32x8xbf16> to vector<32x8xf32>
    %cst_111 = arith.constant dense<0.000000e+00> : vector<8x8xf32>
    %117 = tpu.matmul %113, %116, %cst_111 {dimension_numbers = #tpu.dot_dimension_numbers<[1], [0], [0], [1], [0, 0, 1, 1], [], []>} : vector<8x32xf32>, vector<32x8xf32>, vector<8x8xf32> -> vector<8x8xf32>
    %118 = arith.addf %110, %117 : vector<8x8xf32>
    %c2_112 = arith.constant 2 : index
    %c0_113 = arith.constant 0 : index
    %c0_114 = arith.constant 0 : index
    %119 = vector.load %arg11[%c2_112, %c0_113, %c0_114] : memref<3x8x8xf32, #tpu.memory_space<vmem>>, vector<1x8x8xf32>
    %120 = vector.shape_cast %119 : vector<1x8x8xf32> to vector<8x8xf32>
    %cst_115 = arith.constant dense<0.000000e+00> : vector<8x32xf32>
    %121 = tpu.matmul %120, %103, %cst_115 {dimension_numbers = #tpu.dot_dimension_numbers<[1], [0], [0], [1], [0, 0, 1, 1], [], []>} : vector<8x8xf32>, vector<8x32xf32>, vector<8x32xf32> -> vector<8x32xf32>
    %c2_116 = arith.constant 2 : index
    %c0_117 = arith.constant 0 : index
    %c0_118 = arith.constant 0 : index
    %122 = vector.load %arg12[%c2_116, %c0_117, %c0_118] : memref<3x32x8xbf16, #tpu.memory_space<vmem>>, vector<1x32x8xbf16>
    %123 = vector.shape_cast %122 : vector<1x32x8xbf16> to vector<32x8xbf16>
    %124 = arith.extf %123 : vector<32x8xbf16> to vector<32x8xf32>
    %cst_119 = arith.constant dense<0.000000e+00> : vector<8x8xf32>
    %125 = tpu.matmul %121, %124, %cst_119 {dimension_numbers = #tpu.dot_dimension_numbers<[1], [0], [0], [1], [0, 0, 1, 1], [], []>} : vector<8x32xf32>, vector<32x8xf32>, vector<8x8xf32> -> vector<8x8xf32>
    %126 = arith.addf %118, %125 : vector<8x8xf32>
    %c0_120 = arith.constant 0 : index
    %c0_121 = arith.constant 0 : index
    %127 = vector.load %arg13[%c0_120, %c0_121] : memref<1x8xf32, #tpu.memory_space<vmem>>, vector<1x8xf32>
    %128 = vector.broadcast %127 : vector<1x8xf32> to vector<8x8xf32>
    %129 = arith.addf %126, %128 : vector<8x8xf32>
    %cst_122 = arith.constant 0.000000e+00 : f32
    %130 = vector.broadcast %cst_122 : f32 to vector<8x8xf32>
    %131 = arith.maximumf %129, %130 : vector<8x8xf32>
    %c0_123 = arith.constant 0 : index
    %c0_124 = arith.constant 0 : index
    %132 = vector.load %arg14[%c0_123, %c0_124] : memref<8x32xbf16, #tpu.memory_space<vmem>>, vector<8x32xbf16>
    %133 = arith.extf %132 : vector<8x32xbf16> to vector<8x32xf32>
    %cst_125 = arith.constant dense<0.000000e+00> : vector<8x32xf32>
    %134 = tpu.matmul %131, %133, %cst_125 {dimension_numbers = #tpu.dot_dimension_numbers<[1], [0], [0], [1], [0, 0, 1, 1], [], []>} : vector<8x8xf32>, vector<8x32xf32>, vector<8x32xf32> -> vector<8x32xf32>
    %135 = arith.addf %101, %134 : vector<8x32xf32>
    %c0_126 = arith.constant 0 : index
    %c0_127 = arith.constant 0 : index
    %136 = vector.load %arg15[%c0_126, %c0_127] : memref<1x32xf32, #tpu.memory_space<vmem>>, vector<1x32xf32>
    %137 = vector.broadcast %136 : vector<1x32xf32> to vector<8x32xf32>
    %138 = arith.addf %135, %137 : vector<8x32xf32>
    %cst_128 = arith.constant 0.000000e+00 : f32
    %139 = vector.broadcast %cst_128 : f32 to vector<8x32xf32>
    %140 = arith.maximumf %138, %139 : vector<8x32xf32>
    %c0_129 = arith.constant 0 : index
    %c0_130 = arith.constant 0 : index
    %c0_131 = arith.constant 0 : index
    %141 = vector.load %arg16[%c0_129, %c0_130, %c0_131] : memref<3x8x8xf32, #tpu.memory_space<vmem>>, vector<1x8x8xf32>
    %142 = vector.shape_cast %141 : vector<1x8x8xf32> to vector<8x8xf32>
    %cst_132 = arith.constant dense<0.000000e+00> : vector<8x32xf32>
    %143 = tpu.matmul %142, %140, %cst_132 {dimension_numbers = #tpu.dot_dimension_numbers<[1], [0], [0], [1], [0, 0, 1, 1], [], []>} : vector<8x8xf32>, vector<8x32xf32>, vector<8x32xf32> -> vector<8x32xf32>
    %c0_133 = arith.constant 0 : index
    %c0_134 = arith.constant 0 : index
    %c0_135 = arith.constant 0 : index
    %144 = vector.load %arg17[%c0_133, %c0_134, %c0_135] : memref<3x32x8xbf16, #tpu.memory_space<vmem>>, vector<1x32x8xbf16>
    %145 = vector.shape_cast %144 : vector<1x32x8xbf16> to vector<32x8xbf16>
    %146 = arith.extf %145 : vector<32x8xbf16> to vector<32x8xf32>
    %cst_136 = arith.constant dense<0.000000e+00> : vector<8x8xf32>
    %147 = tpu.matmul %143, %146, %cst_136 {dimension_numbers = #tpu.dot_dimension_numbers<[1], [0], [0], [1], [0, 0, 1, 1], [], []>} : vector<8x32xf32>, vector<32x8xf32>, vector<8x8xf32> -> vector<8x8xf32>
    %c1_137 = arith.constant 1 : index
    %c0_138 = arith.constant 0 : index
    %c0_139 = arith.constant 0 : index
    %148 = vector.load %arg16[%c1_137, %c0_138, %c0_139] : memref<3x8x8xf32, #tpu.memory_space<vmem>>, vector<1x8x8xf32>
    %149 = vector.shape_cast %148 : vector<1x8x8xf32> to vector<8x8xf32>
    %cst_140 = arith.constant dense<0.000000e+00> : vector<8x32xf32>
    %150 = tpu.matmul %149, %140, %cst_140 {dimension_numbers = #tpu.dot_dimension_numbers<[1], [0], [0], [1], [0, 0, 1, 1], [], []>} : vector<8x8xf32>, vector<8x32xf32>, vector<8x32xf32> -> vector<8x32xf32>
    %c1_141 = arith.constant 1 : index
    %c0_142 = arith.constant 0 : index
    %c0_143 = arith.constant 0 : index
    %151 = vector.load %arg17[%c1_141, %c0_142, %c0_143] : memref<3x32x8xbf16, #tpu.memory_space<vmem>>, vector<1x32x8xbf16>
    %152 = vector.shape_cast %151 : vector<1x32x8xbf16> to vector<32x8xbf16>
    %153 = arith.extf %152 : vector<32x8xbf16> to vector<32x8xf32>
    %cst_144 = arith.constant dense<0.000000e+00> : vector<8x8xf32>
    %154 = tpu.matmul %150, %153, %cst_144 {dimension_numbers = #tpu.dot_dimension_numbers<[1], [0], [0], [1], [0, 0, 1, 1], [], []>} : vector<8x32xf32>, vector<32x8xf32>, vector<8x8xf32> -> vector<8x8xf32>
    %155 = arith.addf %147, %154 : vector<8x8xf32>
    %c2_145 = arith.constant 2 : index
    %c0_146 = arith.constant 0 : index
    %c0_147 = arith.constant 0 : index
    %156 = vector.load %arg16[%c2_145, %c0_146, %c0_147] : memref<3x8x8xf32, #tpu.memory_space<vmem>>, vector<1x8x8xf32>
    %157 = vector.shape_cast %156 : vector<1x8x8xf32> to vector<8x8xf32>
    %cst_148 = arith.constant dense<0.000000e+00> : vector<8x32xf32>
    %158 = tpu.matmul %157, %140, %cst_148 {dimension_numbers = #tpu.dot_dimension_numbers<[1], [0], [0], [1], [0, 0, 1, 1], [], []>} : vector<8x8xf32>, vector<8x32xf32>, vector<8x32xf32> -> vector<8x32xf32>
    %c2_149 = arith.constant 2 : index
    %c0_150 = arith.constant 0 : index
    %c0_151 = arith.constant 0 : index
    %159 = vector.load %arg17[%c2_149, %c0_150, %c0_151] : memref<3x32x8xbf16, #tpu.memory_space<vmem>>, vector<1x32x8xbf16>
    %160 = vector.shape_cast %159 : vector<1x32x8xbf16> to vector<32x8xbf16>
    %161 = arith.extf %160 : vector<32x8xbf16> to vector<32x8xf32>
    %cst_152 = arith.constant dense<0.000000e+00> : vector<8x8xf32>
    %162 = tpu.matmul %158, %161, %cst_152 {dimension_numbers = #tpu.dot_dimension_numbers<[1], [0], [0], [1], [0, 0, 1, 1], [], []>} : vector<8x32xf32>, vector<32x8xf32>, vector<8x8xf32> -> vector<8x8xf32>
    %163 = arith.addf %155, %162 : vector<8x8xf32>
    %c0_153 = arith.constant 0 : index
    %c0_154 = arith.constant 0 : index
    %164 = vector.load %arg18[%c0_153, %c0_154] : memref<1x8xf32, #tpu.memory_space<vmem>>, vector<1x8xf32>
    %165 = vector.broadcast %164 : vector<1x8xf32> to vector<8x8xf32>
    %166 = arith.addf %163, %165 : vector<8x8xf32>
    %cst_155 = arith.constant 0.000000e+00 : f32
    %167 = vector.broadcast %cst_155 : f32 to vector<8x8xf32>
    %168 = arith.maximumf %166, %167 : vector<8x8xf32>
    %c0_156 = arith.constant 0 : index
    %c0_157 = arith.constant 0 : index
    %169 = vector.load %arg19[%c0_156, %c0_157] : memref<8x32xbf16, #tpu.memory_space<vmem>>, vector<8x32xbf16>
    %170 = arith.extf %169 : vector<8x32xbf16> to vector<8x32xf32>
    %cst_158 = arith.constant dense<0.000000e+00> : vector<8x32xf32>
    %171 = tpu.matmul %168, %170, %cst_158 {dimension_numbers = #tpu.dot_dimension_numbers<[1], [0], [0], [1], [0, 0, 1, 1], [], []>} : vector<8x8xf32>, vector<8x32xf32>, vector<8x32xf32> -> vector<8x32xf32>
    %172 = arith.addf %138, %171 : vector<8x32xf32>
    %c0_159 = arith.constant 0 : index
    %c0_160 = arith.constant 0 : index
    %173 = vector.load %arg20[%c0_159, %c0_160] : memref<1x32xf32, #tpu.memory_space<vmem>>, vector<1x32xf32>
    %174 = vector.broadcast %173 : vector<1x32xf32> to vector<8x32xf32>
    %175 = arith.addf %172, %174 : vector<8x32xf32>
    %c0_161 = arith.constant 0 : index
    %c0_162 = arith.constant 0 : index
    %c0_163 = arith.constant 0 : index
    %176 = vector.load %arg21[%c0_161, %c0_162, %c0_163] : memref<4x16x8xf32, #tpu.memory_space<vmem>>, vector<1x16x8xf32>
    %177 = vector.shape_cast %176 : vector<1x16x8xf32> to vector<16x8xf32>
    %cst_164 = arith.constant dense<0.000000e+00> : vector<16x32xf32>
    %178 = tpu.matmul %177, %175, %cst_164 {dimension_numbers = #tpu.dot_dimension_numbers<[1], [0], [0], [1], [0, 0, 1, 1], [], []>} : vector<16x8xf32>, vector<8x32xf32>, vector<16x32xf32> -> vector<16x32xf32>
    %c0_165 = arith.constant 0 : index
    %c0_166 = arith.constant 0 : index
    %c0_167 = arith.constant 0 : index
    %179 = vector.load %arg22[%c0_165, %c0_166, %c0_167] : memref<4x32x64xbf16, #tpu.memory_space<vmem>>, vector<1x32x64xbf16>
    %180 = vector.shape_cast %179 : vector<1x32x64xbf16> to vector<32x64xbf16>
    %181 = arith.extf %180 : vector<32x64xbf16> to vector<32x64xf32>
    %cst_168 = arith.constant dense<0.000000e+00> : vector<16x64xf32>
    %182 = tpu.matmul %178, %181, %cst_168 {dimension_numbers = #tpu.dot_dimension_numbers<[1], [0], [0], [1], [0, 0, 1, 1], [], []>} : vector<16x32xf32>, vector<32x64xf32>, vector<16x64xf32> -> vector<16x64xf32>
    %c1_169 = arith.constant 1 : index
    %c0_170 = arith.constant 0 : index
    %c0_171 = arith.constant 0 : index
    %183 = vector.load %arg21[%c1_169, %c0_170, %c0_171] : memref<4x16x8xf32, #tpu.memory_space<vmem>>, vector<1x16x8xf32>
    %184 = vector.shape_cast %183 : vector<1x16x8xf32> to vector<16x8xf32>
    %cst_172 = arith.constant dense<0.000000e+00> : vector<16x32xf32>
    %185 = tpu.matmul %184, %175, %cst_172 {dimension_numbers = #tpu.dot_dimension_numbers<[1], [0], [0], [1], [0, 0, 1, 1], [], []>} : vector<16x8xf32>, vector<8x32xf32>, vector<16x32xf32> -> vector<16x32xf32>
    %c1_173 = arith.constant 1 : index
    %c0_174 = arith.constant 0 : index
    %c0_175 = arith.constant 0 : index
    %186 = vector.load %arg22[%c1_173, %c0_174, %c0_175] : memref<4x32x64xbf16, #tpu.memory_space<vmem>>, vector<1x32x64xbf16>
    %187 = vector.shape_cast %186 : vector<1x32x64xbf16> to vector<32x64xbf16>
    %188 = arith.extf %187 : vector<32x64xbf16> to vector<32x64xf32>
    %cst_176 = arith.constant dense<0.000000e+00> : vector<16x64xf32>
    %189 = tpu.matmul %185, %188, %cst_176 {dimension_numbers = #tpu.dot_dimension_numbers<[1], [0], [0], [1], [0, 0, 1, 1], [], []>} : vector<16x32xf32>, vector<32x64xf32>, vector<16x64xf32> -> vector<16x64xf32>
    %190 = arith.addf %182, %189 : vector<16x64xf32>
    %c2_177 = arith.constant 2 : index
    %c0_178 = arith.constant 0 : index
    %c0_179 = arith.constant 0 : index
    %191 = vector.load %arg21[%c2_177, %c0_178, %c0_179] : memref<4x16x8xf32, #tpu.memory_space<vmem>>, vector<1x16x8xf32>
    %192 = vector.shape_cast %191 : vector<1x16x8xf32> to vector<16x8xf32>
    %cst_180 = arith.constant dense<0.000000e+00> : vector<16x32xf32>
    %193 = tpu.matmul %192, %175, %cst_180 {dimension_numbers = #tpu.dot_dimension_numbers<[1], [0], [0], [1], [0, 0, 1, 1], [], []>} : vector<16x8xf32>, vector<8x32xf32>, vector<16x32xf32> -> vector<16x32xf32>
    %c2_181 = arith.constant 2 : index
    %c0_182 = arith.constant 0 : index
    %c0_183 = arith.constant 0 : index
    %194 = vector.load %arg22[%c2_181, %c0_182, %c0_183] : memref<4x32x64xbf16, #tpu.memory_space<vmem>>, vector<1x32x64xbf16>
    %195 = vector.shape_cast %194 : vector<1x32x64xbf16> to vector<32x64xbf16>
    %196 = arith.extf %195 : vector<32x64xbf16> to vector<32x64xf32>
    %cst_184 = arith.constant dense<0.000000e+00> : vector<16x64xf32>
    %197 = tpu.matmul %193, %196, %cst_184 {dimension_numbers = #tpu.dot_dimension_numbers<[1], [0], [0], [1], [0, 0, 1, 1], [], []>} : vector<16x32xf32>, vector<32x64xf32>, vector<16x64xf32> -> vector<16x64xf32>
    %198 = arith.addf %190, %197 : vector<16x64xf32>
    %c3_185 = arith.constant 3 : index
    %c0_186 = arith.constant 0 : index
    %c0_187 = arith.constant 0 : index
    %199 = vector.load %arg21[%c3_185, %c0_186, %c0_187] : memref<4x16x8xf32, #tpu.memory_space<vmem>>, vector<1x16x8xf32>
    %200 = vector.shape_cast %199 : vector<1x16x8xf32> to vector<16x8xf32>
    %cst_188 = arith.constant dense<0.000000e+00> : vector<16x32xf32>
    %201 = tpu.matmul %200, %175, %cst_188 {dimension_numbers = #tpu.dot_dimension_numbers<[1], [0], [0], [1], [0, 0, 1, 1], [], []>} : vector<16x8xf32>, vector<8x32xf32>, vector<16x32xf32> -> vector<16x32xf32>
    %c3_189 = arith.constant 3 : index
    %c0_190 = arith.constant 0 : index
    %c0_191 = arith.constant 0 : index
    %202 = vector.load %arg22[%c3_189, %c0_190, %c0_191] : memref<4x32x64xbf16, #tpu.memory_space<vmem>>, vector<1x32x64xbf16>
    %203 = vector.shape_cast %202 : vector<1x32x64xbf16> to vector<32x64xbf16>
    %204 = arith.extf %203 : vector<32x64xbf16> to vector<32x64xf32>
    %cst_192 = arith.constant dense<0.000000e+00> : vector<16x64xf32>
    %205 = tpu.matmul %201, %204, %cst_192 {dimension_numbers = #tpu.dot_dimension_numbers<[1], [0], [0], [1], [0, 0, 1, 1], [], []>} : vector<16x32xf32>, vector<32x64xf32>, vector<16x64xf32> -> vector<16x64xf32>
    %206 = arith.addf %198, %205 : vector<16x64xf32>
    %c0_193 = arith.constant 0 : index
    %c0_194 = arith.constant 0 : index
    %207 = vector.load %arg23[%c0_193, %c0_194] : memref<1x64xf32, #tpu.memory_space<vmem>>, vector<1x64xf32>
    %208 = vector.broadcast %207 : vector<1x64xf32> to vector<16x64xf32>
    %209 = arith.addf %206, %208 : vector<16x64xf32>
    %c0_195 = arith.constant 0 : index
    %c0_196 = arith.constant 0 : index
    %210 = vector.load %arg24[%c0_195, %c0_196] : memref<512x64xf32, #tpu.memory_space<vmem>>, vector<512x64xf32>
    %c0_197 = arith.constant 0 : index
    %c0_198 = arith.constant 0 : index
    %211 = vector.load %arg25[%c0_197, %c0_198] : memref<64x512xf32, #tpu.memory_space<vmem>>, vector<64x512xf32>
    %cst_199 = arith.constant dense<0.000000e+00> : vector<16x512xf32>
    %212 = tpu.matmul %209, %211, %cst_199 {dimension_numbers = #tpu.dot_dimension_numbers<[1], [0], [0], [1], [0, 0, 1, 1], [], []>} : vector<16x64xf32>, vector<64x512xf32>, vector<16x512xf32> -> vector<16x512xf32>
    %c0_200 = arith.constant 0 : index
    %c0_201 = arith.constant 0 : index
    %213 = vector.load %arg26[%c0_200, %c0_201] : memref<1x512xf32, #tpu.memory_space<vmem>>, vector<1x512xf32>
    %cst_202 = arith.constant 2.000000e+00 : f32
    %214 = vector.broadcast %cst_202 : f32 to vector<16x512xf32>
    %215 = arith.mulf %214, %212 : vector<16x512xf32>
    %216 = vector.broadcast %213 : vector<1x512xf32> to vector<16x512xf32>
    %217 = arith.subf %216, %215 : vector<16x512xf32>
    %cst_203 = arith.constant dense<0x7F800000> : vector<16xf32>
    %218 = vector.multi_reduction <minimumf>, %217, %cst_203 [1] : vector<16x512xf32> to vector<16xf32>
    %219 = vector.shape_cast %218 : vector<16xf32> to vector<16x1xf32>
    %220 = tpu.iota {dimensions = array<i32: 1>} : vector<16x512xi32>
    %221 = vector.broadcast %219 : vector<16x1xf32> to vector<16x512xf32>
    %222 = arith.cmpf oeq, %217, %221 : vector<16x512xf32>
    %c512_i32 = arith.constant 512 : i32
    %223 = vector.broadcast %c512_i32 : i32 to vector<16x512xi32>
    %224 = arith.select %222, %220, %223 : vector<16x512xi1>, vector<16x512xi32>
    %cst_204 = arith.constant dense<2147483647> : vector<16xi32>
    %225 = vector.multi_reduction <minsi>, %224, %cst_204 [1] : vector<16x512xi32> to vector<16xi32>
    %226 = vector.shape_cast %225 : vector<16xi32> to vector<16x1xi32>
    %227 = vector.broadcast %226 : vector<16x1xi32> to vector<16x512xi32>
    %228 = arith.cmpi eq, %220, %227 : vector<16x512xi32>
    %229 = arith.extui %228 : vector<16x512xi1> to vector<16x512xi32>
    %230 = arith.sitofp %229 : vector<16x512xi32> to vector<16x512xf32>
    %cst_205 = arith.constant dense<0.000000e+00> : vector<16x64xf32>
    %231 = tpu.matmul %230, %210, %cst_205 {dimension_numbers = #tpu.dot_dimension_numbers<[1], [0], [0], [1], [0, 0, 1, 1], [], []>} : vector<16x512xf32>, vector<512x64xf32>, vector<16x64xf32> -> vector<16x64xf32>
    %c0_206 = arith.constant 0 : index
    %c0_207 = arith.constant 0 : index
    %c0_208 = arith.constant 0 : index
    %232 = vector.load %arg27[%c0_206, %c0_207, %c0_208] : memref<1x16x64xf32, #tpu.memory_space<vmem>>, vector<1x16x64xf32>
    %233 = vector.shape_cast %232 : vector<1x16x64xf32> to vector<16x64xf32>
    %234 = vector.shape_cast %231 : vector<16x64xf32> to vector<1x16x64xf32>
    tpu.vector_store %arg27[%c0_206, %c0_207, %c0_208], %234 {strides = array<i32>} : memref<1x16x64xf32, #tpu.memory_space<vmem>>, vector<1x16x64xf32>,
    %c0_209 = arith.constant 0 : index
    %c0_210 = arith.constant 0 : index
    %c0_211 = arith.constant 0 : index
    %235 = vector.load %arg28[%c0_209, %c0_210, %c0_211] : memref<1x16x1xi32, #tpu.memory_space<vmem>>, vector<1x16x1xi32>
    %236 = vector.shape_cast %235 : vector<1x16x1xi32> to vector<16x1xi32>
    %237 = vector.shape_cast %226 : vector<16x1xi32> to vector<1x16x1xi32>
    tpu.vector_store %arg28[%c0_209, %c0_210, %c0_211], %237 {strides = array<i32>} : memref<1x16x1xi32, #tpu.memory_space<vmem>>, vector<1x16x1xi32>,
    %238 = arith.subf %231, %209 : vector<16x64xf32>
    %239 = arith.mulf %238, %238 : vector<16x64xf32>
    %cst_212 = arith.constant dense<0.000000e+00> : vector<16xf32>
    %240 = vector.multi_reduction <add>, %239, %cst_212 [1] : vector<16x64xf32> to vector<16xf32>
    %241 = vector.shape_cast %240 : vector<16xf32> to vector<16x1xf32>
    %cst_213 = arith.constant dense<0.000000e+00> : vector<1xf32>
    %242 = vector.multi_reduction <add>, %241, %cst_213 [0] : vector<16x1xf32> to vector<1xf32>
    %243 = vector.shape_cast %242 : vector<1xf32> to vector<1x1xf32>
    %244 = vector.shape_cast %243 : vector<1x1xf32> to vector<1x1xf32>
    %245 = vector.broadcast %244 : vector<1x1xf32> to vector<1x128xf32>
    %c0_214 = arith.constant 0 : index
    %c0_215 = arith.constant 0 : index
    %c0_216 = arith.constant 0 : index
    %246 = vector.load %arg29[%c0_214, %c0_215, %c0_216] : memref<1x1x128xf32, #tpu.memory_space<vmem>>, vector<1x1x128xf32>
    %247 = vector.shape_cast %246 : vector<1x1x128xf32> to vector<1x128xf32>
    %248 = vector.shape_cast %245 : vector<1x128xf32> to vector<1x1x128xf32>
    tpu.vector_store %arg29[%c0_214, %c0_215, %c0_216], %248 {strides = array<i32>} : memref<1x1x128xf32, #tpu.memory_space<vmem>>, vector<1x1x128xf32>,
    return
  }
  func.func @transform_0(%arg0: i32) -> (i32, i32, i32) {
    %c0_i32 = arith.constant 0 : i32
    %c0_i32_0 = arith.constant 0 : i32
    %c0_i32_1 = arith.constant 0 : i32
    return %arg0, %c0_i32, %c0_i32_0 : i32, i32, i32
  }
  func.func @transform_1(%arg0: i32) -> (i32, i32, i32) {
    %c0_i32 = arith.constant 0 : i32
    %c0_i32_0 = arith.constant 0 : i32
    %c0_i32_1 = arith.constant 0 : i32
    %c0_i32_2 = arith.constant 0 : i32
    return %c0_i32, %c0_i32_0, %c0_i32_1 : i32, i32, i32
  }
  func.func @transform_2(%arg0: i32) -> (i32, i32, i32) {
    %c0_i32 = arith.constant 0 : i32
    %c0_i32_0 = arith.constant 0 : i32
    %c0_i32_1 = arith.constant 0 : i32
    %c0_i32_2 = arith.constant 0 : i32
    return %c0_i32, %c0_i32_0, %c0_i32_1 : i32, i32, i32
  }
  func.func @transform_3(%arg0: i32) -> (i32, i32) {
    %c0_i32 = arith.constant 0 : i32
    %c0_i32_0 = arith.constant 0 : i32
    %c0_i32_1 = arith.constant 0 : i32
    return %c0_i32, %c0_i32_0 : i32, i32
  }
  func.func @transform_4(%arg0: i32) -> (i32, i32, i32) {
    %c0_i32 = arith.constant 0 : i32
    %c0_i32_0 = arith.constant 0 : i32
    %c0_i32_1 = arith.constant 0 : i32
    %c0_i32_2 = arith.constant 0 : i32
    return %c0_i32, %c0_i32_0, %c0_i32_1 : i32, i32, i32
  }
  func.func @transform_5(%arg0: i32) -> (i32, i32, i32) {
    %c0_i32 = arith.constant 0 : i32
    %c0_i32_0 = arith.constant 0 : i32
    %c0_i32_1 = arith.constant 0 : i32
    %c0_i32_2 = arith.constant 0 : i32
    return %c0_i32, %c0_i32_0, %c0_i32_1 : i32, i32, i32
  }
  func.func @transform_6(%arg0: i32) -> (i32, i32) {
    %c0_i32 = arith.constant 0 : i32
    %c0_i32_0 = arith.constant 0 : i32
    %c0_i32_1 = arith.constant 0 : i32
    return %c0_i32, %c0_i32_0 : i32, i32
  }
  func.func @transform_7(%arg0: i32) -> (i32, i32, i32) {
    %c0_i32 = arith.constant 0 : i32
    %c0_i32_0 = arith.constant 0 : i32
    %c0_i32_1 = arith.constant 0 : i32
    %c0_i32_2 = arith.constant 0 : i32
    return %c0_i32, %c0_i32_0, %c0_i32_1 : i32, i32, i32
  }
  func.func @transform_8(%arg0: i32) -> (i32, i32, i32) {
    %c0_i32 = arith.constant 0 : i32
    %c0_i32_0 = arith.constant 0 : i32
    %c0_i32_1 = arith.constant 0 : i32
    %c0_i32_2 = arith.constant 0 : i32
    return %c0_i32, %c0_i32_0, %c0_i32_1 : i32, i32, i32
  }
  func.func @transform_9(%arg0: i32) -> (i32, i32) {
    %c0_i32 = arith.constant 0 : i32
    %c0_i32_0 = arith.constant 0 : i32
    %c0_i32_1 = arith.constant 0 : i32
    return %c0_i32, %c0_i32_0 : i32, i32
  }
  func.func @transform_10(%arg0: i32) -> (i32, i32, i32) {
    %c0_i32 = arith.constant 0 : i32
    %c0_i32_0 = arith.constant 0 : i32
    %c0_i32_1 = arith.constant 0 : i32
    %c0_i32_2 = arith.constant 0 : i32
    return %c0_i32, %c0_i32_0, %c0_i32_1 : i32, i32, i32
  }
  func.func @transform_11(%arg0: i32) -> (i32, i32, i32) {
    %c0_i32 = arith.constant 0 : i32
    %c0_i32_0 = arith.constant 0 : i32
    %c0_i32_1 = arith.constant 0 : i32
    %c0_i32_2 = arith.constant 0 : i32
    return %c0_i32, %c0_i32_0, %c0_i32_1 : i32, i32, i32
  }
  func.func @transform_12(%arg0: i32) -> (i32, i32) {
    %c0_i32 = arith.constant 0 : i32
    %c0_i32_0 = arith.constant 0 : i32
    %c0_i32_1 = arith.constant 0 : i32
    return %c0_i32, %c0_i32_0 : i32, i32
  }
  func.func @transform_13(%arg0: i32) -> (i32, i32) {
    %c0_i32 = arith.constant 0 : i32
    %c0_i32_0 = arith.constant 0 : i32
    %c0_i32_1 = arith.constant 0 : i32
    return %c0_i32, %c0_i32_0 : i32, i32
  }
  func.func @transform_14(%arg0: i32) -> (i32, i32) {
    %c0_i32 = arith.constant 0 : i32
    %c0_i32_0 = arith.constant 0 : i32
    %c0_i32_1 = arith.constant 0 : i32
    return %c0_i32, %c0_i32_0 : i32, i32
  }
  func.func @transform_15(%arg0: i32) -> (i32, i32, i32) {
    %c0_i32 = arith.constant 0 : i32
    %c0_i32_0 = arith.constant 0 : i32
    %c0_i32_1 = arith.constant 0 : i32
    %c0_i32_2 = arith.constant 0 : i32
    return %c0_i32, %c0_i32_0, %c0_i32_1 : i32, i32, i32
  }
  func.func @transform_16(%arg0: i32) -> (i32, i32, i32) {
    %c0_i32 = arith.constant 0 : i32
    %c0_i32_0 = arith.constant 0 : i32
    %c0_i32_1 = arith.constant 0 : i32
    %c0_i32_2 = arith.constant 0 : i32
    return %c0_i32, %c0_i32_0, %c0_i32_1 : i32, i32, i32
  }
  func.func @transform_17(%arg0: i32) -> (i32, i32) {
    %c0_i32 = arith.constant 0 : i32
    %c0_i32_0 = arith.constant 0 : i32
    %c0_i32_1 = arith.constant 0 : i32
    return %c0_i32, %c0_i32_0 : i32, i32
  }
  func.func @transform_18(%arg0: i32) -> (i32, i32) {
    %c0_i32 = arith.constant 0 : i32
    %c0_i32_0 = arith.constant 0 : i32
    %c0_i32_1 = arith.constant 0 : i32
    return %c0_i32, %c0_i32_0 : i32, i32
  }
  func.func @transform_19(%arg0: i32) -> (i32, i32) {
    %c0_i32 = arith.constant 0 : i32
    %c0_i32_0 = arith.constant 0 : i32
    %c0_i32_1 = arith.constant 0 : i32
    return %c0_i32, %c0_i32_0 : i32, i32
  }
  func.func @transform_20(%arg0: i32) -> (i32, i32, i32) {
    %c0_i32 = arith.constant 0 : i32
    %c0_i32_0 = arith.constant 0 : i32
    %c0_i32_1 = arith.constant 0 : i32
    %c0_i32_2 = arith.constant 0 : i32
    return %c0_i32, %c0_i32_0, %c0_i32_1 : i32, i32, i32
  }
  func.func @transform_21(%arg0: i32) -> (i32, i32, i32) {
    %c0_i32 = arith.constant 0 : i32
    %c0_i32_0 = arith.constant 0 : i32
    %c0_i32_1 = arith.constant 0 : i32
    %c0_i32_2 = arith.constant 0 : i32
    return %c0_i32, %c0_i32_0, %c0_i32_1 : i32, i32, i32
  }
  func.func @transform_22(%arg0: i32) -> (i32, i32) {
    %c0_i32 = arith.constant 0 : i32
    %c0_i32_0 = arith.constant 0 : i32
    %c0_i32_1 = arith.constant 0 : i32
    return %c0_i32, %c0_i32_0 : i32, i32
  }
  func.func @transform_23(%arg0: i32) -> (i32, i32) {
    %c0_i32 = arith.constant 0 : i32
    %c0_i32_0 = arith.constant 0 : i32
    %c0_i32_1 = arith.constant 0 : i32
    return %c0_i32, %c0_i32_0 : i32, i32
  }
  func.func @transform_24(%arg0: i32) -> (i32, i32) {
    %c0_i32 = arith.constant 0 : i32
    %c0_i32_0 = arith.constant 0 : i32
    %c0_i32_1 = arith.constant 0 : i32
    return %c0_i32, %c0_i32_0 : i32, i32
  }
  func.func @transform_25(%arg0: i32) -> (i32, i32) {
    %c0_i32 = arith.constant 0 : i32
    %c0_i32_0 = arith.constant 0 : i32
    %c0_i32_1 = arith.constant 0 : i32
    return %c0_i32, %c0_i32_0 : i32, i32
  }
  func.func @transform_26(%arg0: i32) -> (i32, i32, i32) {
    %c0_i32 = arith.constant 0 : i32
    %c0_i32_0 = arith.constant 0 : i32
    %c0_i32_1 = arith.constant 0 : i32
    return %arg0, %c0_i32, %c0_i32_0 : i32, i32, i32
  }
  func.func @transform_27(%arg0: i32) -> (i32, i32, i32) {
    %c0_i32 = arith.constant 0 : i32
    %c0_i32_0 = arith.constant 0 : i32
    %c0_i32_1 = arith.constant 0 : i32
    return %arg0, %c0_i32, %c0_i32_0 : i32, i32, i32
  }
  func.func @transform_28(%arg0: i32) -> (i32, i32, i32) {
    %c0_i32 = arith.constant 0 : i32
    %c0_i32_0 = arith.constant 0 : i32
    %c0_i32_1 = arith.constant 0 : i32
    return %arg0, %c0_i32, %c0_i32_0 : i32, i32, i32
  }
}

module attributes {stable_mosaic.version = 11 : i64} {
  func.func @_decoder_mse_kernel(%arg0: i32, %arg1: memref<1x8x256xf32, #tpu.memory_space<vmem>>, %arg2: memref<1x16x256xf32, #tpu.memory_space<vmem>>, %arg3: memref<3x8x8xf32, #tpu.memory_space<vmem>>, %arg4: memref<3x256x32xbf16, #tpu.memory_space<vmem>>, %arg5: memref<1x32xf32, #tpu.memory_space<vmem>>, %arg6: memref<3x8x8xf32, #tpu.memory_space<vmem>>, %arg7: memref<3x32x8xbf16, #tpu.memory_space<vmem>>, %arg8: memref<1x8xf32, #tpu.memory_space<vmem>>, %arg9: memref<8x32xbf16, #tpu.memory_space<vmem>>, %arg10: memref<1x32xf32, #tpu.memory_space<vmem>>, %arg11: memref<3x8x8xf32, #tpu.memory_space<vmem>>, %arg12: memref<3x32x8xbf16, #tpu.memory_space<vmem>>, %arg13: memref<1x8xf32, #tpu.memory_space<vmem>>, %arg14: memref<8x32xbf16, #tpu.memory_space<vmem>>, %arg15: memref<1x32xf32, #tpu.memory_space<vmem>>, %arg16: memref<4x8x8xf32, #tpu.memory_space<vmem>>, %arg17: memref<4x32x32xbf16, #tpu.memory_space<vmem>>, %arg18: memref<1x32xf32, #tpu.memory_space<vmem>>, %arg19: memref<4x16x8xf32, #tpu.memory_space<vmem>>, %arg20: memref<4x32x256xbf16, #tpu.memory_space<vmem>>, %arg21: memref<1x256xf32, #tpu.memory_space<vmem>>, %arg22: memref<1x16x256xf32, #tpu.memory_space<vmem>>, %arg23: memref<1x1x128xf32, #tpu.memory_space<vmem>>) attributes {dimension_semantics = [#tpu.dimension_semantics<parallel>], iteration_bounds = array<i64: 2>, scalar_prefetch = 0 : i64, scratch_operands = 0 : i64, tpu.core_type = #tpu.core_type<tc>, window_params = [{transform_indices = @transform_0, window_bounds = array<i64: 1, 8, 256>}, {transform_indices = @transform_1, window_bounds = array<i64: 1, 16, 256>}, {pipeline_mode = #tpu.pipeline_mode<synchronous>, transform_indices = @transform_2, window_bounds = array<i64: 3, 8, 8>}, {pipeline_mode = #tpu.pipeline_mode<synchronous>, transform_indices = @transform_3, window_bounds = array<i64: 3, 256, 32>}, {pipeline_mode = #tpu.pipeline_mode<synchronous>, transform_indices = @transform_4, window_bounds = array<i64: 1, 32>}, {pipeline_mode = #tpu.pipeline_mode<synchronous>, transform_indices = @transform_5, window_bounds = array<i64: 3, 8, 8>}, {pipeline_mode = #tpu.pipeline_mode<synchronous>, transform_indices = @transform_6, window_bounds = array<i64: 3, 32, 8>}, {pipeline_mode = #tpu.pipeline_mode<synchronous>, transform_indices = @transform_7, window_bounds = array<i64: 1, 8>}, {pipeline_mode = #tpu.pipeline_mode<synchronous>, transform_indices = @transform_8, window_bounds = array<i64: 8, 32>}, {pipeline_mode = #tpu.pipeline_mode<synchronous>, transform_indices = @transform_9, window_bounds = array<i64: 1, 32>}, {pipeline_mode = #tpu.pipeline_mode<synchronous>, transform_indices = @transform_10, window_bounds = array<i64: 3, 8, 8>}, {pipeline_mode = #tpu.pipeline_mode<synchronous>, transform_indices = @transform_11, window_bounds = array<i64: 3, 32, 8>}, {pipeline_mode = #tpu.pipeline_mode<synchronous>, transform_indices = @transform_12, window_bounds = array<i64: 1, 8>}, {pipeline_mode = #tpu.pipeline_mode<synchronous>, transform_indices = @transform_13, window_bounds = array<i64: 8, 32>}, {pipeline_mode = #tpu.pipeline_mode<synchronous>, transform_indices = @transform_14, window_bounds = array<i64: 1, 32>}, {pipeline_mode = #tpu.pipeline_mode<synchronous>, transform_indices = @transform_15, window_bounds = array<i64: 4, 8, 8>}, {pipeline_mode = #tpu.pipeline_mode<synchronous>, transform_indices = @transform_16, window_bounds = array<i64: 4, 32, 32>}, {pipeline_mode = #tpu.pipeline_mode<synchronous>, transform_indices = @transform_17, window_bounds = array<i64: 1, 32>}, {pipeline_mode = #tpu.pipeline_mode<synchronous>, transform_indices = @transform_18, window_bounds = array<i64: 4, 16, 8>}, {pipeline_mode = #tpu.pipeline_mode<synchronous>, transform_indices = @transform_19, window_bounds = array<i64: 4, 32, 256>}, {pipeline_mode = #tpu.pipeline_mode<synchronous>, transform_indices = @transform_20, window_bounds = array<i64: 1, 256>}, {transform_indices = @transform_21, window_bounds = array<i64: 1, 16, 256>}, {transform_indices = @transform_22, window_bounds = array<i64: 1, 1, 128>}]} {
    %c0 = arith.constant 0 : index
    %c0_0 = arith.constant 0 : index
    %c0_1 = arith.constant 0 : index
    %0 = vector.load %arg1[%c0, %c0_0, %c0_1] : memref<1x8x256xf32, #tpu.memory_space<vmem>>, vector<1x8x256xf32>
    %1 = vector.shape_cast %0 : vector<1x8x256xf32> to vector<8x256xf32>
    %c0_2 = arith.constant 0 : index
    %c0_3 = arith.constant 0 : index
    %c0_4 = arith.constant 0 : index
    %2 = vector.load %arg3[%c0_2, %c0_3, %c0_4] : memref<3x8x8xf32, #tpu.memory_space<vmem>>, vector<1x8x8xf32>
    %3 = vector.shape_cast %2 : vector<1x8x8xf32> to vector<8x8xf32>
    %cst = arith.constant dense<0.000000e+00> : vector<8x256xf32>
    %4 = tpu.matmul %3, %1, %cst {dimension_numbers = #tpu.dot_dimension_numbers<[1], [0], [0], [1], [0, 0, 1, 1], [], []>} : vector<8x8xf32>, vector<8x256xf32>, vector<8x256xf32> -> vector<8x256xf32>
    %c0_5 = arith.constant 0 : index
    %c0_6 = arith.constant 0 : index
    %c0_7 = arith.constant 0 : index
    %5 = vector.load %arg4[%c0_5, %c0_6, %c0_7] : memref<3x256x32xbf16, #tpu.memory_space<vmem>>, vector<1x256x32xbf16>
    %6 = vector.shape_cast %5 : vector<1x256x32xbf16> to vector<256x32xbf16>
    %7 = arith.extf %6 : vector<256x32xbf16> to vector<256x32xf32>
    %cst_8 = arith.constant dense<0.000000e+00> : vector<8x32xf32>
    %8 = tpu.matmul %4, %7, %cst_8 {dimension_numbers = #tpu.dot_dimension_numbers<[1], [0], [0], [1], [0, 0, 1, 1], [], []>} : vector<8x256xf32>, vector<256x32xf32>, vector<8x32xf32> -> vector<8x32xf32>
    %c1 = arith.constant 1 : index
    %c0_9 = arith.constant 0 : index
    %c0_10 = arith.constant 0 : index
    %9 = vector.load %arg3[%c1, %c0_9, %c0_10] : memref<3x8x8xf32, #tpu.memory_space<vmem>>, vector<1x8x8xf32>
    %10 = vector.shape_cast %9 : vector<1x8x8xf32> to vector<8x8xf32>
    %cst_11 = arith.constant dense<0.000000e+00> : vector<8x256xf32>
    %11 = tpu.matmul %10, %1, %cst_11 {dimension_numbers = #tpu.dot_dimension_numbers<[1], [0], [0], [1], [0, 0, 1, 1], [], []>} : vector<8x8xf32>, vector<8x256xf32>, vector<8x256xf32> -> vector<8x256xf32>
    %c1_12 = arith.constant 1 : index
    %c0_13 = arith.constant 0 : index
    %c0_14 = arith.constant 0 : index
    %12 = vector.load %arg4[%c1_12, %c0_13, %c0_14] : memref<3x256x32xbf16, #tpu.memory_space<vmem>>, vector<1x256x32xbf16>
    %13 = vector.shape_cast %12 : vector<1x256x32xbf16> to vector<256x32xbf16>
    %14 = arith.extf %13 : vector<256x32xbf16> to vector<256x32xf32>
    %cst_15 = arith.constant dense<0.000000e+00> : vector<8x32xf32>
    %15 = tpu.matmul %11, %14, %cst_15 {dimension_numbers = #tpu.dot_dimension_numbers<[1], [0], [0], [1], [0, 0, 1, 1], [], []>} : vector<8x256xf32>, vector<256x32xf32>, vector<8x32xf32> -> vector<8x32xf32>
    %16 = arith.addf %8, %15 : vector<8x32xf32>
    %c2 = arith.constant 2 : index
    %c0_16 = arith.constant 0 : index
    %c0_17 = arith.constant 0 : index
    %17 = vector.load %arg3[%c2, %c0_16, %c0_17] : memref<3x8x8xf32, #tpu.memory_space<vmem>>, vector<1x8x8xf32>
    %18 = vector.shape_cast %17 : vector<1x8x8xf32> to vector<8x8xf32>
    %cst_18 = arith.constant dense<0.000000e+00> : vector<8x256xf32>
    %19 = tpu.matmul %18, %1, %cst_18 {dimension_numbers = #tpu.dot_dimension_numbers<[1], [0], [0], [1], [0, 0, 1, 1], [], []>} : vector<8x8xf32>, vector<8x256xf32>, vector<8x256xf32> -> vector<8x256xf32>
    %c2_19 = arith.constant 2 : index
    %c0_20 = arith.constant 0 : index
    %c0_21 = arith.constant 0 : index
    %20 = vector.load %arg4[%c2_19, %c0_20, %c0_21] : memref<3x256x32xbf16, #tpu.memory_space<vmem>>, vector<1x256x32xbf16>
    %21 = vector.shape_cast %20 : vector<1x256x32xbf16> to vector<256x32xbf16>
    %22 = arith.extf %21 : vector<256x32xbf16> to vector<256x32xf32>
    %cst_22 = arith.constant dense<0.000000e+00> : vector<8x32xf32>
    %23 = tpu.matmul %19, %22, %cst_22 {dimension_numbers = #tpu.dot_dimension_numbers<[1], [0], [0], [1], [0, 0, 1, 1], [], []>} : vector<8x256xf32>, vector<256x32xf32>, vector<8x32xf32> -> vector<8x32xf32>
    %24 = arith.addf %16, %23 : vector<8x32xf32>
    %c0_23 = arith.constant 0 : index
    %c0_24 = arith.constant 0 : index
    %25 = vector.load %arg5[%c0_23, %c0_24] : memref<1x32xf32, #tpu.memory_space<vmem>>, vector<1x32xf32>
    %26 = vector.broadcast %25 : vector<1x32xf32> to vector<8x32xf32>
    %27 = arith.addf %24, %26 : vector<8x32xf32>
    %cst_25 = arith.constant 0.000000e+00 : f32
    %28 = vector.broadcast %cst_25 : f32 to vector<8x32xf32>
    %29 = arith.maximumf %27, %28 : vector<8x32xf32>
    %cst_26 = arith.constant 0.000000e+00 : f32
    %30 = vector.broadcast %cst_26 : f32 to vector<8x32xf32>
    %31 = arith.maximumf %29, %30 : vector<8x32xf32>
    %c0_27 = arith.constant 0 : index
    %c0_28 = arith.constant 0 : index
    %c0_29 = arith.constant 0 : index
    %32 = vector.load %arg6[%c0_27, %c0_28, %c0_29] : memref<3x8x8xf32, #tpu.memory_space<vmem>>, vector<1x8x8xf32>
    %33 = vector.shape_cast %32 : vector<1x8x8xf32> to vector<8x8xf32>
    %cst_30 = arith.constant dense<0.000000e+00> : vector<8x32xf32>
    %34 = tpu.matmul %33, %31, %cst_30 {dimension_numbers = #tpu.dot_dimension_numbers<[1], [0], [0], [1], [0, 0, 1, 1], [], []>} : vector<8x8xf32>, vector<8x32xf32>, vector<8x32xf32> -> vector<8x32xf32>
    %c0_31 = arith.constant 0 : index
    %c0_32 = arith.constant 0 : index
    %c0_33 = arith.constant 0 : index
    %35 = vector.load %arg7[%c0_31, %c0_32, %c0_33] : memref<3x32x8xbf16, #tpu.memory_space<vmem>>, vector<1x32x8xbf16>
    %36 = vector.shape_cast %35 : vector<1x32x8xbf16> to vector<32x8xbf16>
    %37 = arith.extf %36 : vector<32x8xbf16> to vector<32x8xf32>
    %cst_34 = arith.constant dense<0.000000e+00> : vector<8x8xf32>
    %38 = tpu.matmul %34, %37, %cst_34 {dimension_numbers = #tpu.dot_dimension_numbers<[1], [0], [0], [1], [0, 0, 1, 1], [], []>} : vector<8x32xf32>, vector<32x8xf32>, vector<8x8xf32> -> vector<8x8xf32>
    %c1_35 = arith.constant 1 : index
    %c0_36 = arith.constant 0 : index
    %c0_37 = arith.constant 0 : index
    %39 = vector.load %arg6[%c1_35, %c0_36, %c0_37] : memref<3x8x8xf32, #tpu.memory_space<vmem>>, vector<1x8x8xf32>
    %40 = vector.shape_cast %39 : vector<1x8x8xf32> to vector<8x8xf32>
    %cst_38 = arith.constant dense<0.000000e+00> : vector<8x32xf32>
    %41 = tpu.matmul %40, %31, %cst_38 {dimension_numbers = #tpu.dot_dimension_numbers<[1], [0], [0], [1], [0, 0, 1, 1], [], []>} : vector<8x8xf32>, vector<8x32xf32>, vector<8x32xf32> -> vector<8x32xf32>
    %c1_39 = arith.constant 1 : index
    %c0_40 = arith.constant 0 : index
    %c0_41 = arith.constant 0 : index
    %42 = vector.load %arg7[%c1_39, %c0_40, %c0_41] : memref<3x32x8xbf16, #tpu.memory_space<vmem>>, vector<1x32x8xbf16>
    %43 = vector.shape_cast %42 : vector<1x32x8xbf16> to vector<32x8xbf16>
    %44 = arith.extf %43 : vector<32x8xbf16> to vector<32x8xf32>
    %cst_42 = arith.constant dense<0.000000e+00> : vector<8x8xf32>
    %45 = tpu.matmul %41, %44, %cst_42 {dimension_numbers = #tpu.dot_dimension_numbers<[1], [0], [0], [1], [0, 0, 1, 1], [], []>} : vector<8x32xf32>, vector<32x8xf32>, vector<8x8xf32> -> vector<8x8xf32>
    %46 = arith.addf %38, %45 : vector<8x8xf32>
    %c2_43 = arith.constant 2 : index
    %c0_44 = arith.constant 0 : index
    %c0_45 = arith.constant 0 : index
    %47 = vector.load %arg6[%c2_43, %c0_44, %c0_45] : memref<3x8x8xf32, #tpu.memory_space<vmem>>, vector<1x8x8xf32>
    %48 = vector.shape_cast %47 : vector<1x8x8xf32> to vector<8x8xf32>
    %cst_46 = arith.constant dense<0.000000e+00> : vector<8x32xf32>
    %49 = tpu.matmul %48, %31, %cst_46 {dimension_numbers = #tpu.dot_dimension_numbers<[1], [0], [0], [1], [0, 0, 1, 1], [], []>} : vector<8x8xf32>, vector<8x32xf32>, vector<8x32xf32> -> vector<8x32xf32>
    %c2_47 = arith.constant 2 : index
    %c0_48 = arith.constant 0 : index
    %c0_49 = arith.constant 0 : index
    %50 = vector.load %arg7[%c2_47, %c0_48, %c0_49] : memref<3x32x8xbf16, #tpu.memory_space<vmem>>, vector<1x32x8xbf16>
    %51 = vector.shape_cast %50 : vector<1x32x8xbf16> to vector<32x8xbf16>
    %52 = arith.extf %51 : vector<32x8xbf16> to vector<32x8xf32>
    %cst_50 = arith.constant dense<0.000000e+00> : vector<8x8xf32>
    %53 = tpu.matmul %49, %52, %cst_50 {dimension_numbers = #tpu.dot_dimension_numbers<[1], [0], [0], [1], [0, 0, 1, 1], [], []>} : vector<8x32xf32>, vector<32x8xf32>, vector<8x8xf32> -> vector<8x8xf32>
    %54 = arith.addf %46, %53 : vector<8x8xf32>
    %c0_51 = arith.constant 0 : index
    %c0_52 = arith.constant 0 : index
    %55 = vector.load %arg8[%c0_51, %c0_52] : memref<1x8xf32, #tpu.memory_space<vmem>>, vector<1x8xf32>
    %56 = vector.broadcast %55 : vector<1x8xf32> to vector<8x8xf32>
    %57 = arith.addf %54, %56 : vector<8x8xf32>
    %cst_53 = arith.constant 0.000000e+00 : f32
    %58 = vector.broadcast %cst_53 : f32 to vector<8x8xf32>
    %59 = arith.maximumf %57, %58 : vector<8x8xf32>
    %c0_54 = arith.constant 0 : index
    %c0_55 = arith.constant 0 : index
    %60 = vector.load %arg9[%c0_54, %c0_55] : memref<8x32xbf16, #tpu.memory_space<vmem>>, vector<8x32xbf16>
    %61 = arith.extf %60 : vector<8x32xbf16> to vector<8x32xf32>
    %cst_56 = arith.constant dense<0.000000e+00> : vector<8x32xf32>
    %62 = tpu.matmul %59, %61, %cst_56 {dimension_numbers = #tpu.dot_dimension_numbers<[1], [0], [0], [1], [0, 0, 1, 1], [], []>} : vector<8x8xf32>, vector<8x32xf32>, vector<8x32xf32> -> vector<8x32xf32>
    %63 = arith.addf %29, %62 : vector<8x32xf32>
    %c0_57 = arith.constant 0 : index
    %c0_58 = arith.constant 0 : index
    %64 = vector.load %arg10[%c0_57, %c0_58] : memref<1x32xf32, #tpu.memory_space<vmem>>, vector<1x32xf32>
    %65 = vector.broadcast %64 : vector<1x32xf32> to vector<8x32xf32>
    %66 = arith.addf %63, %65 : vector<8x32xf32>
    %cst_59 = arith.constant 0.000000e+00 : f32
    %67 = vector.broadcast %cst_59 : f32 to vector<8x32xf32>
    %68 = arith.maximumf %66, %67 : vector<8x32xf32>
    %c0_60 = arith.constant 0 : index
    %c0_61 = arith.constant 0 : index
    %c0_62 = arith.constant 0 : index
    %69 = vector.load %arg11[%c0_60, %c0_61, %c0_62] : memref<3x8x8xf32, #tpu.memory_space<vmem>>, vector<1x8x8xf32>
    %70 = vector.shape_cast %69 : vector<1x8x8xf32> to vector<8x8xf32>
    %cst_63 = arith.constant dense<0.000000e+00> : vector<8x32xf32>
    %71 = tpu.matmul %70, %68, %cst_63 {dimension_numbers = #tpu.dot_dimension_numbers<[1], [0], [0], [1], [0, 0, 1, 1], [], []>} : vector<8x8xf32>, vector<8x32xf32>, vector<8x32xf32> -> vector<8x32xf32>
    %c0_64 = arith.constant 0 : index
    %c0_65 = arith.constant 0 : index
    %c0_66 = arith.constant 0 : index
    %72 = vector.load %arg12[%c0_64, %c0_65, %c0_66] : memref<3x32x8xbf16, #tpu.memory_space<vmem>>, vector<1x32x8xbf16>
    %73 = vector.shape_cast %72 : vector<1x32x8xbf16> to vector<32x8xbf16>
    %74 = arith.extf %73 : vector<32x8xbf16> to vector<32x8xf32>
    %cst_67 = arith.constant dense<0.000000e+00> : vector<8x8xf32>
    %75 = tpu.matmul %71, %74, %cst_67 {dimension_numbers = #tpu.dot_dimension_numbers<[1], [0], [0], [1], [0, 0, 1, 1], [], []>} : vector<8x32xf32>, vector<32x8xf32>, vector<8x8xf32> -> vector<8x8xf32>
    %c1_68 = arith.constant 1 : index
    %c0_69 = arith.constant 0 : index
    %c0_70 = arith.constant 0 : index
    %76 = vector.load %arg11[%c1_68, %c0_69, %c0_70] : memref<3x8x8xf32, #tpu.memory_space<vmem>>, vector<1x8x8xf32>
    %77 = vector.shape_cast %76 : vector<1x8x8xf32> to vector<8x8xf32>
    %cst_71 = arith.constant dense<0.000000e+00> : vector<8x32xf32>
    %78 = tpu.matmul %77, %68, %cst_71 {dimension_numbers = #tpu.dot_dimension_numbers<[1], [0], [0], [1], [0, 0, 1, 1], [], []>} : vector<8x8xf32>, vector<8x32xf32>, vector<8x32xf32> -> vector<8x32xf32>
    %c1_72 = arith.constant 1 : index
    %c0_73 = arith.constant 0 : index
    %c0_74 = arith.constant 0 : index
    %79 = vector.load %arg12[%c1_72, %c0_73, %c0_74] : memref<3x32x8xbf16, #tpu.memory_space<vmem>>, vector<1x32x8xbf16>
    %80 = vector.shape_cast %79 : vector<1x32x8xbf16> to vector<32x8xbf16>
    %81 = arith.extf %80 : vector<32x8xbf16> to vector<32x8xf32>
    %cst_75 = arith.constant dense<0.000000e+00> : vector<8x8xf32>
    %82 = tpu.matmul %78, %81, %cst_75 {dimension_numbers = #tpu.dot_dimension_numbers<[1], [0], [0], [1], [0, 0, 1, 1], [], []>} : vector<8x32xf32>, vector<32x8xf32>, vector<8x8xf32> -> vector<8x8xf32>
    %83 = arith.addf %75, %82 : vector<8x8xf32>
    %c2_76 = arith.constant 2 : index
    %c0_77 = arith.constant 0 : index
    %c0_78 = arith.constant 0 : index
    %84 = vector.load %arg11[%c2_76, %c0_77, %c0_78] : memref<3x8x8xf32, #tpu.memory_space<vmem>>, vector<1x8x8xf32>
    %85 = vector.shape_cast %84 : vector<1x8x8xf32> to vector<8x8xf32>
    %cst_79 = arith.constant dense<0.000000e+00> : vector<8x32xf32>
    %86 = tpu.matmul %85, %68, %cst_79 {dimension_numbers = #tpu.dot_dimension_numbers<[1], [0], [0], [1], [0, 0, 1, 1], [], []>} : vector<8x8xf32>, vector<8x32xf32>, vector<8x32xf32> -> vector<8x32xf32>
    %c2_80 = arith.constant 2 : index
    %c0_81 = arith.constant 0 : index
    %c0_82 = arith.constant 0 : index
    %87 = vector.load %arg12[%c2_80, %c0_81, %c0_82] : memref<3x32x8xbf16, #tpu.memory_space<vmem>>, vector<1x32x8xbf16>
    %88 = vector.shape_cast %87 : vector<1x32x8xbf16> to vector<32x8xbf16>
    %89 = arith.extf %88 : vector<32x8xbf16> to vector<32x8xf32>
    %cst_83 = arith.constant dense<0.000000e+00> : vector<8x8xf32>
    %90 = tpu.matmul %86, %89, %cst_83 {dimension_numbers = #tpu.dot_dimension_numbers<[1], [0], [0], [1], [0, 0, 1, 1], [], []>} : vector<8x32xf32>, vector<32x8xf32>, vector<8x8xf32> -> vector<8x8xf32>
    %91 = arith.addf %83, %90 : vector<8x8xf32>
    %c0_84 = arith.constant 0 : index
    %c0_85 = arith.constant 0 : index
    %92 = vector.load %arg13[%c0_84, %c0_85] : memref<1x8xf32, #tpu.memory_space<vmem>>, vector<1x8xf32>
    %93 = vector.broadcast %92 : vector<1x8xf32> to vector<8x8xf32>
    %94 = arith.addf %91, %93 : vector<8x8xf32>
    %cst_86 = arith.constant 0.000000e+00 : f32
    %95 = vector.broadcast %cst_86 : f32 to vector<8x8xf32>
    %96 = arith.maximumf %94, %95 : vector<8x8xf32>
    %c0_87 = arith.constant 0 : index
    %c0_88 = arith.constant 0 : index
    %97 = vector.load %arg14[%c0_87, %c0_88] : memref<8x32xbf16, #tpu.memory_space<vmem>>, vector<8x32xbf16>
    %98 = arith.extf %97 : vector<8x32xbf16> to vector<8x32xf32>
    %cst_89 = arith.constant dense<0.000000e+00> : vector<8x32xf32>
    %99 = tpu.matmul %96, %98, %cst_89 {dimension_numbers = #tpu.dot_dimension_numbers<[1], [0], [0], [1], [0, 0, 1, 1], [], []>} : vector<8x8xf32>, vector<8x32xf32>, vector<8x32xf32> -> vector<8x32xf32>
    %100 = arith.addf %66, %99 : vector<8x32xf32>
    %c0_90 = arith.constant 0 : index
    %c0_91 = arith.constant 0 : index
    %101 = vector.load %arg15[%c0_90, %c0_91] : memref<1x32xf32, #tpu.memory_space<vmem>>, vector<1x32xf32>
    %102 = vector.broadcast %101 : vector<1x32xf32> to vector<8x32xf32>
    %103 = arith.addf %100, %102 : vector<8x32xf32>
    %c0_92 = arith.constant 0 : index
    %c0_93 = arith.constant 0 : index
    %c0_94 = arith.constant 0 : index
    %104 = vector.load %arg16[%c0_92, %c0_93, %c0_94] : memref<4x8x8xf32, #tpu.memory_space<vmem>>, vector<1x8x8xf32>
    %105 = vector.shape_cast %104 : vector<1x8x8xf32> to vector<8x8xf32>
    %cst_95 = arith.constant dense<0.000000e+00> : vector<8x32xf32>
    %106 = tpu.matmul %105, %103, %cst_95 {dimension_numbers = #tpu.dot_dimension_numbers<[1], [0], [0], [1], [0, 0, 1, 1], [], []>} : vector<8x8xf32>, vector<8x32xf32>, vector<8x32xf32> -> vector<8x32xf32>
    %c0_96 = arith.constant 0 : index
    %c0_97 = arith.constant 0 : index
    %c0_98 = arith.constant 0 : index
    %107 = vector.load %arg17[%c0_96, %c0_97, %c0_98] : memref<4x32x32xbf16, #tpu.memory_space<vmem>>, vector<1x32x32xbf16>
    %108 = vector.shape_cast %107 : vector<1x32x32xbf16> to vector<32x32xbf16>
    %109 = arith.extf %108 : vector<32x32xbf16> to vector<32x32xf32>
    %cst_99 = arith.constant dense<0.000000e+00> : vector<8x32xf32>
    %110 = tpu.matmul %106, %109, %cst_99 {dimension_numbers = #tpu.dot_dimension_numbers<[1], [0], [0], [1], [0, 0, 1, 1], [], []>} : vector<8x32xf32>, vector<32x32xf32>, vector<8x32xf32> -> vector<8x32xf32>
    %c1_100 = arith.constant 1 : index
    %c0_101 = arith.constant 0 : index
    %c0_102 = arith.constant 0 : index
    %111 = vector.load %arg16[%c1_100, %c0_101, %c0_102] : memref<4x8x8xf32, #tpu.memory_space<vmem>>, vector<1x8x8xf32>
    %112 = vector.shape_cast %111 : vector<1x8x8xf32> to vector<8x8xf32>
    %cst_103 = arith.constant dense<0.000000e+00> : vector<8x32xf32>
    %113 = tpu.matmul %112, %103, %cst_103 {dimension_numbers = #tpu.dot_dimension_numbers<[1], [0], [0], [1], [0, 0, 1, 1], [], []>} : vector<8x8xf32>, vector<8x32xf32>, vector<8x32xf32> -> vector<8x32xf32>
    %c1_104 = arith.constant 1 : index
    %c0_105 = arith.constant 0 : index
    %c0_106 = arith.constant 0 : index
    %114 = vector.load %arg17[%c1_104, %c0_105, %c0_106] : memref<4x32x32xbf16, #tpu.memory_space<vmem>>, vector<1x32x32xbf16>
    %115 = vector.shape_cast %114 : vector<1x32x32xbf16> to vector<32x32xbf16>
    %116 = arith.extf %115 : vector<32x32xbf16> to vector<32x32xf32>
    %cst_107 = arith.constant dense<0.000000e+00> : vector<8x32xf32>
    %117 = tpu.matmul %113, %116, %cst_107 {dimension_numbers = #tpu.dot_dimension_numbers<[1], [0], [0], [1], [0, 0, 1, 1], [], []>} : vector<8x32xf32>, vector<32x32xf32>, vector<8x32xf32> -> vector<8x32xf32>
    %118 = arith.addf %110, %117 : vector<8x32xf32>
    %c2_108 = arith.constant 2 : index
    %c0_109 = arith.constant 0 : index
    %c0_110 = arith.constant 0 : index
    %119 = vector.load %arg16[%c2_108, %c0_109, %c0_110] : memref<4x8x8xf32, #tpu.memory_space<vmem>>, vector<1x8x8xf32>
    %120 = vector.shape_cast %119 : vector<1x8x8xf32> to vector<8x8xf32>
    %cst_111 = arith.constant dense<0.000000e+00> : vector<8x32xf32>
    %121 = tpu.matmul %120, %103, %cst_111 {dimension_numbers = #tpu.dot_dimension_numbers<[1], [0], [0], [1], [0, 0, 1, 1], [], []>} : vector<8x8xf32>, vector<8x32xf32>, vector<8x32xf32> -> vector<8x32xf32>
    %c2_112 = arith.constant 2 : index
    %c0_113 = arith.constant 0 : index
    %c0_114 = arith.constant 0 : index
    %122 = vector.load %arg17[%c2_112, %c0_113, %c0_114] : memref<4x32x32xbf16, #tpu.memory_space<vmem>>, vector<1x32x32xbf16>
    %123 = vector.shape_cast %122 : vector<1x32x32xbf16> to vector<32x32xbf16>
    %124 = arith.extf %123 : vector<32x32xbf16> to vector<32x32xf32>
    %cst_115 = arith.constant dense<0.000000e+00> : vector<8x32xf32>
    %125 = tpu.matmul %121, %124, %cst_115 {dimension_numbers = #tpu.dot_dimension_numbers<[1], [0], [0], [1], [0, 0, 1, 1], [], []>} : vector<8x32xf32>, vector<32x32xf32>, vector<8x32xf32> -> vector<8x32xf32>
    %126 = arith.addf %118, %125 : vector<8x32xf32>
    %c3 = arith.constant 3 : index
    %c0_116 = arith.constant 0 : index
    %c0_117 = arith.constant 0 : index
    %127 = vector.load %arg16[%c3, %c0_116, %c0_117] : memref<4x8x8xf32, #tpu.memory_space<vmem>>, vector<1x8x8xf32>
    %128 = vector.shape_cast %127 : vector<1x8x8xf32> to vector<8x8xf32>
    %cst_118 = arith.constant dense<0.000000e+00> : vector<8x32xf32>
    %129 = tpu.matmul %128, %103, %cst_118 {dimension_numbers = #tpu.dot_dimension_numbers<[1], [0], [0], [1], [0, 0, 1, 1], [], []>} : vector<8x8xf32>, vector<8x32xf32>, vector<8x32xf32> -> vector<8x32xf32>
    %c3_119 = arith.constant 3 : index
    %c0_120 = arith.constant 0 : index
    %c0_121 = arith.constant 0 : index
    %130 = vector.load %arg17[%c3_119, %c0_120, %c0_121] : memref<4x32x32xbf16, #tpu.memory_space<vmem>>, vector<1x32x32xbf16>
    %131 = vector.shape_cast %130 : vector<1x32x32xbf16> to vector<32x32xbf16>
    %132 = arith.extf %131 : vector<32x32xbf16> to vector<32x32xf32>
    %cst_122 = arith.constant dense<0.000000e+00> : vector<8x32xf32>
    %133 = tpu.matmul %129, %132, %cst_122 {dimension_numbers = #tpu.dot_dimension_numbers<[1], [0], [0], [1], [0, 0, 1, 1], [], []>} : vector<8x32xf32>, vector<32x32xf32>, vector<8x32xf32> -> vector<8x32xf32>
    %134 = arith.addf %126, %133 : vector<8x32xf32>
    %c0_123 = arith.constant 0 : index
    %c0_124 = arith.constant 0 : index
    %135 = vector.load %arg18[%c0_123, %c0_124] : memref<1x32xf32, #tpu.memory_space<vmem>>, vector<1x32xf32>
    %136 = vector.broadcast %135 : vector<1x32xf32> to vector<8x32xf32>
    %137 = arith.addf %134, %136 : vector<8x32xf32>
    %cst_125 = arith.constant 0.000000e+00 : f32
    %138 = vector.broadcast %cst_125 : f32 to vector<8x32xf32>
    %139 = arith.maximumf %137, %138 : vector<8x32xf32>
    %c0_126 = arith.constant 0 : index
    %c0_127 = arith.constant 0 : index
    %c0_128 = arith.constant 0 : index
    %140 = vector.load %arg19[%c0_126, %c0_127, %c0_128] : memref<4x16x8xf32, #tpu.memory_space<vmem>>, vector<1x16x8xf32>
    %141 = vector.shape_cast %140 : vector<1x16x8xf32> to vector<16x8xf32>
    %cst_129 = arith.constant dense<0.000000e+00> : vector<16x32xf32>
    %142 = tpu.matmul %141, %139, %cst_129 {dimension_numbers = #tpu.dot_dimension_numbers<[1], [0], [0], [1], [0, 0, 1, 1], [], []>} : vector<16x8xf32>, vector<8x32xf32>, vector<16x32xf32> -> vector<16x32xf32>
    %c0_130 = arith.constant 0 : index
    %c0_131 = arith.constant 0 : index
    %c0_132 = arith.constant 0 : index
    %143 = vector.load %arg20[%c0_130, %c0_131, %c0_132] : memref<4x32x256xbf16, #tpu.memory_space<vmem>>, vector<1x32x256xbf16>
    %144 = vector.shape_cast %143 : vector<1x32x256xbf16> to vector<32x256xbf16>
    %145 = arith.extf %144 : vector<32x256xbf16> to vector<32x256xf32>
    %cst_133 = arith.constant dense<0.000000e+00> : vector<16x256xf32>
    %146 = tpu.matmul %142, %145, %cst_133 {dimension_numbers = #tpu.dot_dimension_numbers<[1], [0], [0], [1], [0, 0, 1, 1], [], []>} : vector<16x32xf32>, vector<32x256xf32>, vector<16x256xf32> -> vector<16x256xf32>
    %c1_134 = arith.constant 1 : index
    %c0_135 = arith.constant 0 : index
    %c0_136 = arith.constant 0 : index
    %147 = vector.load %arg19[%c1_134, %c0_135, %c0_136] : memref<4x16x8xf32, #tpu.memory_space<vmem>>, vector<1x16x8xf32>
    %148 = vector.shape_cast %147 : vector<1x16x8xf32> to vector<16x8xf32>
    %cst_137 = arith.constant dense<0.000000e+00> : vector<16x32xf32>
    %149 = tpu.matmul %148, %139, %cst_137 {dimension_numbers = #tpu.dot_dimension_numbers<[1], [0], [0], [1], [0, 0, 1, 1], [], []>} : vector<16x8xf32>, vector<8x32xf32>, vector<16x32xf32> -> vector<16x32xf32>
    %c1_138 = arith.constant 1 : index
    %c0_139 = arith.constant 0 : index
    %c0_140 = arith.constant 0 : index
    %150 = vector.load %arg20[%c1_138, %c0_139, %c0_140] : memref<4x32x256xbf16, #tpu.memory_space<vmem>>, vector<1x32x256xbf16>
    %151 = vector.shape_cast %150 : vector<1x32x256xbf16> to vector<32x256xbf16>
    %152 = arith.extf %151 : vector<32x256xbf16> to vector<32x256xf32>
    %cst_141 = arith.constant dense<0.000000e+00> : vector<16x256xf32>
    %153 = tpu.matmul %149, %152, %cst_141 {dimension_numbers = #tpu.dot_dimension_numbers<[1], [0], [0], [1], [0, 0, 1, 1], [], []>} : vector<16x32xf32>, vector<32x256xf32>, vector<16x256xf32> -> vector<16x256xf32>
    %154 = arith.addf %146, %153 : vector<16x256xf32>
    %c2_142 = arith.constant 2 : index
    %c0_143 = arith.constant 0 : index
    %c0_144 = arith.constant 0 : index
    %155 = vector.load %arg19[%c2_142, %c0_143, %c0_144] : memref<4x16x8xf32, #tpu.memory_space<vmem>>, vector<1x16x8xf32>
    %156 = vector.shape_cast %155 : vector<1x16x8xf32> to vector<16x8xf32>
    %cst_145 = arith.constant dense<0.000000e+00> : vector<16x32xf32>
    %157 = tpu.matmul %156, %139, %cst_145 {dimension_numbers = #tpu.dot_dimension_numbers<[1], [0], [0], [1], [0, 0, 1, 1], [], []>} : vector<16x8xf32>, vector<8x32xf32>, vector<16x32xf32> -> vector<16x32xf32>
    %c2_146 = arith.constant 2 : index
    %c0_147 = arith.constant 0 : index
    %c0_148 = arith.constant 0 : index
    %158 = vector.load %arg20[%c2_146, %c0_147, %c0_148] : memref<4x32x256xbf16, #tpu.memory_space<vmem>>, vector<1x32x256xbf16>
    %159 = vector.shape_cast %158 : vector<1x32x256xbf16> to vector<32x256xbf16>
    %160 = arith.extf %159 : vector<32x256xbf16> to vector<32x256xf32>
    %cst_149 = arith.constant dense<0.000000e+00> : vector<16x256xf32>
    %161 = tpu.matmul %157, %160, %cst_149 {dimension_numbers = #tpu.dot_dimension_numbers<[1], [0], [0], [1], [0, 0, 1, 1], [], []>} : vector<16x32xf32>, vector<32x256xf32>, vector<16x256xf32> -> vector<16x256xf32>
    %162 = arith.addf %154, %161 : vector<16x256xf32>
    %c3_150 = arith.constant 3 : index
    %c0_151 = arith.constant 0 : index
    %c0_152 = arith.constant 0 : index
    %163 = vector.load %arg19[%c3_150, %c0_151, %c0_152] : memref<4x16x8xf32, #tpu.memory_space<vmem>>, vector<1x16x8xf32>
    %164 = vector.shape_cast %163 : vector<1x16x8xf32> to vector<16x8xf32>
    %cst_153 = arith.constant dense<0.000000e+00> : vector<16x32xf32>
    %165 = tpu.matmul %164, %139, %cst_153 {dimension_numbers = #tpu.dot_dimension_numbers<[1], [0], [0], [1], [0, 0, 1, 1], [], []>} : vector<16x8xf32>, vector<8x32xf32>, vector<16x32xf32> -> vector<16x32xf32>
    %c3_154 = arith.constant 3 : index
    %c0_155 = arith.constant 0 : index
    %c0_156 = arith.constant 0 : index
    %166 = vector.load %arg20[%c3_154, %c0_155, %c0_156] : memref<4x32x256xbf16, #tpu.memory_space<vmem>>, vector<1x32x256xbf16>
    %167 = vector.shape_cast %166 : vector<1x32x256xbf16> to vector<32x256xbf16>
    %168 = arith.extf %167 : vector<32x256xbf16> to vector<32x256xf32>
    %cst_157 = arith.constant dense<0.000000e+00> : vector<16x256xf32>
    %169 = tpu.matmul %165, %168, %cst_157 {dimension_numbers = #tpu.dot_dimension_numbers<[1], [0], [0], [1], [0, 0, 1, 1], [], []>} : vector<16x32xf32>, vector<32x256xf32>, vector<16x256xf32> -> vector<16x256xf32>
    %170 = arith.addf %162, %169 : vector<16x256xf32>
    %c0_158 = arith.constant 0 : index
    %c0_159 = arith.constant 0 : index
    %171 = vector.load %arg21[%c0_158, %c0_159] : memref<1x256xf32, #tpu.memory_space<vmem>>, vector<1x256xf32>
    %172 = vector.broadcast %171 : vector<1x256xf32> to vector<16x256xf32>
    %173 = arith.addf %170, %172 : vector<16x256xf32>
    %c0_160 = arith.constant 0 : index
    %c0_161 = arith.constant 0 : index
    %c0_162 = arith.constant 0 : index
    %174 = vector.load %arg22[%c0_160, %c0_161, %c0_162] : memref<1x16x256xf32, #tpu.memory_space<vmem>>, vector<1x16x256xf32>
    %175 = vector.shape_cast %174 : vector<1x16x256xf32> to vector<16x256xf32>
    %176 = vector.shape_cast %173 : vector<16x256xf32> to vector<1x16x256xf32>
    tpu.vector_store %arg22[%c0_160, %c0_161, %c0_162], %176 {strides = array<i32>} : memref<1x16x256xf32, #tpu.memory_space<vmem>>, vector<1x16x256xf32>,
    %c0_163 = arith.constant 0 : index
    %c0_164 = arith.constant 0 : index
    %c0_165 = arith.constant 0 : index
    %177 = vector.load %arg2[%c0_163, %c0_164, %c0_165] : memref<1x16x256xf32, #tpu.memory_space<vmem>>, vector<1x16x256xf32>
    %178 = vector.shape_cast %177 : vector<1x16x256xf32> to vector<16x256xf32>
    %179 = arith.subf %173, %178 : vector<16x256xf32>
    %180 = arith.mulf %179, %179 : vector<16x256xf32>
    %cst_166 = arith.constant dense<0.000000e+00> : vector<16xf32>
    %181 = vector.multi_reduction <add>, %180, %cst_166 [1] : vector<16x256xf32> to vector<16xf32>
    %182 = vector.shape_cast %181 : vector<16xf32> to vector<16x1xf32>
    %cst_167 = arith.constant dense<0.000000e+00> : vector<1xf32>
    %183 = vector.multi_reduction <add>, %182, %cst_167 [0] : vector<16x1xf32> to vector<1xf32>
    %184 = vector.shape_cast %183 : vector<1xf32> to vector<1x1xf32>
    %185 = vector.shape_cast %184 : vector<1x1xf32> to vector<1x1xf32>
    %186 = vector.broadcast %185 : vector<1x1xf32> to vector<1x128xf32>
    %c0_168 = arith.constant 0 : index
    %c0_169 = arith.constant 0 : index
    %c0_170 = arith.constant 0 : index
    %187 = vector.load %arg23[%c0_168, %c0_169, %c0_170] : memref<1x1x128xf32, #tpu.memory_space<vmem>>, vector<1x1x128xf32>
    %188 = vector.shape_cast %187 : vector<1x1x128xf32> to vector<1x128xf32>
    %189 = vector.shape_cast %186 : vector<1x128xf32> to vector<1x1x128xf32>
    tpu.vector_store %arg23[%c0_168, %c0_169, %c0_170], %189 {strides = array<i32>} : memref<1x1x128xf32, #tpu.memory_space<vmem>>, vector<1x1x128xf32>,
    return
  }
  func.func @transform_0(%arg0: i32) -> (i32, i32, i32) {
    %c0_i32 = arith.constant 0 : i32
    %c0_i32_0 = arith.constant 0 : i32
    %c0_i32_1 = arith.constant 0 : i32
    return %arg0, %c0_i32, %c0_i32_0 : i32, i32, i32
  }
  func.func @transform_1(%arg0: i32) -> (i32, i32, i32) {
    %c0_i32 = arith.constant 0 : i32
    %c0_i32_0 = arith.constant 0 : i32
    %c0_i32_1 = arith.constant 0 : i32
    return %arg0, %c0_i32, %c0_i32_0 : i32, i32, i32
  }
  func.func @transform_2(%arg0: i32) -> (i32, i32, i32) {
    %c0_i32 = arith.constant 0 : i32
    %c0_i32_0 = arith.constant 0 : i32
    %c0_i32_1 = arith.constant 0 : i32
    %c0_i32_2 = arith.constant 0 : i32
    return %c0_i32, %c0_i32_0, %c0_i32_1 : i32, i32, i32
  }
  func.func @transform_3(%arg0: i32) -> (i32, i32, i32) {
    %c0_i32 = arith.constant 0 : i32
    %c0_i32_0 = arith.constant 0 : i32
    %c0_i32_1 = arith.constant 0 : i32
    %c0_i32_2 = arith.constant 0 : i32
    return %c0_i32, %c0_i32_0, %c0_i32_1 : i32, i32, i32
  }
  func.func @transform_4(%arg0: i32) -> (i32, i32) {
    %c0_i32 = arith.constant 0 : i32
    %c0_i32_0 = arith.constant 0 : i32
    %c0_i32_1 = arith.constant 0 : i32
    return %c0_i32, %c0_i32_0 : i32, i32
  }
  func.func @transform_5(%arg0: i32) -> (i32, i32, i32) {
    %c0_i32 = arith.constant 0 : i32
    %c0_i32_0 = arith.constant 0 : i32
    %c0_i32_1 = arith.constant 0 : i32
    %c0_i32_2 = arith.constant 0 : i32
    return %c0_i32, %c0_i32_0, %c0_i32_1 : i32, i32, i32
  }
  func.func @transform_6(%arg0: i32) -> (i32, i32, i32) {
    %c0_i32 = arith.constant 0 : i32
    %c0_i32_0 = arith.constant 0 : i32
    %c0_i32_1 = arith.constant 0 : i32
    %c0_i32_2 = arith.constant 0 : i32
    return %c0_i32, %c0_i32_0, %c0_i32_1 : i32, i32, i32
  }
  func.func @transform_7(%arg0: i32) -> (i32, i32) {
    %c0_i32 = arith.constant 0 : i32
    %c0_i32_0 = arith.constant 0 : i32
    %c0_i32_1 = arith.constant 0 : i32
    return %c0_i32, %c0_i32_0 : i32, i32
  }
  func.func @transform_8(%arg0: i32) -> (i32, i32) {
    %c0_i32 = arith.constant 0 : i32
    %c0_i32_0 = arith.constant 0 : i32
    %c0_i32_1 = arith.constant 0 : i32
    return %c0_i32, %c0_i32_0 : i32, i32
  }
  func.func @transform_9(%arg0: i32) -> (i32, i32) {
    %c0_i32 = arith.constant 0 : i32
    %c0_i32_0 = arith.constant 0 : i32
    %c0_i32_1 = arith.constant 0 : i32
    return %c0_i32, %c0_i32_0 : i32, i32
  }
  func.func @transform_10(%arg0: i32) -> (i32, i32, i32) {
    %c0_i32 = arith.constant 0 : i32
    %c0_i32_0 = arith.constant 0 : i32
    %c0_i32_1 = arith.constant 0 : i32
    %c0_i32_2 = arith.constant 0 : i32
    return %c0_i32, %c0_i32_0, %c0_i32_1 : i32, i32, i32
  }
  func.func @transform_11(%arg0: i32) -> (i32, i32, i32) {
    %c0_i32 = arith.constant 0 : i32
    %c0_i32_0 = arith.constant 0 : i32
    %c0_i32_1 = arith.constant 0 : i32
    %c0_i32_2 = arith.constant 0 : i32
    return %c0_i32, %c0_i32_0, %c0_i32_1 : i32, i32, i32
  }
  func.func @transform_12(%arg0: i32) -> (i32, i32) {
    %c0_i32 = arith.constant 0 : i32
    %c0_i32_0 = arith.constant 0 : i32
    %c0_i32_1 = arith.constant 0 : i32
    return %c0_i32, %c0_i32_0 : i32, i32
  }
  func.func @transform_13(%arg0: i32) -> (i32, i32) {
    %c0_i32 = arith.constant 0 : i32
    %c0_i32_0 = arith.constant 0 : i32
    %c0_i32_1 = arith.constant 0 : i32
    return %c0_i32, %c0_i32_0 : i32, i32
  }
  func.func @transform_14(%arg0: i32) -> (i32, i32) {
    %c0_i32 = arith.constant 0 : i32
    %c0_i32_0 = arith.constant 0 : i32
    %c0_i32_1 = arith.constant 0 : i32
    return %c0_i32, %c0_i32_0 : i32, i32
  }
  func.func @transform_15(%arg0: i32) -> (i32, i32, i32) {
    %c0_i32 = arith.constant 0 : i32
    %c0_i32_0 = arith.constant 0 : i32
    %c0_i32_1 = arith.constant 0 : i32
    %c0_i32_2 = arith.constant 0 : i32
    return %c0_i32, %c0_i32_0, %c0_i32_1 : i32, i32, i32
  }
  func.func @transform_16(%arg0: i32) -> (i32, i32, i32) {
    %c0_i32 = arith.constant 0 : i32
    %c0_i32_0 = arith.constant 0 : i32
    %c0_i32_1 = arith.constant 0 : i32
    %c0_i32_2 = arith.constant 0 : i32
    return %c0_i32, %c0_i32_0, %c0_i32_1 : i32, i32, i32
  }
  func.func @transform_17(%arg0: i32) -> (i32, i32) {
    %c0_i32 = arith.constant 0 : i32
    %c0_i32_0 = arith.constant 0 : i32
    %c0_i32_1 = arith.constant 0 : i32
    return %c0_i32, %c0_i32_0 : i32, i32
  }
  func.func @transform_18(%arg0: i32) -> (i32, i32, i32) {
    %c0_i32 = arith.constant 0 : i32
    %c0_i32_0 = arith.constant 0 : i32
    %c0_i32_1 = arith.constant 0 : i32
    %c0_i32_2 = arith.constant 0 : i32
    return %c0_i32, %c0_i32_0, %c0_i32_1 : i32, i32, i32
  }
  func.func @transform_19(%arg0: i32) -> (i32, i32, i32) {
    %c0_i32 = arith.constant 0 : i32
    %c0_i32_0 = arith.constant 0 : i32
    %c0_i32_1 = arith.constant 0 : i32
    %c0_i32_2 = arith.constant 0 : i32
    return %c0_i32, %c0_i32_0, %c0_i32_1 : i32, i32, i32
  }
  func.func @transform_20(%arg0: i32) -> (i32, i32) {
    %c0_i32 = arith.constant 0 : i32
    %c0_i32_0 = arith.constant 0 : i32
    %c0_i32_1 = arith.constant 0 : i32
    return %c0_i32, %c0_i32_0 : i32, i32
  }
  func.func @transform_21(%arg0: i32) -> (i32, i32, i32) {
    %c0_i32 = arith.constant 0 : i32
    %c0_i32_0 = arith.constant 0 : i32
    %c0_i32_1 = arith.constant 0 : i32
    return %arg0, %c0_i32, %c0_i32_0 : i32, i32, i32
  }
  func.func @transform_22(%arg0: i32) -> (i32, i32, i32) {
    %c0_i32 = arith.constant 0 : i32
    %c0_i32_0 = arith.constant 0 : i32
    %c0_i32_1 = arith.constant 0 : i32
    return %arg0, %c0_i32, %c0_i32_0 : i32, i32, i32
  }
}

</mosaic_0001>

<bundles_post_ra>
// kernel: tile.73
= control target key start
LH: loop header
LB: loop body
LE: loop exit
PB: predicated region body
PF: predicated region fallthrough
CT: control target
= control target key end

     0   :  { %s22_s0 = inlined_call_operand.vmem [shape: f32[4], index: 0, kind: input, shape index: {}]   ;;  %s23_s1 = inlined_call_operand.vmem [shape: f32[8,4], index: 1, kind: output, shape index: {}]  }
   0x1   :  { %v4_v0 = vld [vmem:[%s22_s0] ss:$0 sm:$0xff] }
   0x2   :  { %5 = vst [vmem:[%s23_s1] sm:$0xff] %v4_v0 }

// kernel: tile.74
= control target key start
LH: loop header
LB: loop body
LE: loop exit
PB: predicated region body
PF: predicated region fallthrough
CT: control target
= control target key end

     0   :  { %s67_s10 = smov 28   ;;  %s68_s11 = smov 20   ;;  %vm3_vm0 = vcmask 31744   ;;  %vm9_vm1 = vcmask 261344   ;;  %vm15_vm2 = vcmask 228544   ;;  %vm21_vm3 = vcmask 195744   ;;  %s111_s0 = inlined_call_operand.vmem [shape: f32[8,4], index: 0, kind: input, shape index: {}]   ;;  %s112_s1 = inlined_call_operand.vmem [shape: f32[1,32], index: 1, kind: output, shape index: {}]  }
   0x1   :  { %v53_v0 = vld [vmem:[%s111_s0 + $0x7] sm:$0x1]   ;;  %v55_v1 = vld [vmem:[%s111_s0 + $0x5] sm:$0x1]   ;;  %v57_v2 = vld [vmem:[%s111_s0 + $0x3] sm:$0x1]  }
   0x2   :  { %7 = vrot.lane.b32.xlu0 %v53_v0, %s67_s10  ;;  %19 = vrot.lane.b32.xlu1 %v55_v1, %s68_s11  ;;  %s69_s14 = smov 12   ;;  %v54_v3 = vld [vmem:[%s111_s0 + $0x6] sm:$0x1]   ;;  %v56_v4 = vld [vmem:[%s111_s0 + $0x4] sm:$0x1]   ;;  %s70_s21 = smov 24  }
   0x3   :  { %31 = vrot.lane.b32.xlu2 %v57_v2, %s69_s14  ;;  %v58_v5 = vld [vmem:[%s111_s0 + $0x2] sm:$0x1]   ;;  %s71_s22 = smov 16   ;;  %s72_s23 = smov 8   ;;  %v59_v6 = vld [vmem:[%s111_s0 + $0x1] sm:$0x1]  }
   0x4   :  { %s73_s26 = smov 4   ;;  %v2_v7 = vld [vmem:[%s111_s0] sm:$0x1]   ;;  %vm27_vm4 = vcmask 162944   ;;  %vm33_vm5 = vcmask 130144   ;;  %vm39_vm6 = vcmask 97344  }
   0x5   :  { %4 = vst.msk [vmem:[#allocation0] sm:$0x1] %vm3_vm0, %v2_v7   ;;  %vm45_vm7 = vcmask 64544  }
   0xa   :  { %13 = vrot.lane.b32.xlu0 %v54_v3, %s70_s21  ;;  %25 = vrot.lane.b32.xlu1 %v56_v4, %s71_s22 }
   0xb   :  { %37 = vrot.lane.b32.xlu2 %v58_v5, %s72_s23 }
  0x12   :  { %43 = vrot.lane.b32.xlu0 %v59_v6, %s73_s26 }
  0x5d   :  { %v32_v8 = vpop.permute.xlu2 %31  }
  0x65   :  { %v38_v9 = vpop.permute.xlu2 %37  }
  0x74   :  { %v8_v10 = vpop.permute.xlu0 %7   ;;  %v20_v11 = vpop.permute.xlu1 %19  }
  0x75   :  { %10 = vst.msk [vmem:[#allocation0] sm:$0x1] %vm9_vm1, %v8_v10  }
  0x7c   :  { %v14_v12 = vpop.permute.xlu0 %13   ;;  %v26_v13 = vpop.permute.xlu1 %25  }
  0x7d   :  { %16 = vst.msk [vmem:[#allocation0] sm:$0x1] %vm15_vm2, %v14_v12  }
  0x7e   :  { %22 = vst.msk [vmem:[#allocation0] sm:$0x1] %vm21_vm3, %v20_v11  }
  0x7f   :  { %28 = vst.msk [vmem:[#allocation0] sm:$0x1] %vm27_vm4, %v26_v13  }
  0x80   :  { %34 = vst.msk [vmem:[#allocation0] sm:$0x1] %vm33_vm5, %v32_v8  }
  0x81   :  { %40 = vst.msk [vmem:[#allocation0] sm:$0x1] %vm39_vm6, %v38_v9  }
  0x84   :  { %v44_v14 = vpop.permute.xlu0 %43  }
  0x85   :  { %46 = vst.msk [vmem:[#allocation0] sm:$0x1] %vm45_vm7, %v44_v14  }
  0x8c   :  { %v49_v15 = vld [vmem:[#allocation0] sm:$0x1] }
  0x8d   :  { %52 = vst [vmem:[%s112_s1] sm:$0x1] %v49_v15 }

// kernel: tile.103
= control target key start
LH: loop header
LB: loop body
LE: loop exit
PB: predicated region body
PF: predicated region fallthrough
CT: control target
= control target key end

     0   :  { %s22_s0 = inlined_call_operand.vmem [shape: f32[8], index: 0, kind: input, shape index: {}]   ;;  %s23_s1 = inlined_call_operand.vmem [shape: f32[4,8], index: 1, kind: output, shape index: {}]  }
   0x1   :  { %v4_v0 = vld [vmem:[%s22_s0] ss:$0 sm:$0xff] }
   0x2   :  { %5 = vst [vmem:[%s23_s1] sm:$0xf] %v4_v0 }

// kernel: tile.104
= control target key start
LH: loop header
LB: loop body
LE: loop exit
PB: predicated region body
PF: predicated region fallthrough
CT: control target
= control target key end

     0   :  { %s37_s8 = smov 8   ;;  %s38_s9 = smov 16   ;;  %vm7_vm0 = vcmask 64512   ;;  %vm13_vm1 = vcmask 261312   ;;  %vm19_vm2 = vcmask 195712   ;;  %vm25_vm3 = vcmask 130112   ;;  %s55_s0 = inlined_call_operand.vmem [shape: f32[4,8], index: 0, kind: input, shape index: {}]   ;;  %s56_s1 = inlined_call_operand.vmem [shape: f32[1,32], index: 1, kind: output, shape index: {}]  }
   0x1   :  { %v4_v0 = vld [vmem:[%s55_s0] sm:$0xf]  ;;  %s36_s0 = smov 24  }
   0x2   :  { %5 = vst [vmem:[#allocation1] sm:$0xf] %v4_v0 }
   0x9   :  { %v10_v1 = vld [vmem:[#allocation1 + $0x3] sm:$0x1]   ;;  %v22_v2 = vld [vmem:[#allocation1 + $0x1] sm:$0x1]   ;;  %v16_v3 = vld [vmem:[#allocation1 + $0x2] sm:$0x1]  }
   0xa   :  { %11 = vrot.lane.b32.xlu0 %v10_v1, %s36_s0  ;;  %23 = vrot.lane.b32.xlu1 %v22_v2, %s37_s8  ;;  %v6_v4 = vld [vmem:[#allocation1] sm:$0x1]  }
   0xb   :  { %8 = vst.msk [vmem:[#allocation0] sm:$0x1] %vm7_vm0, %v6_v4  }
  0x12   :  { %17 = vrot.lane.b32.xlu0 %v16_v3, %s38_s9 }
  0x7c   :  { %v12_v5 = vpop.permute.xlu0 %11   ;;  %v24_v6 = vpop.permute.xlu1 %23  }
  0x7d   :  { %14 = vst.msk [vmem:[#allocation0] sm:$0x1] %vm13_vm1, %v12_v5  }
  0x84   :  { %v18_v7 = vpop.permute.xlu0 %17  }
  0x85   :  { %20 = vst.msk [vmem:[#allocation0] sm:$0x1] %vm19_vm2, %v18_v7  }
  0x86   :  { %26 = vst.msk [vmem:[#allocation0] sm:$0x1] %vm25_vm3, %v24_v6  }
  0x8d   :  { %v29_v8 = vld [vmem:[#allocation0] sm:$0x1] }
  0x8e   :  { %32 = vst [vmem:[%s56_s1] sm:$0x1] %v29_v8 }

// kernel: tile.88
= control target key start
LH: loop header
LB: loop body
LE: loop exit
PB: predicated region body
PF: predicated region fallthrough
CT: control target
= control target key end

     0   :  { %s22_s0 = inlined_call_operand.vmem [shape: f32[2], index: 0, kind: input, shape index: {}]   ;;  %s23_s1 = inlined_call_operand.vmem [shape: f32[4,2], index: 1, kind: output, shape index: {}]  }
   0x1   :  { %v4_v0 = vld [vmem:[%s22_s0] ss:$0 sm:$0xff] }
   0x2   :  { %5 = vst [vmem:[%s23_s1] sm:$0xf] %v4_v0 }

// kernel: tile.89
= control target key start
LH: loop header
LB: loop body
LE: loop exit
PB: predicated region body
PF: predicated region fallthrough
CT: control target
= control target key end

     0   :  { %s37_s8 = smov 2   ;;  %s38_s9 = smov 4   ;;  %vm7_vm0 = vcmask 15360   ;;  %vm13_vm1 = vcmask 64560   ;;  %vm19_vm2 = vcmask 48160   ;;  %vm25_vm3 = vcmask 31760   ;;  %s55_s0 = inlined_call_operand.vmem [shape: f32[4,2], index: 0, kind: input, shape index: {}]   ;;  %s56_s1 = inlined_call_operand.vmem [shape: f32[1,8], index: 1, kind: output, shape index: {}]  }
   0x1   :  { %v4_v0 = vld [vmem:[%s55_s0] sm:$0xf]  ;;  %s36_s0 = smov 6  }
   0x2   :  { %5 = vst [vmem:[#allocation1] sm:$0xf] %v4_v0 }
   0x9   :  { %v10_v1 = vld [vmem:[#allocation1 + $0x3] sm:$0x1]   ;;  %v22_v2 = vld [vmem:[#allocation1 + $0x1] sm:$0x1]   ;;  %v16_v3 = vld [vmem:[#allocation1 + $0x2] sm:$0x1]  }
   0xa   :  { %11 = vrot.lane.b32.xlu0 %v10_v1, %s36_s0  ;;  %23 = vrot.lane.b32.xlu1 %v22_v2, %s37_s8  ;;  %v6_v4 = vld [vmem:[#allocation1] sm:$0x1]  }
   0xb   :  { %8 = vst.msk [vmem:[#allocation0] sm:$0x1] %vm7_vm0, %v6_v4  }
  0x12   :  { %17 = vrot.lane.b32.xlu0 %v16_v3, %s38_s9 }
  0x7c   :  { %v12_v5 = vpop.permute.xlu0 %11   ;;  %v24_v6 = vpop.permute.xlu1 %23  }
  0x7d   :  { %14 = vst.msk [vmem:[#allocation0] sm:$0x1] %vm13_vm1, %v12_v5  }
  0x84   :  { %v18_v7 = vpop.permute.xlu0 %17  }
  0x85   :  { %20 = vst.msk [vmem:[#allocation0] sm:$0x1] %vm19_vm2, %v18_v7  }
  0x86   :  { %26 = vst.msk [vmem:[#allocation0] sm:$0x1] %vm25_vm3, %v24_v6  }
  0x8d   :  { %v29_v8 = vld [vmem:[#allocation0] sm:$0x1] }
  0x8e   :  { %32 = vst [vmem:[%s56_s1] sm:$0x1] %v29_v8 }

// kernel: vqvae_forward.2
= control target key start
LH: loop header
LB: loop body
LE: loop exit
PB: predicated region body
PF: predicated region fallthrough
CT: control target
= control target key end

     0   :  { %s4920_s0 = inlined_call_operand.vmem [shape: f32[2,16,256], index: 0, kind: input, shape index: {}]   ;;  %s4921_s1 = inlined_call_operand.vmem [shape: f32[4,8,16], index: 1, kind: input, shape index: {}]   ;;  %s4922_s2 = inlined_call_operand.vmem [shape: bf16[4,256,32], index: 2, kind: input, shape index: {}]   ;;  %s4923_s3 = inlined_call_operand.vmem [shape: f32[1,32], index: 3, kind: input, shape index: {}]   ;;  %s4924_s4 = inlined_call_operand.vmem [shape: f32[4,8,8], index: 4, kind: input, shape index: {}]   ;;  %s4925_s5 = inlined_call_operand.vmem [shape: bf16[4,32,32], index: 5, kind: input, shape index: {}]   ;;  %s4926_s6 = inlined_call_operand.vmem [shape: f32[1,32], index: 6, kind: input, shape index: {}]   ;;  %s4927_s7 = inlined_call_operand.vmem [shape: f32[3,8,8], index: 7, kind: input, shape index: {}, may-alias: {7,10,15}]   ;;  %s4928_s8 = inlined_call_operand.vmem [shape: bf16[3,32,32], index: 8, kind: input, shape index: {}]   ;;  %s4929_s9 = inlined_call_operand.vmem [shape: f32[1,32], index: 9, kind: input, shape index: {}]   ;;  %s4930_s10 = inlined_call_operand.vmem [shape: f32[3,8,8], index: 10, kind: input, shape index: {}, may-alias: {7,10,15}]   ;;  %s4931_s11 = inlined_call_operand.vmem [shape: bf16[3,32,8], index: 11, kind: input, shape index: {}]   ;;  %s4932_s12 = inlined_call_operand.vmem [shape: f32[1,8], index: 12, kind: input, shape index: {}]   ;;  %s4933_s13 = inlined_call_operand.vmem [shape: bf16[8,32], index: 13, kind: input, shape index: {}]   ;;  %s4934_s14 = inlined_call_operand.vmem [shape: f32[1,32], index: 14, kind: input, shape index: {}]   ;;  %s4935_s15 = inlined_call_operand.vmem [shape: f32[3,8,8], index: 15, kind: input, shape index: {}, may-alias: {7,10,15}]   ;;  %s4936_s16 = inlined_call_operand.vmem [shape: bf16[3,32,8], index: 16, kind: input, shape index: {}]   ;;  %s4937_s17 = inlined_call_operand.vmem [shape: f32[1,8], index: 17, kind: input, shape index: {}]   ;;  %s4938_s18 = inlined_call_operand.vmem [shape: bf16[8,32], index: 18, kind: input, shape index: {}]   ;;  %s4939_s19 = inlined_call_operand.vmem [shape: f32[1,32], index: 19, kind: input, shape index: {}]   ;;  %s4940_s20 = inlined_call_operand.vmem [shape: f32[4,16,8], index: 20, kind: input, shape index: {}]   ;;  %s4941_s21 = inlined_call_operand.vmem [shape: bf16[4,32,64], index: 21, kind: input, shape index: {}]   ;;  %s4942_s22 = inlined_call_operand.vmem [shape: f32[1,64], index: 22, kind: input, shape index: {}]   ;;  %s4943_s23 = inlined_call_operand.vmem [shape: f32[512,64], index: 23, kind: input, shape index: {}]   ;;  %s4944_s24 = inlined_call_operand.vmem [shape: f32[64,512], index: 24, kind: input, shape index: {}]   ;;  %s4945_s25 = inlined_call_operand.vmem [shape: f32[1,512], index: 25, kind: input, shape index: {}]   ;;  %s4946_s26 = inlined_call_operand.vmem [shape: f32[2,16,64], index: 26, kind: output, shape index: {0}]   ;;  %s4947_s27 = inlined_call_operand.vmem [shape: s32[2,16,1], index: 27, kind: output, shape index: {1}]   ;;  %s4948_s28 = inlined_call_operand.vmem [shape: f32[2,1,128], index: 28, kind: output, shape index: {2}]  }
   0x1   :  { %4962 = sst [smem:[#allocation2_spill]] %s4920_s0 }
   0x2   :  { %4963 = sst [smem:[#allocation3_spill]] %s4921_s1 }
   0x3   :  { %4964 = sst [smem:[#allocation4_spill]] %s4922_s2 }
   0x4   :  { %4965 = sst [smem:[#allocation5_spill]] %s4923_s3 }
   0x5   :  { %4966 = sst [smem:[#allocation6_spill]] %s4924_s4 }
   0x6   :  { %4967 = sst [smem:[#allocation7_spill]] %s4925_s5 }
   0x7   :  { %4968 = sst [smem:[#allocation8_spill]] %s4926_s6 }
   0x8   :  { %4969 = sst [smem:[#allocation9_spill]] %s4927_s7 }
   0x9   :  { %4970 = sst [smem:[#allocation10_spill]] %s4928_s8  ;;  %s4047_s8 = smov 0  }
   0xa   :  { %4971 = sst [smem:[#allocation11_spill]] %s4929_s9 }
   0xb   :  { %4972 = sst [smem:[#allocation12_spill]] %s4930_s10 }
   0xc   :  { %4973 = sst [smem:[#allocation13_spill]] %s4931_s11 }
   0xd   :  { %4974 = sst [smem:[#allocation14_spill]] %s4932_s12 }
   0xe LB: > { %s3138_s5 = sadd.s32 4294967295, %s3899_s8   ;;  %p3142_p0 = scmp.ge.s32.totalorder %s3899_s8, 1  ;;  %s3899_s8 = sphi %s4047_s8, %s39_s8  }
   0xf   : > { %p767_p1 = scmp.lt.s32.totalorder %s3899_s8, 3 }
  0x11   : > { %p768_p2 = pnand %p3142_p0, %p767_p1 }
  0x12   : > { %p849_p3 = scmp.lt.s32.totalorder (!%p768_p2), %s3138_s5, 1  ;;  %s4975_s6 = sld [smem:[#allocation2_spill]] (!%p768_p2) }
  0x13   : > { %771 = sbr.rel (%p768_p2) target bundleno = 3142 (0xc46), region = 124  ;;  %s4976_s29 = sld [smem:[#allocation3_spill]] (!%p768_p2) }
  0x14   : > { %s4977_s12 = sld [smem:[#allocation4_spill]] (!%p768_p2) }
  0x15   : > { %s4980_s7 = sld [smem:[#allocation6_spill]] (!%p768_p2) }
  0x16   : > { %s4981_s2 = sld [smem:[#allocation10_spill]] (!%p768_p2) }
  0x17   : > { %s4982_s11 = sld [smem:[#allocation8_spill]] (!%p768_p2) }
  0x18   : > { %s4989_s5 = smov (!%p849_p3, %s3138_s5), 1  ;;  %vm872_vm0 = vcmask 130048   ;;  %vm1479_vm1 = vcmask 64512   ;;  %vm1545_vm2 = vcmask 261120   ;;  %s4984_s0 = sld [smem:[#allocation13_spill]]  ;;  %vm2690_vm3 = vcmask 523264  }
  0x19   : > { %s3389_s9 = sshll.u32 %s4989_s5, 5  ;;  %v3151_v0 = vld [vmem:[%s4976_s29 + $0x8] sm:$0xff]  ;;  %v871_v9 = vld [vmem:[%s4976_s29] sm:$0xff]  ;;  %s3390_s1 = sshll.u32 %s4989_s5, 4 }
  0x1a   : > { %s853_s10 = scalar_lea.vmem %s4975_s6, %s3389_s9  ;;  %v3790_v1 = vld [vmem:[%s4977_s12 + $0x38] sm:$0xff]   ;;  %v3789_v14 = vld [vmem:[%s4977_s12 + $0x30] sm:$0xff]   ;;  %v3788_v26 = vld [vmem:[%s4977_s12 + $0x28] sm:$0xff]   ;;  %s4978_s9 = sld [smem:[#allocation5_spill]] }
  0x1b   : > { %v3798_v2 = vld [vmem:[%s4977_s12 + $0x78] sm:$0xff]   ;;  %v4070_v3 = vld [vmem:[%s853_s10 + $0x10] sm:$0xff]  ;;  %v4074_v5 = vld [vmem:[%s853_s10] sm:$0xff]  ;;  %v3423_v10 = vunpack.c.h.bf16 %v3790_v1  ;;  %v3422_v16 = vunpack.c.l.bf16 %v3790_v1  ;;  %v3419_v22 = vunpack.c.h.bf16 %v3789_v14  ;;  %v3418_v28 = vunpack.c.l.bf16 %v3789_v14  ;;  %s4979_s6 = sld [smem:[#allocation7_spill]] }
  0x1c   : > { %v4072_v4 = vld [vmem:[%s853_s10 + $0x18] sm:$0xff]  ;;  %999 = vmatpush.msra.mxu2 %v4070_v3  ;;  %v4078_v6 = vld [vmem:[%s853_s10 + $0x8] sm:$0xff]  ;;  %890 = vmatpush.msra.mxu0 %v4070_v3  ;;  %v3455_v11 = vunpack.c.h.bf16 %v3798_v2  ;;  %v3797_v15 = vld [vmem:[%s4977_s12 + $0x70] sm:$0xff]   ;;  %v3454_v17 = vunpack.c.l.bf16 %v3798_v2  ;;  %v3415_v34 = vunpack.c.h.bf16 %v3788_v26  ;;  %v3414_v40 = vunpack.c.l.bf16 %v3788_v26  ;;  %s4985_s10 = sld [smem:[#allocation11_spill]] }
  0x1d   : > { %1019 = vmatpush.msra.mxu3 %v4072_v4  ;;  %v3806_v7 = vld [vmem:[%s4977_s12 + $0xb8] sm:$0xff]   ;;  %910 = vmatpush.msra.mxu1 %v4072_v4  ;;  %v3805_v18 = vld [vmem:[%s4977_s12 + $0xb0] sm:$0xff]   ;;  %v3451_v23 = vunpack.c.h.bf16 %v3797_v15  ;;  %v3796_v27 = vld [vmem:[%s4977_s12 + $0x68] sm:$0xff]   ;;  %v3450_v29 = vunpack.c.l.bf16 %v3797_v15 }
  0x1e   : > { %v3814_v8 = vld [vmem:[%s4977_s12 + $0xf8] sm:$0xff]   ;;  %1000 = vmatpush.msra.mxu2 %v4074_v5  ;;  %v3487_v12 = vunpack.c.h.bf16 %v3806_v7  ;;  %891 = vmatpush.msra.mxu0 %v4074_v5  ;;  %v3813_v19 = vld [vmem:[%s4977_s12 + $0xf0] sm:$0xff]   ;;  %v3486_v20 = vunpack.c.l.bf16 %v3806_v7  ;;  %v3483_v24 = vunpack.c.h.bf16 %v3805_v18  ;;  %v3804_v30 = vld [vmem:[%s4977_s12 + $0xa8] sm:$0xff]   ;;  %v3482_v32 = vunpack.c.l.bf16 %v3805_v18 }
  0x1f   : > { %1020 = vmatpush.msra.mxu3 %v4078_v6  ;;  %3152 = vmatmul.msk.f32.vlgmr.msra.gmra.mxu2 %vm872_vm0, %v3151_v0  ;;  %v3519_v13 = vunpack.c.h.bf16 %v3814_v8  ;;  %v3518_v21 = vunpack.c.l.bf16 %v3814_v8  ;;  %v3515_v25 = vunpack.c.h.bf16 %v3813_v19  ;;  %v3812_v31 = vld [vmem:[%s4977_s12 + $0xe8] sm:$0xff]   ;;  %v3514_v33 = vunpack.c.l.bf16 %v3813_v19  ;;  %v3787_v38 = vld [vmem:[%s4977_s12 + $0x20] sm:$0xff]   ;;  %v3786_v50 = vld [vmem:[%s4977_s12 + $0x18] sm:$0xff]  }
  0x20   : > { %3153 = vmatmul.msk.f32.vlgmr.msra.gmra.mxu3 %vm872_vm0, %v3151_v0  ;;  %911 = vmatpush.msra.mxu1 %v4078_v6  ;;  %v3447_v35 = vunpack.c.h.bf16 %v3796_v27  ;;  %v3479_v36 = vunpack.c.h.bf16 %v3804_v30  ;;  %v3511_v37 = vunpack.c.h.bf16 %v3812_v31  ;;  %v3795_v39 = vld [vmem:[%s4977_s12 + $0x60] sm:$0xff]   ;;  %v3446_v41 = vunpack.c.l.bf16 %v3796_v27  ;;  %v3794_v51 = vld [vmem:[%s4977_s12 + $0x58] sm:$0xff]   ;;  %v3785_v62 = vld [vmem:[%s4977_s12 + $0x10] sm:$0xff]  }
  0x21   : > { %3149 = vmatmul.msk.f32.vlgmr.msra.gmra.mxu0 %vm872_vm0, %v871_v9  ;;  %3150 = vmatmul.msk.f32.vlgmr.msra.gmra.mxu1 %vm872_vm0, %v871_v9  ;;  %v3803_v42 = vld [vmem:[%s4977_s12 + $0xa0] sm:$0xff]   ;;  %v3478_v44 = vunpack.c.l.bf16 %v3804_v30  ;;  %v3510_v45 = vunpack.c.l.bf16 %v3812_v31  ;;  %v3411_v46 = vunpack.c.h.bf16 %v3787_v38  ;;  %v3443_v47 = vunpack.c.h.bf16 %v3795_v39  ;;  %v3802_v54 = vld [vmem:[%s4977_s12 + $0x98] sm:$0xff]   ;;  %v3793_v63 = vld [vmem:[%s4977_s12 + $0x50] sm:$0xff]  }
  0x22   : > { %1130 = vmatpush.msrb.mxu2 %v3423_v10  ;;  %1150 = vmatpush.msrb.mxu3 %v3455_v11  ;;  %v3811_v43 = vld [vmem:[%s4977_s12 + $0xe0] sm:$0xff]   ;;  %v3475_v48 = vunpack.c.h.bf16 %v3803_v42  ;;  %v3410_v52 = vunpack.c.l.bf16 %v3787_v38  ;;  %v3442_v53 = vunpack.c.l.bf16 %v3795_v39  ;;  %v3810_v55 = vld [vmem:[%s4977_s12 + $0xd8] sm:$0xff]   ;;  %v3474_v56 = vunpack.c.l.bf16 %v3803_v42  ;;  %v3801_v2 = vld [vmem:[%s4977_s12 + $0x90] sm:$0xff]  }
  0x23   : > { %1090 = vmatpush.msrb.mxu0 %v3487_v12  ;;  %1110 = vmatpush.msrb.mxu1 %v3519_v13  ;;  %v3507_v49 = vunpack.c.h.bf16 %v3811_v43  ;;  %v3506_v57 = vunpack.c.l.bf16 %v3811_v43  ;;  %v3407_v58 = vunpack.c.h.bf16 %v3786_v50  ;;  %v3439_v59 = vunpack.c.h.bf16 %v3794_v51  ;;  %v3809_v7 = vld [vmem:[%s4977_s12 + $0xd0] sm:$0xff]   ;;  %v3784_v14 = vld [vmem:[%s4977_s12 + $0x8] sm:$0xff]   ;;  %v3393_v26 = vld [vmem:[%s4977_s12] sm:$0xff]  }
  0x24   : > { %1131 = vmatpush.msrb.mxu2 %v3422_v16  ;;  %1151 = vmatpush.msrb.mxu3 %v3454_v17  ;;  %v3471_v60 = vunpack.c.h.bf16 %v3802_v54  ;;  %v3503_v61 = vunpack.c.h.bf16 %v3810_v55  ;;  %v3406_v0 = vunpack.c.l.bf16 %v3786_v50  ;;  %v3438_v1 = vunpack.c.l.bf16 %v3794_v51  ;;  %v3792_v15 = vld [vmem:[%s4977_s12 + $0x48] sm:$0xff]   ;;  %v3791_v30 = vld [vmem:[%s4977_s12 + $0x40] sm:$0xff]   ;;  %v3822_v42 = vld [vmem:[%s4977_s12 + $0x138] sm:$0xff]  }
  0x25   : > { %1091 = vmatpush.msrb.mxu0 %v3486_v20  ;;  %1111 = vmatpush.msrb.mxu1 %v3518_v21  ;;  %v3470_v8 = vunpack.c.l.bf16 %v3802_v54  ;;  %v3502_v9 = vunpack.c.l.bf16 %v3810_v55  ;;  %v3403_v10 = vunpack.c.h.bf16 %v3785_v62  ;;  %v3435_v11 = vunpack.c.h.bf16 %v3793_v63  ;;  %v3800_v18 = vld [vmem:[%s4977_s12 + $0x88] sm:$0xff]   ;;  %v3830_v43 = vld [vmem:[%s4977_s12 + $0x178] sm:$0xff]  }
  0x26   : > { %1132 = vmatpush.msrb.mxu2 %v3419_v22  ;;  %1152 = vmatpush.msrb.mxu3 %v3451_v23  ;;  %v3467_v12 = vunpack.c.h.bf16 %v3801_v2  ;;  %v3499_v13 = vunpack.c.h.bf16 %v3809_v7  ;;  %v3402_v16 = vunpack.c.l.bf16 %v3785_v62  ;;  %v3434_v17 = vunpack.c.l.bf16 %v3793_v63  ;;  %v3808_v19 = vld [vmem:[%s4977_s12 + $0xc8] sm:$0xff]  }
  0x27   : > { %1092 = vmatpush.msrb.mxu0 %v3483_v24  ;;  %1112 = vmatpush.msrb.mxu1 %v3515_v25  ;;  %v3466_v20 = vunpack.c.l.bf16 %v3801_v2  ;;  %v3498_v21 = vunpack.c.l.bf16 %v3809_v7  ;;  %v3399_v22 = vunpack.c.h.bf16 %v3784_v14  ;;  %v3431_v23 = vunpack.c.h.bf16 %v3792_v15  ;;  %v3818_v2 = vld [vmem:[%s4977_s12 + $0x118] sm:$0xff]  }
  0x28   : > { %1133 = vmatpush.msrb.mxu2 %v3418_v28  ;;  %1153 = vmatpush.msrb.mxu3 %v3450_v29  ;;  %v3463_v24 = vunpack.c.h.bf16 %v3800_v18  ;;  %v3495_v25 = vunpack.c.h.bf16 %v3808_v19  ;;  %v3398_v27 = vunpack.c.l.bf16 %v3784_v14  ;;  %v3430_v28 = vunpack.c.l.bf16 %v3792_v15  ;;  %v3826_v7 = vld [vmem:[%s4977_s12 + $0x158] sm:$0xff]  }
  0x29   : > { %1093 = vmatpush.msrb.mxu0 %v3482_v32  ;;  %1113 = vmatpush.msrb.mxu1 %v3514_v33  ;;  %v3395_v29 = vunpack.c.h.bf16 %v3393_v26  ;;  %v3462_v31 = vunpack.c.l.bf16 %v3800_v18  ;;  %v3494_v32 = vunpack.c.l.bf16 %v3808_v19  ;;  %v3394_v33 = vunpack.c.l.bf16 %v3393_v26  ;;  %v3838_v14 = vld [vmem:[%s4977_s12 + $0x1b8] sm:$0xff]   ;;  %v3186_v18 = vld [vmem:[%s4976_s29 + $0x10] sm:$0xff] }
  0x2a   : > { %1134 = vmatpush.msrb.mxu2 %v3415_v34  ;;  %1154 = vmatpush.msrb.mxu3 %v3447_v35  ;;  %v3427_v34 = vunpack.c.h.bf16 %v3791_v30  ;;  %v3799_v35 = vld [vmem:[%s4977_s12 + $0x80] sm:$0xff]   ;;  %v3426_v39 = vunpack.c.l.bf16 %v3791_v30  ;;  %v3846_v15 = vld [vmem:[%s4977_s12 + $0x1f8] sm:$0xff]   ;;  %v3615_v19 = vunpack.c.h.bf16 %v3838_v14 }
  0x2b   : > { %1094 = vmatpush.msrb.mxu0 %v3479_v36  ;;  %1114 = vmatpush.msrb.mxu1 %v3511_v37  ;;  %v3807_v36 = vld [vmem:[%s4977_s12 + $0xc0] sm:$0xff]   ;;  %v3459_v37 = vunpack.c.h.bf16 %v3799_v35 }
  0x2c   : > { %1135 = vmatpush.msrb.mxu2 %v3414_v40  ;;  %1155 = vmatpush.msrb.mxu3 %v3446_v41  ;;  %v3491_v38 = vunpack.c.h.bf16 %v3807_v36  ;;  %v3458_v40 = vunpack.c.l.bf16 %v3799_v35  ;;  %v3490_v41 = vunpack.c.l.bf16 %v3807_v36  ;;  %v3843_v35 = vld [vmem:[%s4977_s12 + $0x1e0] sm:$0xff]  }
  0x2d   : > { %1095 = vmatpush.msrb.mxu0 %v3478_v44  ;;  %1115 = vmatpush.msrb.mxu1 %v3510_v45  ;;  %v3821_v44 = vld [vmem:[%s4977_s12 + $0x130] sm:$0xff]   ;;  %v3551_v45 = vunpack.c.h.bf16 %v3822_v42 }
  0x2e   : > { %1136 = vmatpush.msrb.mxu2 %v3411_v46  ;;  %1156 = vmatpush.msrb.mxu3 %v3443_v47  ;;  %v3583_v46 = vunpack.c.h.bf16 %v3830_v43  ;;  %v3550_v47 = vunpack.c.l.bf16 %v3822_v42  ;;  %v3547_v50 = vunpack.c.h.bf16 %v3821_v44  ;;  %v3546_v54 = vunpack.c.l.bf16 %v3821_v44  ;;  %v3816_v44 = vld [vmem:[%s4977_s12 + $0x108] sm:$0xff]  }
  0x2f   : > { %1096 = vmatpush.msrb.mxu0 %v3475_v48  ;;  %1116 = vmatpush.msrb.mxu1 %v3507_v49  ;;  %v3582_v48 = vunpack.c.l.bf16 %v3830_v43  ;;  %v3829_v49 = vld [vmem:[%s4977_s12 + $0x170] sm:$0xff]   ;;  %v3634_v43 = vunpack.c.l.bf16 %v3843_v35 }
  0x30   : > { %1137 = vmatpush.msrb.mxu2 %v3410_v52  ;;  %1157 = vmatpush.msrb.mxu3 %v3442_v53  ;;  %v3579_v51 = vunpack.c.h.bf16 %v3829_v49  ;;  %v3820_v52 = vld [vmem:[%s4977_s12 + $0x128] sm:$0xff]   ;;  %v3578_v55 = vunpack.c.l.bf16 %v3829_v49 }
  0x31   : > { %1097 = vmatpush.msrb.mxu0 %v3474_v56  ;;  %1117 = vmatpush.msrb.mxu1 %v3506_v57  ;;  %v3828_v53 = vld [vmem:[%s4977_s12 + $0x168] sm:$0xff]   ;;  %v3543_v56 = vunpack.c.h.bf16 %v3820_v52 }
  0x32   : > { %1138 = vmatpush.msrb.mxu2 %v3407_v58  ;;  %1158 = vmatpush.msrb.mxu3 %v3439_v59  ;;  %v3575_v57 = vunpack.c.h.bf16 %v3828_v53  ;;  %v3819_v58 = vld [vmem:[%s4977_s12 + $0x120] sm:$0xff]  }
  0x33   : > { %1098 = vmatpush.msrb.mxu0 %v3471_v60  ;;  %1118 = vmatpush.msrb.mxu1 %v3503_v61  ;;  %v3827_v59 = vld [vmem:[%s4977_s12 + $0x160] sm:$0xff]   ;;  %v3542_v60 = vunpack.c.l.bf16 %v3820_v52  ;;  %v3574_v61 = vunpack.c.l.bf16 %v3828_v53  ;;  %v3526_v52 = vunpack.c.l.bf16 %v3816_v44 }
  0x34   : > { %1139 = vmatpush.msrb.mxu2 %v3406_v0  ;;  %1159 = vmatpush.msrb.mxu3 %v3438_v1  ;;  %v3539_v0 = vunpack.c.h.bf16 %v3819_v58  ;;  %v3571_v1 = vunpack.c.h.bf16 %v3827_v59 }
  0x35   : > { %1099 = vmatpush.msrb.mxu0 %v3470_v8  ;;  %1119 = vmatpush.msrb.mxu1 %v3502_v9  ;;  %v3538_v8 = vunpack.c.l.bf16 %v3819_v58  ;;  %v3570_v9 = vunpack.c.l.bf16 %v3827_v59  ;;  %v3833_v58 = vld [vmem:[%s4977_s12 + $0x190] sm:$0xff]  }
  0x36   : > { %1140 = vmatpush.msrb.mxu2 %v3403_v10  ;;  %1160 = vmatpush.msrb.mxu3 %v3435_v11 }
  0x37   : > { %1100 = vmatpush.msrb.mxu0 %v3467_v12  ;;  %1120 = vmatpush.msrb.mxu1 %v3499_v13  ;;  %v3535_v12 = vunpack.c.h.bf16 %v3818_v2  ;;  %v3567_v13 = vunpack.c.h.bf16 %v3826_v7 }
  0x38   : > { %1141 = vmatpush.msrb.mxu2 %v3402_v16  ;;  %1161 = vmatpush.msrb.mxu3 %v3434_v17  ;;  %v3534_v16 = vunpack.c.l.bf16 %v3818_v2  ;;  %v3566_v17 = vunpack.c.l.bf16 %v3826_v7  ;;  %v3594_v2 = vunpack.c.l.bf16 %v3833_v58 }
  0x39   : > { %1101 = vmatpush.msrb.mxu0 %v3466_v20  ;;  %1121 = vmatpush.msrb.mxu1 %v3498_v21  ;;  %v3647_v20 = vunpack.c.h.bf16 %v3846_v15 }
  0x3a   : > { %1142 = vmatpush.msrb.mxu2 %v3399_v22  ;;  %1162 = vmatpush.msrb.mxu3 %v3431_v23  ;;  %v3614_v23 = vunpack.c.l.bf16 %v3838_v14  ;;  %v3831_v14 = vld [vmem:[%s4977_s12 + $0x180] sm:$0xff]  }
  0x3b   : > { %1102 = vmatpush.msrb.mxu0 %v3463_v24  ;;  %1122 = vmatpush.msrb.mxu1 %v3495_v25  ;;  %v3646_v24 = vunpack.c.l.bf16 %v3846_v15  ;;  %v3839_v15 = vld [vmem:[%s4977_s12 + $0x1c0] sm:$0xff]  }
  0x3c   : > { %1143 = vmatpush.msrb.mxu2 %v3398_v27  ;;  %1163 = vmatpush.msrb.mxu3 %v3430_v28  ;;  %v3836_v27 = vld [vmem:[%s4977_s12 + $0x1a8] sm:$0xff]  }
  0x3d   : > { %1103 = vmatpush.msrb.mxu0 %v3462_v31  ;;  %1123 = vmatpush.msrb.mxu1 %v3494_v32  ;;  %v3844_v28 = vld [vmem:[%s4977_s12 + $0x1e8] sm:$0xff]   ;;  %v3221_v31 = vld [vmem:[%s4976_s29 + $0x18] sm:$0xff]  ;;  %v3607_v32 = vunpack.c.h.bf16 %v3836_v27  ;;  %v3606_v36 = vunpack.c.l.bf16 %v3836_v27 }
  0x3e   : > { %1144 = vmatpush.msrb.mxu2 %v3395_v29  ;;  %1164 = vmatpush.msrb.mxu3 %v3427_v34  ;;  %v3835_v34 = vld [vmem:[%s4977_s12 + $0x1a0] sm:$0xff]  }
  0x3f   : > { %1104 = vmatpush.msrb.mxu0 %v3459_v37  ;;  %1124 = vmatpush.msrb.mxu1 %v3491_v38  ;;  %v3638_v37 = vunpack.c.l.bf16 %v3844_v28  ;;  %v3603_v38 = vunpack.c.h.bf16 %v3835_v34  ;;  %v3602_v42 = vunpack.c.l.bf16 %v3835_v34  ;;  %v3885_v34 = vld [vmem:[%s4978_s9] ss:$0 sm:$0xff]  ;;  %s4983_s9 = sld [smem:[#allocation9_spill]] }
  0x40   : > { %1145 = vmatpush.msrb.mxu2 %v3394_v33  ;;  %1165 = vmatpush.msrb.mxu3 %v3426_v39  ;;  %v3639_v33 = vunpack.c.h.bf16 %v3844_v28  ;;  %v3635_v39 = vunpack.c.h.bf16 %v3843_v35 }
  0x41   : > { %1105 = vmatpush.msrb.mxu0 %v3458_v40  ;;  %1125 = vmatpush.msrb.mxu1 %v3490_v41 }
  0x42   : > { %1280 = vmatpush.msra.mxu2 %v3551_v45  ;;  %1300 = vmatpush.msra.mxu3 %v3583_v46  ;;  %v3824_v45 = vld [vmem:[%s4977_s12 + $0x148] sm:$0xff]   ;;  %v3834_v46 = vld [vmem:[%s4977_s12 + $0x198] sm:$0xff]  }
  0x43   : > { %1189 = vmatpush.msra.mxu0 %v4070_v3  ;;  %1209 = vmatpush.msra.mxu1 %v4072_v4  ;;  %v3599_v49 = vunpack.c.h.bf16 %v3834_v46  ;;  %v3558_v53 = vunpack.c.l.bf16 %v3824_v45 }
  0x44   : > { %1281 = vmatpush.msra.mxu2 %v3550_v47  ;;  %1301 = vmatpush.msra.mxu3 %v3582_v48  ;;  %v3527_v47 = vunpack.c.h.bf16 %v3816_v44  ;;  %v3559_v48 = vunpack.c.h.bf16 %v3824_v45 }
  0x45   : > { %1190 = vmatpush.msra.mxu0 %v4074_v5  ;;  %1210 = vmatpush.msra.mxu1 %v4078_v6 }
  0x46   : > { %1282 = vmatpush.msra.mxu2 %v3547_v50  ;;  %1302 = vmatpush.msra.mxu3 %v3579_v51  ;;  %v3842_v50 = vld [vmem:[%s4977_s12 + $0x1d8] sm:$0xff]  }
  0x47   : > { %v3631_v51 = vunpack.c.h.bf16 %v3842_v50 }
  0x48   : > { %1283 = vmatpush.msra.mxu2 %v3546_v54  ;;  %1303 = vmatpush.msra.mxu3 %v3578_v55  ;;  %v3598_v54 = vunpack.c.l.bf16 %v3834_v46  ;;  %v3630_v55 = vunpack.c.l.bf16 %v3842_v50  ;;  %v3265_v46 = vld [vmem:[%s4980_s7 + $0x10] sm:$0xff] }
  0x4a   : > { %1284 = vmatpush.msra.mxu2 %v3543_v56  ;;  %1304 = vmatpush.msra.mxu3 %v3575_v57  ;;  %v3815_v56 = vld [vmem:[%s4977_s12 + $0x100] sm:$0xff]  }
  0x4b   : > { %v3823_v57 = vld [vmem:[%s4977_s12 + $0x140] sm:$0xff]   ;;  %v3523_v59 = vunpack.c.h.bf16 %v3815_v56 }
  0x4c   : > { %1285 = vmatpush.msra.mxu2 %v3542_v60  ;;  %1305 = vmatpush.msra.mxu3 %v3574_v61  ;;  %v3555_v60 = vunpack.c.h.bf16 %v3823_v57  ;;  %v3595_v61 = vunpack.c.h.bf16 %v3833_v58 }
  0x4e   : > { %1286 = vmatpush.msra.mxu2 %v3539_v0  ;;  %1306 = vmatpush.msra.mxu3 %v3571_v1  ;;  %v3522_v0 = vunpack.c.l.bf16 %v3815_v56  ;;  %v3554_v1 = vunpack.c.l.bf16 %v3823_v57  ;;  %v3850_v56 = vld [vmem:[%s4979_s6 + $0x20] sm:$0xff]  }
  0x4f   : > { %v3667_v57 = vunpack.c.h.bf16 %v3850_v56  ;;  %v3666_v58 = vunpack.c.l.bf16 %v3850_v56 }
  0x50   : > { %1287 = vmatpush.msra.mxu2 %v3538_v8  ;;  %1307 = vmatpush.msra.mxu3 %v3570_v9  ;;  %v3832_v8 = vld [vmem:[%s4977_s12 + $0x188] sm:$0xff]  }
  0x51   : > { %v3840_v9 = vld [vmem:[%s4977_s12 + $0x1c8] sm:$0xff]  }
  0x52   : > { %1288 = vmatpush.msra.mxu2 %v3535_v12  ;;  %1308 = vmatpush.msra.mxu3 %v3567_v13  ;;  %v3590_v12 = vunpack.c.l.bf16 %v3832_v8  ;;  %v3622_v13 = vunpack.c.l.bf16 %v3840_v9 }
  0x54   : > { %1289 = vmatpush.msra.mxu2 %v3534_v16  ;;  %1309 = vmatpush.msra.mxu3 %v3566_v17  ;;  %v3587_v16 = vunpack.c.h.bf16 %v3831_v14  ;;  %v3619_v17 = vunpack.c.h.bf16 %v3839_v15 }
  0x9e   : > { %v893_v62 = vpop.f32.mrf.mxu0  ;;  %v913_v63 = vpop.f32.mrf.mxu1 }
  0x9f   : > { %1146 = vmatmul.f32.vlgmr.msrb.gmra.mxu2 %v893_v62  ;;  %1166 = vmatmul.f32.vlgmr.msrb.gmra.mxu3 %v913_v63  ;;  %v3841_v62 = vld [vmem:[%s4977_s12 + $0x1d0] sm:$0xff]  }
  0xa0   : > { %v3627_v63 = vunpack.c.h.bf16 %v3841_v62  ;;  %v3626_v7 = vunpack.c.l.bf16 %v3841_v62  ;;  %v3272_v62 = vld [vmem:[%s4980_s7 + $0x18] sm:$0xff] }
  0xa2   : > { %v1002_v10 = vpop.f32.mrf.mxu2 }
  0xa3   : > { %v1022_v11 = vpop.f32.mrf.mxu3  ;;  %1106 = vmatmul.f32.vlgmr.msrb.gmra.mxu0 %v1002_v10  ;;  %v3591_v10 = vunpack.c.h.bf16 %v3832_v8 }
  0xa4   : > { %1126 = vmatmul.f32.vlgmr.msrb.gmra.mxu1 %v1022_v11  ;;  %1340 = vmatpush.msrb.mxu0 %v4070_v3  ;;  %v3817_v3 = vld [vmem:[%s4977_s12 + $0x110] sm:$0xff]   ;;  %v3623_v11 = vunpack.c.h.bf16 %v3840_v9 }
  0xa5   : > { %1360 = vmatpush.msrb.mxu1 %v4072_v4  ;;  %v3825_v4 = vld [vmem:[%s4977_s12 + $0x150] sm:$0xff]   ;;  %v3531_v21 = vunpack.c.h.bf16 %v3817_v3  ;;  %v3530_v40 = vunpack.c.l.bf16 %v3817_v3  ;;  %v3586_v3 = vunpack.c.l.bf16 %v3831_v14 }
  0xa6   : > { %1341 = vmatpush.msrb.mxu0 %v4074_v5  ;;  %v3837_v5 = vld [vmem:[%s4977_s12 + $0x1b0] sm:$0xff]   ;;  %v3563_v22 = vunpack.c.h.bf16 %v3825_v4  ;;  %v3562_v41 = vunpack.c.l.bf16 %v3825_v4  ;;  %v3618_v4 = vunpack.c.l.bf16 %v3839_v15 }
  0xa7   : > { %1361 = vmatpush.msrb.mxu1 %v4078_v6  ;;  %v3845_v6 = vld [vmem:[%s4977_s12 + $0x1f0] sm:$0xff]   ;;  %v3611_v25 = vunpack.c.h.bf16 %v3837_v5  ;;  %1290 = vmatpush.msra.mxu2 %v3531_v21  ;;  %v3610_v29 = vunpack.c.l.bf16 %v3837_v5  ;;  %s866_s12 = scalar_lea.vmem %s4948_s28, %s4989_s5 }
  0xa8   : > { %v3643_v26 = vunpack.c.h.bf16 %v3845_v6  ;;  %1310 = vmatpush.msra.mxu3 %v3563_v22  ;;  %v3642_v30 = vunpack.c.l.bf16 %v3845_v6 }
  0xa9   : > { %1291 = vmatpush.msra.mxu2 %v3530_v40  ;;  %v1478_v40 = vld [vmem:[%s4980_s7] sm:$0xff] }
  0xaa   : > { %1311 = vmatpush.msra.mxu3 %v3562_v41 }
  0xab   : > { %3187 = vmatmul.msk.f32.vlgmr.msra.gmra.mxu0 %vm872_vm0, %v3186_v18  ;;  %1292 = vmatpush.msra.mxu2 %v3527_v47  ;;  %v3649_v47 = vld [vmem:[%s4979_s6] sm:$0xff]  }
  0xac   : > { %3188 = vmatmul.msk.f32.vlgmr.msra.gmra.mxu1 %vm872_vm0, %v3186_v18  ;;  %1431 = vmatpush.msra.mxu0 %v3615_v19  ;;  %v3651_v50 = vunpack.c.h.bf16 %v3649_v47 }
  0xad   : > { %1451 = vmatpush.msra.mxu1 %v3647_v20  ;;  %1312 = vmatpush.msra.mxu3 %v3559_v48 }
  0xae   : > { %1432 = vmatpush.msra.mxu0 %v3614_v23  ;;  %1293 = vmatpush.msra.mxu2 %v3526_v52  ;;  %v3650_v52 = vunpack.c.l.bf16 %v3649_v47  ;;  %v3705_v47 = vld [vmem:[%s4984_s0] sm:$0xff]  }
  0xaf   : > { %1452 = vmatpush.msra.mxu1 %v3646_v24  ;;  %1313 = vmatpush.msra.mxu3 %v3558_v53  ;;  %v3851_v53 = vld [vmem:[%s4979_s6 + $0x28] sm:$0xff]  }
  0xb0   : > { %1433 = vmatpush.msra.mxu0 %v3611_v25  ;;  %1294 = vmatpush.msra.mxu2 %v3523_v59 }
  0xb1   : > { %1453 = vmatpush.msra.mxu1 %v3643_v26  ;;  %1314 = vmatpush.msra.mxu3 %v3555_v60 }
  0xb2   : > { %1434 = vmatpush.msra.mxu0 %v3610_v29  ;;  %1295 = vmatpush.msra.mxu2 %v3522_v0 }
  0xb3   : > { %1454 = vmatpush.msra.mxu1 %v3642_v30  ;;  %3222 = vmatmul.msk.f32.vlgmr.msrb.gmra.mxu0 %vm872_vm0, %v3221_v31 }
  0xb4   : > { %3223 = vmatmul.msk.f32.vlgmr.msrb.gmra.mxu1 %vm872_vm0, %v3221_v31  ;;  %1435 = vmatpush.msra.mxu0 %v3607_v32 }
  0xb5   : > { %1455 = vmatpush.msra.mxu1 %v3639_v33  ;;  %1315 = vmatpush.msra.mxu3 %v3554_v1 }
  0xb6   : > { %1436 = vmatpush.msra.mxu0 %v3606_v36  ;;  %v3849_v36 = vld [vmem:[%s4979_s6 + $0x18] sm:$0xff]  }
  0xb7   : > { %1456 = vmatpush.msra.mxu1 %v3638_v37  ;;  %v3663_v41 = vunpack.c.h.bf16 %v3849_v36  ;;  %v3662_v45 = vunpack.c.l.bf16 %v3849_v36 }
  0xb8   : > { %1437 = vmatpush.msra.mxu0 %v3603_v38  ;;  %v3847_v38 = vld [vmem:[%s4979_s6 + $0x8] sm:$0xff]  }
  0xb9   : > { %1457 = vmatpush.msra.mxu1 %v3635_v39  ;;  %v3655_v44 = vunpack.c.h.bf16 %v3847_v38  ;;  %v3654_v48 = vunpack.c.l.bf16 %v3847_v38 }
  0xba   : > { %1438 = vmatpush.msra.mxu0 %v3602_v42  ;;  %v3257_v42 = vld [vmem:[%s4980_s7 + $0x8] sm:$0xff]  ;;  %s863_s7 = scalar_lea.vmem %s4947_s27, %s3390_s1 }
  0xbb   : > { %1458 = vmatpush.msra.mxu1 %v3634_v43  ;;  %v3848_v43 = vld [vmem:[%s4979_s6 + $0x10] sm:$0xff]  }
  0xbc   : > { %1439 = vmatpush.msra.mxu0 %v3599_v49  ;;  %v3659_v49 = vunpack.c.h.bf16 %v3848_v43 }
  0xbd   : > { %1459 = vmatpush.msra.mxu1 %v3631_v51  ;;  %v3658_v51 = vunpack.c.l.bf16 %v3848_v43 }
  0xbe   : > { %1440 = vmatpush.msra.mxu0 %v3598_v54  ;;  %v3671_v54 = vunpack.c.h.bf16 %v3851_v53 }
  0xbf   : > { %1460 = vmatpush.msra.mxu1 %v3630_v55  ;;  %v3670_v55 = vunpack.c.l.bf16 %v3851_v53  ;;  %v3887_v53 = vld [vmem:[%s4985_s10] ss:$0 sm:$0xff] }
  0xc0   : > { %1441 = vmatpush.msra.mxu0 %v3595_v61 }
  0xc1   : > { %1461 = vmatpush.msra.mxu1 %v3627_v63  ;;  %v3853_v63 = vld [vmem:[%s4979_s6 + $0x38] sm:$0xff]  }
  0xc2   : > { %1442 = vmatpush.msra.mxu0 %v3594_v2  ;;  %v3679_v0 = vunpack.c.h.bf16 %v3853_v63  ;;  %v3678_v1 = vunpack.c.l.bf16 %v3853_v63  ;;  %v3852_v2 = vld [vmem:[%s4979_s6 + $0x30] sm:$0xff]   ;;  %v3706_v63 = vunpack.c.l.bf16 %v3705_v47 }
  0xc3   : > { %1462 = vmatpush.msra.mxu1 %v3626_v7  ;;  %v3675_v7 = vunpack.c.h.bf16 %v3852_v2  ;;  %v3674_v8 = vunpack.c.l.bf16 %v3852_v2 }
  0xc4   : > { %1443 = vmatpush.msra.mxu0 %v3591_v10 }
  0xc5   : > { %1463 = vmatpush.msra.mxu1 %v3623_v11  ;;  %v3856_v11 = vld [vmem:[%s4981_s2 + $0x18] sm:$0xff]  }
  0xc6   : > { %1444 = vmatpush.msra.mxu0 %v3590_v12  ;;  %v3854_v12 = vld [vmem:[%s4981_s2 + $0x8] sm:$0xff]   ;;  %v3695_v14 = vunpack.c.h.bf16 %v3856_v11 }
  0xc7   : > { %1464 = vmatpush.msra.mxu1 %v3622_v13  ;;  %v3855_v13 = vld [vmem:[%s4981_s2 + $0x10] sm:$0xff]   ;;  %v3687_v15 = vunpack.c.h.bf16 %v3854_v12 }
  0xc8   : > { %1445 = vmatpush.msra.mxu0 %v3587_v16  ;;  %v3694_v16 = vunpack.c.l.bf16 %v3856_v11 }
  0xc9   : > { %1465 = vmatpush.msra.mxu1 %v3619_v17  ;;  %v3686_v17 = vunpack.c.l.bf16 %v3854_v12 }
  0xca   : > { %1446 = vmatpush.msra.mxu0 %v3586_v3  ;;  %v3681_v3 = vld [vmem:[%s4981_s2] sm:$0xff]  }
  0xcb   : > { %1466 = vmatpush.msra.mxu1 %v3618_v4  ;;  %v3691_v4 = vunpack.c.h.bf16 %v3855_v13 }
  0xcd   : > { %1641 = vmatpush.msrb.mxu1 %v3671_v54 }
  0xcf   : > { %1642 = vmatpush.msrb.mxu1 %v3670_v55 }
  0xd1   : > { %1643 = vmatpush.msrb.mxu1 %v3667_v57 }
  0xd3   : > { %1644 = vmatpush.msrb.mxu1 %v3666_v58 }
 0x120   : > { %v1107_v18 = vpop.f32.mrf.mxu0 }
 0x121   : > { %v1127_v19 = vpop.f32.mrf.mxu1 }
 0x122   : > { %v1128_v20 = vadd.f32 %v1127_v19, %v1107_v18  ;;  %v1147_v23 = vpop.f32.mrf.mxu2  ;;  %v1167_v24 = vpop.f32.mrf.mxu3  ;;  %v3683_v18 = vunpack.c.h.bf16 %v3681_v3 }
 0x124   : > { %v1148_v25 = vadd.f32 %v1147_v23, %v1128_v20 }
 0x126   : > { %v1168_v28 = vadd.f32 %v1167_v24, %v1148_v25 }
 0x128   : > { %v1192_v5 = vpop.f32.mrf.mxu0 }
 0x129   : > { %v1212_v6 = vpop.f32.mrf.mxu1  ;;  %1296 = vmatmul.f32.vlgmr.msra.gmra.mxu2 %v1192_v5 }
 0x12a   : > { %1316 = vmatmul.f32.vlgmr.msra.gmra.mxu3 %v1212_v6 }
 0x130   : > { %v1343_v21 = vpop.f32.mrf.mxu0 }
 0x131   : > { %v1363_v22 = vpop.f32.mrf.mxu1  ;;  %1447 = vmatmul.f32.vlgmr.msra.gmra.mxu0 %v1343_v21  ;;  %v3886_v21 = vld [vmem:[%s4982_s11] ss:$0 sm:$0xff]  ;;  %s4986_s11 = sld [smem:[#allocation12_spill]] }
 0x132   : > { %1467 = vmatmul.f32.vlgmr.msra.gmra.mxu1 %v1363_v22 }
 0x1ac   : > { %v1297_v26 = vpop.f32.mrf.mxu2 }
 0x1ad   : > { %v1317_v27 = vpop.f32.mrf.mxu3 }
 0x1ae   : > { %v1318_v29 = vadd.f32 %v1317_v27, %v1297_v26  ;;  %v1448_v30 = vpop.f32.mrf.mxu0  ;;  %v1714_v26 = vld [vmem:[%s4983_s9] sm:$0xff]  ;;  %v3280_v27 = vld [vmem:[%s4983_s9 + $0x8] sm:$0xff] }
 0x1af   : > { %v1468_v31 = vpop.f32.mrf.mxu1 }
 0x1b0   : > { %v1320_v32 = vadd.f32 %v1318_v29, %v1168_v28  ;;  %v1469_v33 = vadd.f32 %v1468_v31, %v1448_v30  ;;  %v3288_v28 = vld [vmem:[%s4983_s9 + $0x10] sm:$0xff]  ;;  %v3690_v29 = vunpack.c.l.bf16 %v3855_v13  ;;  %v3682_v30 = vunpack.c.l.bf16 %v3681_v3  ;;  %v3858_v31 = vld [vmem:[%s4981_s2 + $0x28] sm:$0xff]   ;;  %v2067_v13 = vld [vmem:[%s4933_s13] sm:$0xf] }
 0x1b2   : > { %v1471_v35 = vadd.f32 %v1469_v33, %v1320_v32  ;;  %v3703_v32 = vunpack.c.h.bf16 %v3858_v31  ;;  %v3702_v33 = vunpack.c.l.bf16 %v3858_v31  ;;  %v3321_v31 = vld [vmem:[%s4935_s15 + $0x10] sm:$0xff] }
 0x1b4   : > { %v1476_v37 = vadd.f32 %v3885_v34, %v1471_v35  ;;  %v3857_v34 = vld [vmem:[%s4981_s2 + $0x20] sm:$0xff]   ;;  %s4987_s2 = sld [smem:[#allocation14_spill]] }
 0x1b5   : > { %v3699_v35 = vunpack.c.h.bf16 %v3857_v34  ;;  %v3698_v36 = vunpack.c.l.bf16 %v3857_v34 }
 0x1b6   : > { %v1477_v39 = vmax.f32 %v1476_v37, 0.0 }
 0x1b8   : > { %1498 = vmatpush.msrb.mxu2 %v1477_v39  ;;  %1531 = vmatpush.msrb.mxu3 %v1477_v39 }
 0x1b9   : > { %1612 = vmatpush.msrb.mxu0 %v1477_v39  ;;  %3256 = vmatmul.msk.f32.vlgmr.msrb.gmra.mxu2 %vm1479_vm1, %v1478_v40  ;;  %v3861_v40 = vld [vmem:[%s4984_s0 + $0x18] sm:$0xff]  }
 0x1ba   : > { %3258 = vmatmul.msk.f32.vlgmr.msrb.gmra.mxu3 %vm1479_vm1, %v3257_v42  ;;  %1561 = vmatpush.msra.mxu2 %v3663_v41  ;;  %v3859_v41 = vld [vmem:[%s4984_s0 + $0x8] sm:$0xff]   ;;  %v3860_v42 = vld [vmem:[%s4984_s0 + $0x10] sm:$0xff]   ;;  %v3719_v43 = vunpack.c.h.bf16 %v3861_v40  ;;  %v3888_v3 = vld [vmem:[%s4987_s2] ss:$0 sm:$0xff] }
 0x1bb   : > { %3266 = vmatmul.msk.f32.vlgmr.msrb.gmra.mxu0 %vm1479_vm1, %v3265_v46  ;;  %1584 = vmatpush.msra.mxu3 %v3655_v44  ;;  %v3711_v44 = vunpack.c.h.bf16 %v3859_v41  ;;  %v3710_v46 = vunpack.c.l.bf16 %v3859_v41  ;;  %v3867_v41 = vld [vmem:[%s4936_s16 + $0x20] sm:$0xff]  }
 0x1bc   : > { %1562 = vmatpush.msra.mxu2 %v3662_v45  ;;  %v3718_v45 = vunpack.c.l.bf16 %v3861_v40 }
 0x1bd   : > { %1585 = vmatpush.msra.mxu3 %v3654_v48  ;;  %v3715_v48 = vunpack.c.h.bf16 %v3860_v42 }
 0x1be   : > { %1563 = vmatpush.msra.mxu2 %v3659_v49  ;;  %v3707_v49 = vunpack.c.h.bf16 %v3705_v47 }
 0x1bf   : > { %1586 = vmatpush.msra.mxu3 %v3651_v50 }
 0x1c0   : > { %1564 = vmatpush.msra.mxu2 %v3658_v51 }
 0x1c1   : > { %1587 = vmatpush.msra.mxu3 %v3650_v52 }
 0x1c2   : > { %1670 = vmatpush.msrb.mxu2 %v1477_v39 }
 0x1c3   : > { %1699 = vmatpush.msrb.mxu3 %v3679_v0  ;;  %v3863_v0 = vld [vmem:[%s4984_s0 + $0x28] sm:$0xff]  }
 0x1c4   : > { %v3726_v2 = vunpack.c.l.bf16 %v3863_v0 }
 0x1c5   : > { %1700 = vmatpush.msrb.mxu3 %v3678_v1  ;;  %v3727_v1 = vunpack.c.h.bf16 %v3863_v0  ;;  %v3891_v0 = vld [vmem:[%s4939_s19] ss:$0 sm:$0xff] }
 0x1c7   : > { %1701 = vmatpush.msrb.mxu3 %v3675_v7  ;;  %v3862_v7 = vld [vmem:[%s4984_s0 + $0x20] sm:$0xff]   ;;  %s858_s0 = scalar_lea.vmem %s4946_s26, %s3390_s1 }
 0x1c9   : > { %1702 = vmatpush.msrb.mxu3 %v3674_v8  ;;  %v3723_v8 = vunpack.c.h.bf16 %v3862_v7 }
 0x238   : > { %v1614_v59 = vpop.f32.mrf.mxu0 }
 0x239   : > { %3271 = vmatmul.msk.f32.vlgmr.msrb.gmra.mxu1 %vm1545_vm2, %v1614_v59  ;;  %v1891_v59 = vld [vmem:[%s4986_s11] sm:$0xff] }
 0x23c   : > { %v1500_v60 = vpop.f32.mrf.mxu2 }
 0x23d   : > { %v1533_v61 = vpop.f32.mrf.mxu3  ;;  %3264 = vmatmul.msk.f32.vlgmr.msra.gmra.mxu3 %vm1545_vm2, %v1500_v60  ;;  %v3296_v60 = vld [vmem:[%s4986_s11 + $0x8] sm:$0xff] }
 0x23e   : > { %3263 = vmatmul.msk.f32.vlgmr.msra.gmra.mxu2 %vm1545_vm2, %v1533_v61  ;;  %1818 = vmatpush.msra.mxu3 %v3687_v15  ;;  %v3304_v61 = vld [vmem:[%s4986_s11 + $0x10] sm:$0xff] }
 0x23f   : > { %1795 = vmatpush.msra.mxu2 %v3695_v14  ;;  %v2068_v14 = vunpack.c.l.bf16 %v2067_v13  ;;  %v3344_v13 = vld [vmem:[%s4940_s20 + $0x28] sm:$0xff] }
 0x240   : > { %1819 = vmatpush.msra.mxu3 %v3686_v17 }
 0x241   : > { %1796 = vmatpush.msra.mxu2 %v3694_v16 }
 0x242   : > { %1820 = vmatpush.msra.mxu3 %v3683_v18 }
 0x243   : > { %1797 = vmatpush.msra.mxu2 %v3691_v4 }
 0x244   : > { %1821 = vmatpush.msra.mxu3 %v3682_v30  ;;  %v3313_v30 = vld [vmem:[%s4935_s15 + $0x8] sm:$0xff] }
 0x245   : > { %1798 = vmatpush.msra.mxu2 %v3690_v29  ;;  %v2099_v29 = vld [vmem:[%s4935_s15] sm:$0xff] }
 0x246   : > { %3273 = vmatmul.msk.f32.vlgmr.msrb.gmra.mxu2 %vm1479_vm1, %v3272_v62  ;;  %v3714_v62 = vunpack.c.l.bf16 %v3860_v42 }
 0x2b6   : > { %v1646_v5 = vpop.f32.mrf.mxu1 }
 0x2c0   : > { %v1589_v19 = vpop.f32.mrf.mxu3 }
 0x2c1   : > { %v1566_v9 = vpop.f32.mrf.mxu2 }
 0x2c2   : > { %v1590_v20 = vadd.f32 %v1589_v19, %v1566_v9  ;;  %v3722_v9 = vunpack.c.l.bf16 %v3862_v7 }
 0x2c4   : > { %v1649_v6 = vadd.f32 %v1646_v5, %v1590_v20  ;;  %v3864_v5 = vld [vmem:[%s4936_s16 + $0x8] sm:$0xff]  }
 0x2c9   : > { %v1672_v10 = vpop.f32.mrf.mxu2 }
 0x2ca   : > { %3278 = vmatmul.msk.f32.vlgmr.msrb.gmra.mxu3 %vm1545_vm2, %v1672_v10 }
 0x34d   : > { %v1704_v22 = vpop.f32.mrf.mxu3 }
 0x34e   : > { %v1707_v23 = vadd.f32 %v1704_v22, %v1649_v6  ;;  %v3729_v6 = vld [vmem:[%s4936_s16] sm:$0xff]   ;;  %v3734_v22 = vunpack.c.l.bf16 %v3864_v5 }
 0x34f   : > { %v3730_v34 = vunpack.c.l.bf16 %v3729_v6 }
 0x350   : > { %v1712_v24 = vadd.f32 %v3886_v21, %v1707_v23  ;;  %v3735_v21 = vunpack.c.h.bf16 %v3864_v5  ;;  %v3731_v23 = vunpack.c.h.bf16 %v3729_v6  ;;  %v3872_v5 = vld [vmem:[%s4941_s21 + $0x20] sm:$0xff]  }
 0x351   : > { %v3771_v6 = vunpack.c.h.bf16 %v3872_v5 }
 0x352   : > { %v1713_v25 = vmax.f32 %v1712_v24, 0.0  ;;  %v3889_v24 = vld [vmem:[%s4934_s14] ss:$0 sm:$0xff] }
 0x354   : > { %1733 = vmatpush.msra.mxu0 %v1713_v25  ;;  %1766 = vmatpush.msra.mxu1 %v1713_v25 }
 0x355   : > { %3279 = vmatmul.msk.f32.vlgmr.msra.gmra.mxu0 %vm1479_vm1, %v1714_v26  ;;  %3281 = vmatmul.msk.f32.vlgmr.msra.gmra.mxu1 %vm1479_vm1, %v3280_v27 }
 0x356   : > { %1846 = vmatpush.msrb.mxu0 %v1713_v25  ;;  %1875 = vmatpush.msrb.mxu1 %v3703_v32  ;;  %v3866_v32 = vld [vmem:[%s4936_s16 + $0x18] sm:$0xff]  }
 0x358   : > { %1876 = vmatpush.msrb.mxu1 %v3702_v33  ;;  %1972 = vmatpush.msra.mxu0 %v3719_v43  ;;  %v3743_v33 = vunpack.c.h.bf16 %v3866_v32  ;;  %v3747_v43 = vunpack.c.h.bf16 %v3867_v41 }
 0x35a   : > { %1877 = vmatpush.msrb.mxu1 %v3699_v35  ;;  %1973 = vmatpush.msra.mxu0 %v3718_v45  ;;  %v3868_v35 = vld [vmem:[%s4936_s16 + $0x28] sm:$0xff]  }
 0x35c   : > { %1878 = vmatpush.msrb.mxu1 %v3698_v36  ;;  %1974 = vmatpush.msra.mxu0 %v3715_v48  ;;  %v3742_v36 = vunpack.c.l.bf16 %v3866_v32  ;;  %v2275_v48 = vld [vmem:[%s4938_s18] sm:$0xf] }
 0x35d   : > { %3289 = vmatmul.msk.f32.vlgmr.msrb.gmra.mxu0 %vm1479_vm1, %v3288_v28 }
 0x35e   : > { %1995 = vmatpush.msra.mxu1 %v3711_v44  ;;  %1975 = vmatpush.msra.mxu0 %v3714_v62  ;;  %v3746_v44 = vunpack.c.l.bf16 %v3867_v41  ;;  %v2683_v41 = vld [vmem:[%s4944_s24 + $0xc8] sm:$0xff] }
 0x360   : > { %1996 = vmatpush.msra.mxu1 %v3710_v46  ;;  %2087 = vmatpush.msrb.mxu0 %v2068_v14  ;;  %v3869_v14 = vld [vmem:[%s4941_s21 + $0x8] sm:$0xff]  }
 0x362   : > { %1997 = vmatpush.msra.mxu1 %v3707_v49  ;;  %v2276_v49 = vunpack.c.l.bf16 %v2275_v48  ;;  %v2674_v48 = vld [vmem:[%s4944_s24 + $0x80] sm:$0xff] }
 0x364   : > { %1998 = vmatpush.msra.mxu1 %v3706_v63 }
 0x3d2   : > { %v1735_v37 = vpop.f32.mrf.mxu0  ;;  %v1768_v38 = vpop.f32.mrf.mxu1 }
 0x3d3   : > { %3286 = vmatmul.msk.f32.vlgmr.msra.gmra.mxu2 %vm1545_vm2, %v1768_v38  ;;  %3287 = vmatmul.msk.f32.vlgmr.msra.gmra.mxu3 %vm1545_vm2, %v1735_v37  ;;  %v3751_v37 = vunpack.c.h.bf16 %v3868_v35  ;;  %v3865_v38 = vld [vmem:[%s4936_s16 + $0x10] sm:$0xff]  }
 0x3d4   : > { %v3739_v40 = vunpack.c.h.bf16 %v3865_v38  ;;  %v3738_v42 = vunpack.c.l.bf16 %v3865_v38  ;;  %v2688_v38 = vld [vmem:[%s4944_s24 + $0xf0] sm:$0xff] }
 0x3da   : > { %v1848_v39 = vpop.f32.mrf.mxu0 }
 0x3db   : > { %3294 = vmatmul.msk.f32.vlgmr.msrb.gmra.mxu1 %vm1545_vm2, %v1848_v39  ;;  %v3750_v39 = vunpack.c.l.bf16 %v3868_v35 }
 0x456   : > { %v1800_v50 = vpop.f32.mrf.mxu2  ;;  %v1823_v51 = vpop.f32.mrf.mxu3 }
 0x457   : > { %v1824_v52 = vadd.f32 %v1823_v51, %v1800_v50  ;;  %v3871_v50 = vld [vmem:[%s4941_s21 + $0x18] sm:$0xff]  }
 0x458   : > { %v1880_v54 = vpop.f32.mrf.mxu1  ;;  %v3767_v51 = vunpack.c.h.bf16 %v3871_v50 }
 0x459   : > { %v1883_v55 = vadd.f32 %v1880_v54, %v1824_v52 }
 0x45b   : > { %v1888_v56 = vadd.f32 %v3887_v53, %v1883_v55  ;;  %v3890_v55 = vld [vmem:[%s4937_s17] ss:$0 sm:$0xff] }
 0x45d   : > { %v1889_v57 = vmax.f32 %v1888_v56, 0.0 }
 0x45f   : > { %v1890_v58 = vmax.f32 %v1889_v57, 0.0 }
 0x461   : > { %1910 = vmatpush.msrb.mxu2 %v1890_v58  ;;  %1943 = vmatpush.msrb.mxu3 %v1890_v58 }
 0x462   : > { %3295 = vmatmul.msk.f32.vlgmr.msrb.gmra.mxu2 %vm1479_vm1, %v1891_v59  ;;  %3297 = vmatmul.msk.f32.vlgmr.msrb.gmra.mxu3 %vm1479_vm1, %v3296_v60  ;;  %v3766_v60 = vunpack.c.l.bf16 %v3871_v50  ;;  %v2676_v50 = vld [vmem:[%s4944_s24 + $0x90] sm:$0xff] }
 0x463   : > { %2023 = vmatpush.msra.mxu2 %v1890_v58  ;;  %2052 = vmatpush.msra.mxu3 %v3727_v1 }
 0x465   : > { %2053 = vmatpush.msra.mxu3 %v3726_v2 }
 0x467   : > { %2054 = vmatpush.msra.mxu3 %v3723_v8  ;;  %v2306_v8 = vld [vmem:[%s4940_s20] sm:$0xff] }
 0x469   : > { %2055 = vmatpush.msra.mxu3 %v3722_v9  ;;  %v3331_v9 = vld [vmem:[%s4940_s20 + $0x10] sm:$0xff] }
 0x46a   : > { %3305 = vmatmul.msk.f32.vlgmr.msra.gmra.mxu2 %vm1479_vm1, %v3304_v61  ;;  %v3870_v61 = vld [vmem:[%s4941_s21 + $0x10] sm:$0xff]  }
 0x46b   : > { %2180 = vmatpush.msrb.mxu3 %v3743_v33  ;;  %v3763_v62 = vunpack.c.h.bf16 %v3870_v61  ;;  %v3762_v63 = vunpack.c.l.bf16 %v3870_v61  ;;  %v3874_v33 = vld [vmem:[%s4941_s21 + $0x30] sm:$0xff]   ;;  %v2667_v61 = vld [vmem:[%s4944_s24 + $0x48] sm:$0xff] }
 0x46c   : > { %v3778_v35 = vunpack.c.l.bf16 %v3874_v33 }
 0x46d   : > { %2181 = vmatpush.msrb.mxu3 %v3742_v36  ;;  %v2686_v36 = vld [vmem:[%s4944_s24 + $0xe0] sm:$0xff] }
 0x46f   : > { %2182 = vmatpush.msrb.mxu3 %v3739_v40  ;;  %v2682_v40 = vld [vmem:[%s4944_s24 + $0xc0] sm:$0xff] }
 0x471   : > { %2183 = vmatpush.msrb.mxu3 %v3738_v42  ;;  %v2684_v42 = vld [vmem:[%s4944_s24 + $0xd0] sm:$0xff] }
 0x4e5   : > { %v1912_v10 = vpop.f32.mrf.mxu2  ;;  %v1945_v11 = vpop.f32.mrf.mxu3 }
 0x4e6   : > { %3302 = vmatmul.msk.f32.vlgmr.msra.gmra.mxu0 %vm1545_vm2, %v1945_v11  ;;  %3303 = vmatmul.msk.f32.vlgmr.msra.gmra.mxu1 %vm1545_vm2, %v1912_v10  ;;  %v2307_v10 = vld [vmem:[%s4940_s20 + $0x8] sm:$0xff]  ;;  %v3332_v11 = vld [vmem:[%s4940_s20 + $0x18] sm:$0xff] }
 0x4e7   : > { %2203 = vmatpush.msra.mxu0 %v3735_v21  ;;  %v3770_v21 = vunpack.c.l.bf16 %v3872_v5 }
 0x4e9   : > { %2204 = vmatpush.msra.mxu0 %v3734_v22 }
 0x4eb   : > { %2205 = vmatpush.msra.mxu0 %v3731_v23 }
 0x4ed   : > { %v2025_v12 = vpop.f32.mrf.mxu2  ;;  %2206 = vmatpush.msra.mxu0 %v3730_v34  ;;  %v3779_v34 = vunpack.c.h.bf16 %v3874_v33 }
 0x4ee   : > { %3310 = vmatmul.msk.f32.vlgmr.msra.gmra.mxu3 %vm1545_vm2, %v2025_v12  ;;  %v3343_v12 = vld [vmem:[%s4940_s20 + $0x20] sm:$0xff] }
 0x4ef   : > { %2295 = vmatpush.msra.mxu3 %v2276_v49  ;;  %v2675_v49 = vld [vmem:[%s4944_s24 + $0x88] sm:$0xff] }
 0x563   : > { %v1977_v15 = vpop.f32.mrf.mxu0  ;;  %v2000_v16 = vpop.f32.mrf.mxu1 }
 0x564   : > { %v2001_v17 = vadd.f32 %v2000_v16, %v1977_v15  ;;  %v3759_v15 = vunpack.c.h.bf16 %v3869_v14  ;;  %v3758_v16 = vunpack.c.l.bf16 %v3869_v14 }
 0x571   : > { %v2057_v4 = vpop.f32.mrf.mxu3 }
 0x572   : > { %v2060_v18 = vadd.f32 %v2057_v4, %v2001_v17  ;;  %v3753_v17 = vld [vmem:[%s4941_s21] sm:$0xff]  }
 0x573   : > { %v3754_v4 = vunpack.c.l.bf16 %v3753_v17 }
 0x574   : > { %v2065_v19 = vadd.f32 %v3888_v3, %v2060_v18  ;;  %v3755_v3 = vunpack.c.h.bf16 %v3753_v17  ;;  %v3873_v18 = vld [vmem:[%s4941_s21 + $0x28] sm:$0xff]   ;;  %v3892_v17 = vld [vmem:[%s4942_s22] ss:$0 sm:$0xff] }
 0x576   : > { %v2066_v20 = vmax.f32 %v2065_v19, 0.0  ;;  %v3775_v19 = vunpack.c.h.bf16 %v3873_v18 }
 0x578   : > { %3311 = vmatmul.msk.f32.vlgmr.msrb.gmra.mxu0 %vm1479_vm1, %v2066_v20  ;;  %v3774_v20 = vunpack.c.l.bf16 %v3873_v18 }
 0x5f5   : > { %v2089_v25 = vpop.f32.mrf.mxu0 }
 0x5f6   : > { %v2092_v26 = vadd.f32 %v2089_v25, %v1889_v57 }
 0x5f8   : > { %v4432_v27 = vadd.f32 %v3889_v24, %v2092_v26  ;;  %v3353_v26 = vld [vmem:[%s4940_s20 + $0x30] sm:$0xff] }
 0x5fa   : > { %v2098_v28 = vmax.f32 %v4432_v27, 0.0 }
 0x5fc   : > { %2118 = vmatpush.msrb.mxu1 %v2098_v28  ;;  %2151 = vmatpush.msrb.mxu2 %v2098_v28 }
 0x5fd   : > { %3312 = vmatmul.msk.f32.vlgmr.msrb.gmra.mxu1 %vm1479_vm1, %v2099_v29  ;;  %3314 = vmatmul.msk.f32.vlgmr.msrb.gmra.mxu2 %vm1479_vm1, %v3313_v30  ;;  %v3875_v30 = vld [vmem:[%s4941_s21 + $0x38] sm:$0xff]  }
 0x5fe   : > { %2231 = vmatpush.msra.mxu1 %v2098_v28  ;;  %2260 = vmatpush.msra.mxu2 %v3751_v37  ;;  %v3354_v28 = vld [vmem:[%s4940_s20 + $0x38] sm:$0xff]  ;;  %v3782_v32 = vunpack.c.l.bf16 %v3875_v30  ;;  %v2687_v37 = vld [vmem:[%s4944_s24 + $0xe8] sm:$0xff] }
 0x600   : > { %2261 = vmatpush.msra.mxu2 %v3750_v39  ;;  %v2689_v39 = vld [vmem:[%s4944_s24 + $0xf8] sm:$0xff] }
 0x602   : > { %2262 = vmatpush.msra.mxu2 %v3747_v43  ;;  %v2685_v43 = vld [vmem:[%s4944_s24 + $0xd8] sm:$0xff] }
 0x604   : > { %2263 = vmatpush.msra.mxu2 %v3746_v44  ;;  %v2678_v44 = vld [vmem:[%s4944_s24 + $0xa0] sm:$0xff] }
 0x605   : > { %3322 = vmatmul.msk.f32.vlgmr.msra.gmra.mxu1 %vm1479_vm1, %v3321_v31  ;;  %v3783_v31 = vunpack.c.h.bf16 %v3875_v30 }
 0x606   : > { %2404 = vmatpush.msrb.mxu2 %v3767_v51  ;;  %v2677_v51 = vld [vmem:[%s4944_s24 + $0x98] sm:$0xff] }
 0x608   : > { %2405 = vmatpush.msrb.mxu2 %v3766_v60  ;;  %v2666_v60 = vld [vmem:[%s4944_s24 + $0x40] sm:$0xff] }
 0x60a   : > { %2406 = vmatpush.msrb.mxu2 %v3763_v62  ;;  %v2668_v62 = vld [vmem:[%s4944_s24 + $0x50] sm:$0xff] }
 0x60c   : > { %2407 = vmatpush.msrb.mxu2 %v3762_v63  ;;  %v2669_v63 = vld [vmem:[%s4944_s24 + $0x58] sm:$0xff] }
 0x67a   : > { %v2120_v45 = vpop.f32.mrf.mxu1 }
 0x67b   : > { %3320 = vmatmul.msk.f32.vlgmr.msra.gmra.mxu0 %vm1545_vm2, %v2120_v45  ;;  %v2679_v45 = vld [vmem:[%s4944_s24 + $0xa8] sm:$0xff] }
 0x680   : > { %v2153_v46 = vpop.f32.mrf.mxu2 }
 0x681   : > { %3319 = vmatmul.msk.f32.vlgmr.msrb.gmra.mxu3 %vm1545_vm2, %v2153_v46  ;;  %v2680_v46 = vld [vmem:[%s4944_s24 + $0xb0] sm:$0xff] }
 0x682   : > { %v2233_v47 = vpop.f32.mrf.mxu1  ;;  %2433 = vmatpush.msrb.mxu3 %v3759_v15 }
 0x683   : > { %3327 = vmatmul.msk.f32.vlgmr.msra.gmra.mxu2 %vm1545_vm2, %v2233_v47  ;;  %v2681_v47 = vld [vmem:[%s4944_s24 + $0xb8] sm:$0xff] }
 0x684   : > { %2434 = vmatpush.msrb.mxu3 %v3758_v16 }
 0x686   : > { %2435 = vmatpush.msrb.mxu3 %v3755_v3 }
 0x688   : > { %2436 = vmatpush.msrb.mxu3 %v3754_v4 }
 0x6f8   : > { %v2208_v52 = vpop.f32.mrf.mxu0 }
 0x704   : > { %v2185_v53 = vpop.f32.mrf.mxu3 }
 0x705   : > { %v2209_v54 = vadd.f32 %v2208_v52, %v2185_v53  ;;  %v2670_v52 = vld [vmem:[%s4944_s24 + $0x60] sm:$0xff]  ;;  %v2671_v53 = vld [vmem:[%s4944_s24 + $0x68] sm:$0xff] }
 0x706   : > { %v2265_v56 = vpop.f32.mrf.mxu2 }
 0x707   : > { %v2268_v57 = vadd.f32 %v2265_v56, %v2209_v54  ;;  %v2673_v56 = vld [vmem:[%s4944_s24 + $0x78] sm:$0xff] }
 0x709   : > { %v2273_v58 = vadd.f32 %v3890_v55, %v2268_v57  ;;  %v2672_v55 = vld [vmem:[%s4944_s24 + $0x70] sm:$0xff] }
 0x70b   : > { %v2274_v59 = vmax.f32 %v2273_v58, 0.0 }
 0x70d   : > { %3328 = vmatmul.msk.f32.vlgmr.msra.gmra.mxu3 %vm1479_vm1, %v2274_v59 }
 0x70e   : > { %2575 = vmatpush.msra.mxu3 %v3783_v31 }
 0x710   : > { %2576 = vmatpush.msra.mxu3 %v3782_v32 }
 0x712   : > { %2577 = vmatpush.msra.mxu3 %v3779_v34 }
 0x714   : > { %2578 = vmatpush.msra.mxu3 %v3778_v35 }
 0x790   : > { %v2297_v1 = vpop.f32.mrf.mxu3 }
 0x791   : > { %v2300_v2 = vadd.f32 %v2297_v1, %v4432_v27  ;;  %v2663_v1 = vld [vmem:[%s4944_s24 + $0x28] sm:$0xff] }
 0x793   : > { %v2305_v7 = vadd.f32 %v3891_v0, %v2300_v2  ;;  %v2662_v0 = vld [vmem:[%s4944_s24 + $0x20] sm:$0xff]  ;;  %v2664_v2 = vld [vmem:[%s4944_s24 + $0x30] sm:$0xff] }
 0x795   : > { %2329 = vmatpush.msrb.mxu0 %v2305_v7  ;;  %2369 = vmatpush.msrb.mxu1 %v2305_v7 }
 0x796   : > { %2540 = vmatpush.msra.mxu2 %v2305_v7  ;;  %3329 = vmatmul.msk.f32.vlgmr.msrb.gmra.mxu0 %vm1479_vm1, %v2306_v8  ;;  %v2658_v8 = vld [vmem:[%s4944_s24] sm:$0xff] }
 0x797   : > { %3333 = vmatmul.msk.f32.vlgmr.msrb.gmra.mxu1 %vm1479_vm1, %v3331_v9  ;;  %2468 = vmatpush.msra.mxu0 %v2305_v7  ;;  %v2665_v7 = vld [vmem:[%s4944_s24 + $0x38] sm:$0xff]  ;;  %v2659_v9 = vld [vmem:[%s4944_s24 + $0x8] sm:$0xff] }
 0x798   : > { %2503 = vmatpush.msra.mxu1 %v3775_v19 }
 0x799   : > { %2705 = vmatpush.msrb.mxu0 %v2686_v36 }
 0x79a   : > { %2504 = vmatpush.msra.mxu1 %v3774_v20 }
 0x79b   : > { %2706 = vmatpush.msrb.mxu0 %v2682_v40 }
 0x79c   : > { %2505 = vmatpush.msra.mxu1 %v3771_v6 }
 0x79d   : > { %2707 = vmatpush.msrb.mxu0 %v2678_v44 }
 0x79e   : > { %3330 = vmatmul.msk.f32.gmra.mxu0 %vm1479_vm1, %v2307_v10  ;;  %2506 = vmatpush.msra.mxu1 %v3770_v21  ;;  %v2660_v10 = vld [vmem:[%s4944_s24 + $0x10] sm:$0xff] }
 0x79f   : > { %3334 = vmatmul.msk.f32.gmra.mxu1 %vm1479_vm1, %v3332_v11  ;;  %2708 = vmatpush.msrb.mxu0 %v2674_v48  ;;  %v2661_v11 = vld [vmem:[%s4944_s24 + $0x18] sm:$0xff] }
 0x7a0   : > { %2728 = vmatpush.msrb.mxu1 %v2687_v37 }
 0x7a1   : > { %2709 = vmatpush.msrb.mxu0 %v2670_v52 }
 0x7a2   : > { %2729 = vmatpush.msrb.mxu1 %v2683_v41 }
 0x7a3   : > { %2710 = vmatpush.msrb.mxu0 %v2666_v60 }
 0x7a4   : > { %2730 = vmatpush.msrb.mxu1 %v2679_v45 }
 0x7a5   : > { %2711 = vmatpush.msrb.mxu0 %v2662_v0 }
 0x7a6   : > { %3345 = vmatmul.msk.f32.vlgmr.msra.gmra.mxu0 %vm1479_vm1, %v3343_v12  ;;  %2731 = vmatpush.msrb.mxu1 %v2675_v49 }
 0x7a7   : > { %2712 = vmatpush.msrb.mxu0 %v2658_v8 }
 0x7a8   : > { %2732 = vmatpush.msrb.mxu1 %v2671_v53 }
 0x7aa   : > { %2733 = vmatpush.msrb.mxu1 %v2667_v61 }
 0x7ac   : > { %2734 = vmatpush.msrb.mxu1 %v2663_v1 }
 0x7ae   : > { %3346 = vmatmul.msk.f32.gmra.mxu0 %vm1479_vm1, %v3344_v13  ;;  %2735 = vmatpush.msrb.mxu1 %v2659_v9 }
 0x813   : > { %v2331_v22 = vpop.f32.mrf.mxu0 }
 0x814   : > { %v2371_v23 = vpop.f32.mrf.mxu1  ;;  %3341 = vmatmul.msk.f32.vlgmr.msrb.gmra.mxu3 %vm1545_vm2, %v2331_v22 }
 0x815   : > { %3339 = vmatmul.msk.f32.vlgmr.msrb.gmra.mxu2 %vm1545_vm2, %v2371_v23  ;;  %2774 = vmatpush.msrb.mxu3 %v2689_v39 }
 0x816   : > { %2751 = vmatpush.msrb.mxu2 %v2688_v38 }
 0x817   : > { %2775 = vmatpush.msrb.mxu3 %v2685_v43 }
 0x818   : > { %2752 = vmatpush.msrb.mxu2 %v2684_v42 }
 0x819   : > { %2776 = vmatpush.msrb.mxu3 %v2681_v47 }
 0x81a   : > { %2753 = vmatpush.msrb.mxu2 %v2680_v46 }
 0x81b   : > { %v2334_v24 = vpop.f32.mrf.mxu0  ;;  %2777 = vmatpush.msrb.mxu3 %v2677_v51 }
 0x81c   : > { %v2374_v25 = vpop.f32.mrf.mxu1  ;;  %3342 = vmatmul.msk.f32.gmra.mxu3 %vm1545_vm2, %v2334_v24  ;;  %2754 = vmatpush.msrb.mxu2 %v2676_v50 }
 0x81d   : > { %3340 = vmatmul.msk.f32.gmra.mxu2 %vm1545_vm2, %v2374_v25  ;;  %2778 = vmatpush.msrb.mxu3 %v2673_v56  ;;  %v2789_v25 = vld [vmem:[%s4945_s25] sm:$0xf] }
 0x81e   : > { %2755 = vmatpush.msrb.mxu2 %v2672_v55  ;;  %v2801_v30 = vperm.slane %v2789_v25, 2  ;;  %v2802_v31 = vperm.slane %v2789_v25, 3 }
 0x81f   : > { %2779 = vmatpush.msrb.mxu3 %v2669_v63 }
 0x820   : > { %2756 = vmatpush.msrb.mxu2 %v2668_v62 }
 0x821   : > { %2780 = vmatpush.msrb.mxu3 %v2665_v7 }
 0x822   : > { %2757 = vmatpush.msrb.mxu2 %v2664_v2 }
 0x823   : > { %v2470_v27 = vpop.f32.mrf.mxu0  ;;  %2781 = vmatpush.msrb.mxu3 %v2661_v11 }
 0x824   : > { %3351 = vmatmul.msk.f32.vlgmr.msra.gmra.mxu1 %vm1545_vm2, %v2470_v27  ;;  %2758 = vmatpush.msrb.mxu2 %v2660_v10  ;;  %v2800_v27 = vperm.slane %v2789_v25, 1 }
 0x825   : > { %3355 = vmatmul.msk.f32.vlgmr.msra.gmra.mxu2 %vm1479_vm1, %v3353_v26  ;;  %v2799_v26 = vperm.slane %v2789_v25, 0  ;;  %v2608_v25 = vld [vmem:[%s4943_s23 + $0x70] sm:$0xff] }
 0x82b   : > { %v2473_v29 = vpop.f32.mrf.mxu0 }
 0x82c   : > { %3352 = vmatmul.msk.f32.gmra.mxu1 %vm1545_vm2, %v2473_v29 }
 0x82d   : > { %3356 = vmatmul.msk.f32.gmra.mxu2 %vm1479_vm1, %v3354_v28 }
 0x897   : > { %v2438_v12 = vpop.f32.mrf.mxu3 }
 0x898   : > { %v2409_v54 = vpop.f32.mrf.mxu2 }
 0x899   : > { %v2439_v15 = vadd.f32 %v2438_v12, %v2409_v54 }
 0x89f   : > { %v2441_v13 = vpop.f32.mrf.mxu3 }
 0x8a0   : > { %v2412_v57 = vpop.f32.mrf.mxu2 }
 0x8a1   : > { %v2508_v14 = vpop.f32.mrf.mxu1  ;;  %v2442_v20 = vadd.f32 %v2441_v13, %v2412_v57 }
 0x8a2   : > { %v2514_v16 = vadd.f32 %v2508_v14, %v2439_v15 }
 0x8a8   : > { %v2542_v58 = vpop.f32.mrf.mxu2 }
 0x8a9   : > { %3361 = vmatmul.msk.f32.vlgmr.msra.gmra.mxu3 %vm1545_vm2, %v2542_v58  ;;  %v2511_v19 = vpop.f32.mrf.mxu1  ;;  %v2825_v58 = vlaneseq }
 0x8aa   : > { %v2515_v5 = vadd.f32 %v2511_v19, %v2442_v20 }
 0x8b0   : > { %v2545_v59 = vpop.f32.mrf.mxu2 }
 0x8b1   : > { %3362 = vmatmul.msk.f32.gmra.mxu3 %vm1545_vm2, %v2545_v59  ;;  %v4659_v59 = vand.u32 127, %v2825_v58  ;;  %v2616_v58 = vld [vmem:[%s4943_s23 + $0xb0] sm:$0xff] }
 0x8b3   : > { %v4662_v60 = vadd.s32 128, %v4659_v59  ;;  %v4665_v61 = vadd.s32 256, %v4659_v59  ;;  %v4668_v62 = vadd.s32 384, %v4659_v59 }
 0x92c   : > { %v2580_v3 = vpop.f32.mrf.mxu3 }
 0x92d   : > { %v2586_v4 = vadd.f32 %v2580_v3, %v2514_v16 }
 0x92f   : > { %v4636_v18 = vadd.f32 %v3892_v17, %v2586_v4 }
 0x931   : > { %3363 = vmatmul.msk.f32.vlgmr.msrb.gmra.mxu0 %vm2690_vm3, %v4636_v18  ;;  %3365 = vmatmul.msk.f32.vlgmr.msrb.gmra.mxu1 %vm2690_vm3, %v4636_v18 }
 0x932   : > { %3367 = vmatmul.msk.f32.vlgmr.msrb.gmra.mxu2 %vm2690_vm3, %v4636_v18  ;;  %3369 = vmatmul.msk.f32.vlgmr.msrb.gmra.mxu3 %vm2690_vm3, %v4636_v18 }
 0x934   : > { %v2583_v6 = vpop.f32.mrf.mxu3 }
 0x935   : > { %v2587_v21 = vadd.f32 %v2583_v6, %v2515_v5  ;;  %v2609_v6 = vld [vmem:[%s4943_s23 + $0x78] sm:$0xff] }
 0x936   : > { %2910 = vmatpush.msra.mxu0 %v2609_v6 }
 0x937   : > { %v4646_v22 = vadd.f32 %v3892_v17, %v2587_v21  ;;  %v2625_v21 = vld [vmem:[%s4943_s23 + $0xf8] sm:$0xff] }
 0x938   : > { %2933 = vmatpush.msra.mxu1 %v2625_v21  ;;  %2911 = vmatpush.msra.mxu0 %v2608_v25  ;;  %v2596_v25 = vld [vmem:[%s4943_s23 + $0x10] sm:$0xff] }
 0x939   : > { %3364 = vmatmul.msk.f32.gmra.mxu0 %vm2690_vm3, %v4646_v22  ;;  %3366 = vmatmul.msk.f32.gmra.mxu1 %vm2690_vm3, %v4646_v22 }
 0x93a   : > { %3368 = vmatmul.msk.f32.gmra.mxu2 %vm2690_vm3, %v4646_v22  ;;  %3370 = vmatmul.msk.f32.gmra.mxu3 %vm2690_vm3, %v4646_v22 }
 0x9ae   : > { %v2714_v23 = vpop.f32.mrf.mxu0  ;;  %v2737_v24 = vpop.f32.mrf.mxu1 }
 0x9af   : > { %v2790_v28 = vmul.f32 2.0, %v2714_v23  ;;  %v2791_v29 = vmul.f32 2.0, %v2737_v24  ;;  %v2641_v23 = vld [vmem:[%s4943_s23 + $0x178] sm:$0xff] }
 0x9b0   : > { %v2657_v24 = vld [vmem:[%s4943_s23 + $0x1f8] sm:$0xff]  ;;  %2956 = vmatpush.msra.mxu2 %v2641_v23 }
 0x9b1   : > { %v2807_v36 = vsub.f32 %v2799_v26, %v2790_v28  ;;  %v2808_v37 = vsub.f32 %v2800_v27, %v2791_v29  ;;  %2979 = vmatpush.msra.mxu3 %v2657_v24  ;;  %v2656_v28 = vld [vmem:[%s4943_s23 + $0x1f0] sm:$0xff]  ;;  %v2607_v29 = vld [vmem:[%s4943_s23 + $0x68] sm:$0xff] }
 0x9b2   : > { %2912 = vmatpush.msra.mxu0 %v2607_v29  ;;  %v2627_v29 = vld [vmem:[%s4943_s23 + $0x108] sm:$0xff] }
 0x9b3   : > { %2980 = vmatpush.msra.mxu3 %v2656_v28  ;;  %v2611_v28 = vld [vmem:[%s4943_s23 + $0x88] sm:$0xff] }
 0x9b5   : > { %v2760_v32 = vpop.f32.mrf.mxu2  ;;  %v2783_v33 = vpop.f32.mrf.mxu3 }
 0x9b6   : > { %v2792_v34 = vmul.f32 2.0, %v2760_v32  ;;  %v2793_v35 = vmul.f32 2.0, %v2783_v33  ;;  %v2717_v40 = vpop.f32.mrf.mxu0  ;;  %v2740_v41 = vpop.f32.mrf.mxu1  ;;  %v2655_v32 = vld [vmem:[%s4943_s23 + $0x1e8] sm:$0xff]  ;;  %v2606_v33 = vld [vmem:[%s4943_s23 + $0x60] sm:$0xff] }
 0x9b7   : > { %v2794_v44 = vmul.f32 2.0, %v2717_v40  ;;  %v2795_v45 = vmul.f32 2.0, %v2740_v41  ;;  %2981 = vmatpush.msra.mxu3 %v2655_v32  ;;  %2913 = vmatpush.msra.mxu0 %v2606_v33  ;;  %v2653_v40 = vld [vmem:[%s4943_s23 + $0x1d8] sm:$0xff]  ;;  %v2604_v41 = vld [vmem:[%s4943_s23 + $0x50] sm:$0xff]  ;;  %v2610_v32 = vld [vmem:[%s4943_s23 + $0x80] sm:$0xff] }
 0x9b8   : > { %v2809_v38 = vsub.f32 %v2801_v30, %v2792_v34  ;;  %v2810_v39 = vsub.f32 %v2802_v31, %v2793_v35  ;;  %v2622_v34 = vld [vmem:[%s4943_s23 + $0xe0] sm:$0xff] }
 0x9b9   : > { %v2811_v51 = vsub.f32 %v2799_v26, %v2794_v44  ;;  %v2812_v52 = vsub.f32 %v2800_v27, %v2795_v45  ;;  %v2624_v26 = vld [vmem:[%s4943_s23 + $0xf0] sm:$0xff]  ;;  %v2638_v35 = vld [vmem:[%s4943_s23 + $0x160] sm:$0xff]  ;;  %v2603_v45 = vld [vmem:[%s4943_s23 + $0x48] sm:$0xff] }
 0x9ba   : > { %v2815_v42 = vmin.f32 %v2807_v36, %v2809_v38  ;;  %v2816_v43 = vmin.f32 %v2808_v37, %v2810_v39  ;;  %v2640_v27 = vld [vmem:[%s4943_s23 + $0x170] sm:$0xff]  ;;  %2934 = vmatpush.msra.mxu1 %v2624_v26  ;;  %v2626_v33 = vld [vmem:[%s4943_s23 + $0x100] sm:$0xff] }
 0x9bb   : > { %2957 = vmatpush.msra.mxu2 %v2640_v27  ;;  %v2652_v44 = vld [vmem:[%s4943_s23 + $0x1d0] sm:$0xff]  ;;  %v2595_v27 = vld [vmem:[%s4943_s23 + $0x8] sm:$0xff] }
 0x9bc   : > { %v2817_v46 = vmin.f32 %v2815_v42, %v2816_v43  ;;  %v2620_v42 = vld [vmem:[%s4943_s23 + $0xd0] sm:$0xff] }
 0x9bd   : > { %v2763_v47 = vpop.f32.mrf.mxu2  ;;  %v2786_v48 = vpop.f32.mrf.mxu3  ;;  %v2636_v43 = vld [vmem:[%s4943_s23 + $0x150] sm:$0xff] }
 0x9be   : > { %v2796_v49 = vmul.f32 2.0, %v2763_v47  ;;  %v2797_v50 = vmul.f32 2.0, %v2786_v48  ;;  %2818 = vmin.xlane.f32.xlu0 %v2817_v46  ;;  %v2619_v46 = vld [vmem:[%s4943_s23 + $0xc8] sm:$0xff]  ;;  %v2612_v26 = vld [vmem:[%s4943_s23 + $0x90] sm:$0xff] }
 0x9bf   : > { %v2635_v47 = vld [vmem:[%s4943_s23 + $0x148] sm:$0xff] }
 0x9c0   : > { %v2813_v53 = vsub.f32 %v2801_v30, %v2796_v49  ;;  %v2814_v54 = vsub.f32 %v2802_v31, %v2797_v50  ;;  %v2623_v30 = vld [vmem:[%s4943_s23 + $0xe8] sm:$0xff]  ;;  %v2602_v49 = vld [vmem:[%s4943_s23 + $0x40] sm:$0xff] }
 0x9c1   : > { %v2639_v31 = vld [vmem:[%s4943_s23 + $0x168] sm:$0xff]  ;;  %2935 = vmatpush.msra.mxu1 %v2623_v30  ;;  %v2618_v50 = vld [vmem:[%s4943_s23 + $0xc0] sm:$0xff] }
 0x9c2   : > { %v2820_v55 = vmin.f32 %v2811_v51, %v2813_v53  ;;  %v2821_v56 = vmin.f32 %v2812_v52, %v2814_v54  ;;  %2958 = vmatpush.msra.mxu2 %v2639_v31  ;;  %v2651_v48 = vld [vmem:[%s4943_s23 + $0x1c8] sm:$0xff]  ;;  %v2594_v31 = vld [vmem:[%s4943_s23] sm:$0xff] }
 0x9c3   : > { %2936 = vmatpush.msra.mxu1 %v2622_v34  ;;  %v2643_v30 = vld [vmem:[%s4943_s23 + $0x188] sm:$0xff]  ;;  %v2642_v34 = vld [vmem:[%s4943_s23 + $0x180] sm:$0xff] }
 0x9c4   : > { %v2822_v57 = vmin.f32 %v2820_v55, %v2821_v56  ;;  %2959 = vmatpush.msra.mxu2 %v2638_v35  ;;  %v2633_v55 = vld [vmem:[%s4943_s23 + $0x138] sm:$0xff] }
 0x9c5   : > { %v2649_v56 = vld [vmem:[%s4943_s23 + $0x1b8] sm:$0xff] }
 0x9c6   : > { %2823 = vmin.xlane.f32.xlu0 %v2822_v57  ;;  %v2600_v57 = vld [vmem:[%s4943_s23 + $0x30] sm:$0xff] }
 0xa31   : > { %v2819_v63 = vpop.xlane.xlu0 %2818 }
 0xa32   : > { %vm2830_vm4 = vcmp.eq.f32.partialorder %v2807_v36, %v2819_v63  ;;  %vm2831_vm5 = vcmp.eq.f32.partialorder %v2808_v37, %v2819_v63  ;;  %vm2832_vm6 = vcmp.eq.f32.partialorder %v2809_v38, %v2819_v63  ;;  %vm2833_vm7 = vcmp.eq.f32.partialorder %v2810_v39, %v2819_v63  ;;  %v2654_v36 = vld [vmem:[%s4943_s23 + $0x1e0] sm:$0xff]  ;;  %v2605_v37 = vld [vmem:[%s4943_s23 + $0x58] sm:$0xff] }
 0xa33   : > { %v2838_v0 = vsel %vm2830_vm4, %v4659_v59, 512  ;;  %v2839_v1 = vsel %vm2831_vm5, %v4662_v60, 512  ;;  %v2840_v2 = vsel %vm2832_vm6, %v4665_v61, 512  ;;  %v2841_v7 = vsel %vm2833_vm7, %v4668_v62, 512  ;;  %v2621_v38 = vld [vmem:[%s4943_s23 + $0xd8] sm:$0xff]  ;;  %2982 = vmatpush.msra.mxu3 %v2654_v36  ;;  %2914 = vmatpush.msra.mxu0 %v2605_v37 }
 0xa34   : > { %vm2846_vm8 = vcmp.lt.s32.totalorder %v2838_v0, %v2840_v2  ;;  %vm2848_vm9 = vcmp.lt.s32.totalorder %v2839_v1, %v2841_v7  ;;  %v2637_v39 = vld [vmem:[%s4943_s23 + $0x158] sm:$0xff]  ;;  %2937 = vmatpush.msra.mxu1 %v2621_v38  ;;  %vm3004_vm5 = vcmask 7168  }
 0xa35   : > { %v2847_v8 = vsel %vm2846_vm8, %v2838_v0, %v2840_v2  ;;  %v2849_v9 = vsel %vm2848_vm9, %v2839_v1, %v2841_v7  ;;  %2960 = vmatpush.msra.mxu2 %v2637_v39  ;;  %2983 = vmatpush.msra.mxu3 %v2653_v40  ;;  %v2632_v0 = vld [vmem:[%s4943_s23 + $0x130] sm:$0xff]  ;;  %v2599_v2 = vld [vmem:[%s4943_s23 + $0x28] sm:$0xff] }
 0xa36   : > { %vm2850_vm10 = vcmp.lt.s32.totalorder %v2847_v8, %v2849_v9  ;;  %2915 = vmatpush.msra.mxu0 %v2604_v41  ;;  %2938 = vmatpush.msra.mxu1 %v2620_v42  ;;  %v2648_v1 = vld [vmem:[%s4943_s23 + $0x1b0] sm:$0xff]  ;;  %v2615_v7 = vld [vmem:[%s4943_s23 + $0xa8] sm:$0xff]  ;;  %v3901_v41 = vmov 1.0  }
 0xa37   : > { %v4674_v10 = vsel %vm2850_vm10, %v2847_v8, %v2849_v9  ;;  %2961 = vmatpush.msra.mxu2 %v2636_v43  ;;  %2984 = vmatpush.msra.mxu3 %v2652_v44  ;;  %v2631_v8 = vld [vmem:[%s4943_s23 + $0x128] sm:$0xff] }
 0xa38   : > { %v2853_v11 = vshra.s32 %v4674_v10, 16  ;;  %2916 = vmatpush.msra.mxu0 %v2603_v45  ;;  %2939 = vmatpush.msra.mxu1 %v2619_v46  ;;  %v2852_v63 = vand.u32 65535, %v4674_v10  ;;  %v2647_v9 = vld [vmem:[%s4943_s23 + $0x1a8] sm:$0xff]  ;;  %v2598_v10 = vld [vmem:[%s4943_s23 + $0x20] sm:$0xff] }
 0xa39   : > { %v2824_v12 = vpop.xlane.xlu0 %2823  ;;  %2962 = vmatpush.msra.mxu2 %v2635_v47  ;;  %2985 = vmatpush.msra.mxu3 %v2651_v48 }
 0xa3a   : > { %vm2834_vm11 = vcmp.eq.f32.partialorder %v2811_v51, %v2824_v12  ;;  %vm2835_vm12 = vcmp.eq.f32.partialorder %v2812_v52, %v2824_v12  ;;  %vm2836_vm13 = vcmp.eq.f32.partialorder %v2813_v53, %v2824_v12  ;;  %vm2837_vm14 = vcmp.eq.f32.partialorder %v2814_v54, %v2824_v12  ;;  %v2634_v51 = vld [vmem:[%s4943_s23 + $0x140] sm:$0xff]  ;;  %v2601_v53 = vld [vmem:[%s4943_s23 + $0x38] sm:$0xff]  ;;  %2917 = vmatpush.msra.mxu0 %v2602_v49 }
 0xa3b   : > { %v2842_v13 = vsel %vm2834_vm11, %v4659_v59, 512  ;;  %v2843_v14 = vsel %vm2835_vm12, %v4662_v60, 512  ;;  %v2844_v15 = vsel %vm2836_vm13, %v4665_v61, 512  ;;  %v2845_v16 = vsel %vm2837_vm14, %v4668_v62, 512  ;;  %v2650_v52 = vld [vmem:[%s4943_s23 + $0x1c0] sm:$0xff]  ;;  %v2617_v54 = vld [vmem:[%s4943_s23 + $0xb8] sm:$0xff]  ;;  %2940 = vmatpush.msra.mxu1 %v2618_v50  ;;  %2963 = vmatpush.msra.mxu2 %v2634_v51 }
 0xa3c   : > { %v4681_v17 = vcvt.s32.f32 %v2853_v11  ;;  %vm2866_vm15 = vcmp.lt.s32.totalorder %v2842_v13, %v2844_v15  ;;  %vm2868_vm0 = vcmp.lt.s32.totalorder %v2843_v14, %v2845_v16  ;;  %2986 = vmatpush.msra.mxu3 %v2650_v52  ;;  %2918 = vmatpush.msra.mxu0 %v2601_v53  ;;  %v2614_v11 = vld [vmem:[%s4943_s23 + $0xa0] sm:$0xff] }
 0xa3d   : > { %v2867_v3 = vsel %vm2866_vm15, %v2842_v13, %v2844_v15  ;;  %v2869_v4 = vsel %vm2868_vm0, %v2843_v14, %v2845_v16  ;;  %2941 = vmatpush.msra.mxu1 %v2617_v54  ;;  %2964 = vmatpush.msra.mxu2 %v2633_v55  ;;  %v2854_v13 = vcvt.s32.f32 %v2852_v63  ;;  %v2630_v14 = vld [vmem:[%s4943_s23 + $0x120] sm:$0xff]  ;;  %v2597_v16 = vld [vmem:[%s4943_s23 + $0x18] sm:$0xff] }
 0xa3e   : > { %2856 = vmin.xlane.f32.xlu1 %v4681_v17  ;;  %vm2870_vm1 = vcmp.lt.s32.totalorder %v2867_v3, %v2869_v4  ;;  %2987 = vmatpush.msra.mxu3 %v2649_v56  ;;  %v2646_v15 = vld [vmem:[%s4943_s23 + $0x1a0] sm:$0xff] }
 0xa3f   : > { %v4684_v19 = vsel %vm2870_vm1, %v2867_v3, %v2869_v4  ;;  %2919 = vmatpush.msra.mxu0 %v2600_v57  ;;  %2942 = vmatpush.msra.mxu1 %v2616_v58  ;;  %v2613_v4 = vld [vmem:[%s4943_s23 + $0x98] sm:$0xff] }
 0xa40   : > { %v2873_v20 = vshra.s32 %v4684_v19, 16  ;;  %2965 = vmatpush.msra.mxu2 %v2632_v0  ;;  %2988 = vmatpush.msra.mxu3 %v2648_v1  ;;  %v2872_v6 = vand.u32 65535, %v4684_v19  ;;  %v2628_v19 = vld [vmem:[%s4943_s23 + $0x110] sm:$0xff] }
 0xa41   : > { %2920 = vmatpush.msra.mxu0 %v2599_v2  ;;  %2943 = vmatpush.msra.mxu1 %v2615_v7 }
 0xa42   : > { %v4687_v5 = vcvt.s32.f32 %v2873_v20  ;;  %2966 = vmatpush.msra.mxu2 %v2631_v8  ;;  %2989 = vmatpush.msra.mxu3 %v2647_v9  ;;  %v2645_v20 = vld [vmem:[%s4943_s23 + $0x198] sm:$0xff]  ;;  %v2874_v23 = vcvt.s32.f32 %v2872_v6 }
 0xa43   : > { %2921 = vmatpush.msra.mxu0 %v2598_v10  ;;  %2944 = vmatpush.msra.mxu1 %v2614_v11 }
 0xa44   : > { %2967 = vmatpush.msra.mxu2 %v2630_v14  ;;  %2990 = vmatpush.msra.mxu3 %v2646_v15 }
 0xa45   : > { %2922 = vmatpush.msra.mxu0 %v2597_v16  ;;  %2945 = vmatpush.msra.mxu1 %v2613_v4 }
 0xa46   : > { %2876 = vmin.xlane.f32.xlu1 %v4687_v5  ;;  %2991 = vmatpush.msra.mxu3 %v2645_v20 }
 0xa47   : > { %2923 = vmatpush.msra.mxu0 %v2596_v25  ;;  %2946 = vmatpush.msra.mxu1 %v2612_v26 }
 0xa49   : > { %2924 = vmatpush.msra.mxu0 %v2595_v27  ;;  %2947 = vmatpush.msra.mxu1 %v2611_v28 }
 0xa4b   : > { %2925 = vmatpush.msra.mxu0 %v2594_v31  ;;  %2948 = vmatpush.msra.mxu1 %v2610_v32 }
 0xab1   : > { %v2857_v12 = vpop.xlane.xlu1 %2856 }
 0xab2   : > { %vm2858_vm2 = vcmp.eq.f32.partialorder %v4681_v17, %v2857_v12  ;;  %v2629_v17 = vld [vmem:[%s4943_s23 + $0x118] sm:$0xff]  ;;  %v2863_v35 = vcvt.f32.s32 %v2857_v12 }
 0xab3   : > { %v2859_v3 = vsel %vm2858_vm2, %v2854_v13, inf  ;;  %2968 = vmatpush.msra.mxu2 %v2629_v17 }
 0xab4   : > { %2860 = vmin.xlane.f32.xlu2 %v2859_v3  ;;  %v2864_v37 = vshll.u32 %v2863_v35, 16 }
 0xab5   : > { %2969 = vmatpush.msra.mxu2 %v2628_v19 }
 0xab7   : > { %2970 = vmatpush.msra.mxu2 %v2627_v29 }
 0xab9   : > { %v2877_v21 = vpop.xlane.xlu1 %2876  ;;  %2971 = vmatpush.msra.mxu2 %v2626_v33 }
 0xaba   : > { %vm2878_vm4 = vcmp.eq.f32.partialorder %v4687_v5, %v2877_v21  ;;  %v2644_v5 = vld [vmem:[%s4943_s23 + $0x190] sm:$0xff]  ;;  %v2883_v40 = vcvt.f32.s32 %v2877_v21 }
 0xabb   : > { %v2879_v24 = vsel %vm2878_vm4, %v2874_v23, inf  ;;  %2992 = vmatpush.msra.mxu3 %v2644_v5 }
 0xabc   : > { %2880 = vmin.xlane.f32.xlu2 %v2879_v24  ;;  %v2884_v43 = vshll.u32 %v2883_v40, 16 }
 0xabd   : > { %2993 = vmatpush.msra.mxu3 %v2643_v30 }
 0xabf   : > { %2994 = vmatpush.msra.mxu3 %v2642_v34 }
 0xb27   : > { %v2861_v36 = vpop.xlane.xlu2 %2860 }
 0xb28   : > { %v2862_v38 = vcvt.f32.s32 %v2861_v36 }
 0xb2a   : > { %v2865_v39 = vadd.s32 %v2864_v37, %v2862_v38 }
 0xb2c   : > { %vm2886_vm6 = vcmp.eq.s32.totalorder %v4659_v59, %v2865_v39  ;;  %vm2887_vm7 = vcmp.eq.s32.totalorder %v4662_v60, %v2865_v39  ;;  %vm2888_vm8 = vcmp.eq.s32.totalorder %v4665_v61, %v2865_v39  ;;  %vm2889_vm9 = vcmp.eq.s32.totalorder %v4668_v62, %v2865_v39  ;;  %3005 = vst.msk [vmem:[%s863_s7] sm:$0xff] %vm3004_vm5, %v2865_v39 }
 0xb2d   : > { %3379 = vmatmul.msk.f32.vlgmr.msra.gmra.mxu0 %vm2886_vm6, %v3901_v41  ;;  %3381 = vmatmul.msk.f32.vlgmr.msra.gmra.mxu1 %vm2887_vm7, %v3901_v41 }
 0xb2e   : > { %3383 = vmatmul.msk.f32.vlgmr.msra.gmra.mxu2 %vm2888_vm8, %v3901_v41  ;;  %3385 = vmatmul.msk.f32.vlgmr.msra.gmra.mxu3 %vm2889_vm9, %v3901_v41 }
 0xb2f   : > { %v2881_v42 = vpop.xlane.xlu2 %2880 }
 0xb30   : > { %v2882_v44 = vcvt.f32.s32 %v2881_v42 }
 0xb32   : > { %v2885_v45 = vadd.s32 %v2884_v43, %v2882_v44 }
 0xb34   : > { %vm2890_vm10 = vcmp.eq.s32.totalorder %v4659_v59, %v2885_v45  ;;  %vm2891_vm11 = vcmp.eq.s32.totalorder %v4662_v60, %v2885_v45  ;;  %vm2892_vm12 = vcmp.eq.s32.totalorder %v4665_v61, %v2885_v45  ;;  %vm2893_vm13 = vcmp.eq.s32.totalorder %v4668_v62, %v2885_v45  ;;  %3006 = vst.msk [vmem:[%s863_s7 + $0x8] sm:$0xff] %vm3004_vm5, %v2885_v45 }
 0xb35   : > { %3380 = vmatmul.msk.f32.gmra.mxu0 %vm2890_vm10, %v3901_v41  ;;  %3382 = vmatmul.msk.f32.gmra.mxu1 %vm2891_vm11, %v3901_v41 }
 0xb36   : > { %3384 = vmatmul.msk.f32.gmra.mxu2 %vm2892_vm12, %v3901_v41  ;;  %3386 = vmatmul.msk.f32.gmra.mxu3 %vm2893_vm13, %v3901_v41 }
 0xbaa   : > { %v2927_v46 = vpop.f32.mrf.mxu0  ;;  %v2950_v47 = vpop.f32.mrf.mxu1 }
 0xbab   : > { %v2951_v48 = vadd.f32 %v2950_v47, %v2927_v46 }
 0xbb1   : > { %v2973_v49 = vpop.f32.mrf.mxu2  ;;  %v2996_v50 = vpop.f32.mrf.mxu3 }
 0xbb2   : > { %v2974_v51 = vadd.f32 %v2973_v49, %v2951_v48  ;;  %v2930_v60 = vpop.f32.mrf.mxu0  ;;  %v2953_v61 = vpop.f32.mrf.mxu1 }
 0xbb3   : > { %v2954_v52 = vadd.f32 %v2953_v61, %v2930_v60 }
 0xbb4   : > { %v2997_v59 = vadd.f32 %v2996_v50, %v2974_v51 }
 0xbb6   : > { %3002 = vst.msk [vmem:[%s858_s0] sm:$0xff] %vm2690_vm3, %v2997_v59  ;;  %v3007_v62 = vsub.f32 %v2997_v59, %v4636_v18 }
 0xbb8   : > { %v3009_v53 = vmul.f32 %v3007_v62, %v3007_v62 }
 0xbb9   : > { %v2976_v54 = vpop.f32.mrf.mxu2  ;;  %v2999_v57 = vpop.f32.mrf.mxu3 }
 0xbba   : > { %v2977_v55 = vadd.f32 %v2976_v54, %v2954_v52  ;;  %v3011_v56 = vsel %vm2690_vm3, %v3009_v53, 0.0 }
 0xbbb   : > { %3012 = vadd.xlane.f32.xlu0 %v3011_v56 }
 0xbbc   : > { %v3000_v58 = vadd.f32 %v2999_v57, %v2977_v55 }
 0xbbe   : > { %3003 = vst.msk [vmem:[%s858_s0 + $0x8] sm:$0xff] %vm2690_vm3, %v3000_v58  ;;  %v3008_v63 = vsub.f32 %v3000_v58, %v4646_v22 }
 0xbc0   : > { %v3010_v0 = vmul.f32 %v3008_v63, %v3008_v63 }
 0xbc2   : > { %v3014_v1 = vsel %vm2690_vm3, %v3010_v0, 0.0 }
 0xbc3   : > { %3015 = vadd.xlane.f32.xlu1 %v3014_v1 }
 0xc2e   : > { %v3013_v2 = vpop.xlane.xlu0 %3012 }
 0xc36   : > { %v3016_v18 = vpop.xlane.xlu1 %3015 }
 0xc37   : > { %v3017_v7 = vadd.f32 %v3016_v18, %v3013_v2 }
 0xc39   : > { %v3018_v8 = vrot.slane %v3017_v7, 4 }
 0xc3b   : > { %v3019_v9 = vadd.f32 %v3018_v8, %v3017_v7 }
 0xc3d   : > { %v3020_v10 = vrot.slane %v3019_v9, 2 }
 0xc3f   : > { %v3021_v11 = vadd.f32 %v3020_v10, %v3019_v9 }
 0xc41   : > { %v3022_v12 = vrot.slane %v3021_v11, 1 }
 0xc43   : > { %v3023_v13 = vadd.f32 %v3022_v12, %v3021_v11 }
 0xc45   : > { %3024 = vst [vmem:[%s866_s12] sm:$0x1] %v3023_v13 }
 0xc46 PF: > { %s39_s8 = sadd.s32 1, %s3899_s8  }
 0xc47   : > { %p36_p4 = scmp.ge.s32.totalorder %s39_s8, 4  }
 0xc49   :  { %38 = sbr.rel (!%p36_p4) target bundleno = 14 (0xe), region = 208 }

// kernel: tile.138
= control target key start
LH: loop header
LB: loop body
LE: loop exit
PB: predicated region body
PF: predicated region fallthrough
CT: control target
= control target key end

     0   :  { %s28_s0 = inlined_call_operand.vmem [shape: f32[16], index: 0, kind: input, shape index: {}]   ;;  %s29_s1 = inlined_call_operand.vmem [shape: f32[16,16], index: 1, kind: output, shape index: {}]  }
   0x1   :  { %v4_v0 = vld [vmem:[%s28_s0] ss:$0 sm:$0xff] }
   0x2   :  { %5 = vst [vmem:[%s29_s1] sm:$0xff] %v4_v0 }
   0x3   :  { %8 = vst [vmem:[%s29_s1 + $0x8] sm:$0xff] %v4_v0 }

// kernel: tile.139
= control target key start
LH: loop header
LB: loop body
LE: loop exit
PB: predicated region body
PF: predicated region fallthrough
CT: control target
= control target key end

     0   :  { %s7_s6 = smov 3  ;;  %s21_s9 = smov 3  ;;  %vm4_vm0 = vcmask 130048   ;;  %vm11_vm1 = vcmask 1048448   ;;  %vm18_vm2 = vcmask 917248   ;;  %vm25_vm3 = vcmask 786048   ;;  %s129_s0 = inlined_call_operand.vmem [shape: f32[16,16], index: 0, kind: input, shape index: {}]   ;;  %s130_s1 = inlined_call_operand.vmem [shape: f32[1,256], index: 1, kind: output, shape index: {}]  }
   0x1   :  { %v67_v0 = vld [vmem:[%s129_s0 + $0x7] ss:$8 sm:%s7_s6]   ;;  %s82_s10 = smov 112   ;;  %v69_v1 = vld [vmem:[%s129_s0 + $0x5] ss:$8 sm:%s21_s9]   ;;  %s83_s13 = smov 80  }
   0x2   :  { %9 = vrot.lane.b32.xlu0 %v67_v0, %s82_s10  ;;  %23 = vrot.lane.b32.xlu1 %v69_v1, %s83_s13  ;;  %s14_s14 = smov 3  ;;  %s28_s15 = smov 3  ;;  %vm32_vm4 = vcmask 654848   ;;  %vm39_vm5 = vcmask 523648   ;;  %vm46_vm6 = vcmask 392448   ;;  %vm53_vm7 = vcmask 261248  }
   0x3   :  { %s35_s16 = smov 3  ;;  %v68_v3 = vld [vmem:[%s129_s0 + $0x6] ss:$8 sm:%s14_s14]   ;;  %s84_s21 = smov 48   ;;  %v70_v4 = vld [vmem:[%s129_s0 + $0x4] ss:$8 sm:%s28_s15]  }
   0x4   :  { %v71_v2 = vld [vmem:[%s129_s0 + $0x3] ss:$8 sm:%s35_s16]   ;;  %s42_s24 = smov 3  ;;  %s85_s25 = smov 96  }
   0x5   :  { %37 = vrot.lane.b32.xlu2 %v71_v2, %s84_s21  ;;  %s86_s26 = smov 64   ;;  %s49_s27 = smov 3  ;;  %v72_v5 = vld [vmem:[%s129_s0 + $0x2] ss:$8 sm:%s42_s24]  }
   0x6   :  { %v73_v6 = vld [vmem:[%s129_s0 + $0x1] ss:$8 sm:%s49_s27]   ;;  %s87_s3 = smov 32   ;;  %s88_s4 = smov 16  }
   0x7   :  { %s2_s5 = smov 3 }
   0x8   :  { %v3_v7 = vld [vmem:[%s129_s0] ss:$8 sm:%s2_s5]  }
   0x9   :  { %5 = vst.msk [vmem:[#allocation0] ss:$8 sm:$0x3] %vm4_vm0, %v3_v7  }
   0xa   :  { %16 = vrot.lane.b32.xlu0 %v68_v3, %s85_s25  ;;  %30 = vrot.lane.b32.xlu1 %v70_v4, %s86_s26 }
   0xd   :  { %44 = vrot.lane.b32.xlu2 %v72_v5, %s87_s3 }
  0x12   :  { %51 = vrot.lane.b32.xlu0 %v73_v6, %s88_s4 }
  0x5f   :  { %v38_v8 = vpop.permute.xlu2 %37  }
  0x67   :  { %v45_v9 = vpop.permute.xlu2 %44  }
  0x74   :  { %v10_v10 = vpop.permute.xlu0 %9   ;;  %v24_v11 = vpop.permute.xlu1 %23  }
  0x75   :  { %12 = vst.msk [vmem:[#allocation0] ss:$8 sm:$0x3] %vm11_vm1, %v10_v10  }
  0x7c   :  { %v17_v12 = vpop.permute.xlu0 %16   ;;  %v31_v13 = vpop.permute.xlu1 %30  }
  0x7d   :  { %19 = vst.msk [vmem:[#allocation0] ss:$8 sm:$0x3] %vm18_vm2, %v17_v12  }
  0x7e   :  { %26 = vst.msk [vmem:[#allocation0] ss:$8 sm:$0x3] %vm25_vm3, %v24_v11  }
  0x7f   :  { %33 = vst.msk [vmem:[#allocation0] ss:$8 sm:$0x3] %vm32_vm4, %v31_v13  }
  0x80   :  { %40 = vst.msk [vmem:[#allocation0] ss:$8 sm:$0x3] %vm39_vm5, %v38_v8  }
  0x81   :  { %47 = vst.msk [vmem:[#allocation0] ss:$8 sm:$0x3] %vm46_vm6, %v45_v9  }
  0x84   :  { %v52_v14 = vpop.permute.xlu0 %51  }
  0x85   :  { %54 = vst.msk [vmem:[#allocation0] ss:$8 sm:$0x3] %vm53_vm7, %v52_v14  }
  0x8c   :  { %v57_v15 = vld [vmem:[#allocation0] sm:$0x1]  ;;  %v62_v16 = vld [vmem:[#allocation0 + $0x8] sm:$0x1] }
  0x8d   :  { %60 = vst [vmem:[%s130_s1] sm:$0x1] %v57_v15 }
  0x8e   :  { %74 = vst [vmem:[%s130_s1 + $0x1] sm:$0x1] %v62_v16 }

// kernel: squeeze.4
= control target key start
LH: loop header
LB: loop body
LE: loop exit
PB: predicated region body
PF: predicated region fallthrough
CT: control target
= control target key end

     0   :  { %s102_s0 = inlined_call_operand.vmem [shape: s32[2,16], index: 0, kind: input, shape index: {}]   ;;  %s103_s1 = inlined_call_operand.hbm [shape: s32[2,4,4], index: 1, kind: output, shape index: {}]  }
   0x1   :  { %v5_v0 = vld [vmem:[%s102_s0] sm:$0x3] }
   0x2   :  { %6 = vst [vmem:[#allocation3] sm:$0x3] %v5_v0 }
   0x3   :  { %2 = vsyncpa [#allocation1], 0  ;;  %s82_s0 = smov 124   ;;  %s83_s8 = smov 116   ;;  %vm8_vm0 = vcmask 31744  }
   0x4   :  { %s84_s9 = smov 120   ;;  %s85_s10 = smov [#allocation0]  }
   0x5   :  { %s43_s11 = sshll.u32 %s85_s10, 4  ;;  %s45_s1 = sshll.u32 %s103_s1, 4  ;;  %s44_s11 = int_to_ptr.vmem [resolvable:$true] %s43_s11  ;;  %s46_s1 = int_to_ptr.hbm [resolvable:$true] %s45_s1 }
   0x9   :  { %v10_v1 = vld [vmem:[#allocation3] sm:$0x3]  }
   0xa   :  { %v22_v2 = vld [vmem:[#allocation3] sm:$0x3]   ;;  %11 = vrot.lane.b32.xlu0 %v10_v1, %s82_s0 }
   0xb   :  { %23 = vrot.lane.b32.xlu1 %v22_v2, %s83_s8  ;;  %v16_v3 = vld [vmem:[#allocation3] sm:$0x3]  }
   0xc   :  { %v7_v4 = vld [vmem:[#allocation3] sm:$0x3]  }
   0xd   :  { %9 = vst.msk [vmem:[#allocation2] ss:$8 sm:$0x3] %vm8_vm0, %v7_v4  }
  0x12   :  { %17 = vrot.lane.b32.xlu0 %v16_v3, %s84_s9 }
  0x7c   :  { %v12_v5 = vpop.permute.xlu0 %11  }
  0x7d   :  { %v24_v6 = vpop.permute.xlu1 %23   ;;  %15 = vst.msk [vmem:[#allocation2 + $0x1] ss:$8 sm:$0x3] %vm8_vm0, %v12_v5  }
  0x7e   :  { %27 = vst.msk [vmem:[#allocation2 + $0x3] ss:$8 sm:$0x3] %vm8_vm0, %v24_v6  }
  0x84   :  { %v18_v7 = vpop.permute.xlu0 %17  }
  0x85   :  { %21 = vst.msk [vmem:[#allocation2 + $0x2] ss:$8 sm:$0x3] %vm8_vm0, %v18_v7  }
  0x8c   :  { %v30_v8 = vld [vmem:[#allocation2] sm:$0xf]  ;;  %v35_v9 = vld [vmem:[#allocation2 + $0x8] sm:$0xf] }
  0x8d   :  { %33 = vst [vmem:[#allocation0] sm:$0xf] %v30_v8 }
  0x8e   :  { %39 = vst [vmem:[#allocation0 + $0x4] sm:$0xf] %v35_v9 }
  0x8f   :  { %48 = dma.vmem_to_hbm [thread:$0]  %s44_s11, 128, %s46_s1, [#allocation1]  }
  0x90   :  { %80 = dma.done.wait [#allocation1], 128  }
  0x91   :  { %81 = vsyncadd [#allocation1], 4294967168 }
  0x92   :  { %51 = vsyncpa [#allocation1], 1 }

// kernel: vqvae_forward.3
= control target key start
LH: loop header
LB: loop body
LE: loop exit
PB: predicated region body
PF: predicated region fallthrough
CT: control target
= control target key end

     0   :  { %s3457_s0 = inlined_call_operand.vmem [shape: f32[2,8,256], index: 0, kind: input, shape index: {}]   ;;  %s3458_s1 = inlined_call_operand.vmem [shape: f32[2,16,256], index: 1, kind: input, shape index: {}]   ;;  %s3459_s2 = inlined_call_operand.vmem [shape: f32[3,8,8], index: 2, kind: input, shape index: {}, may-alias: {2,5,10}]   ;;  %s3460_s3 = inlined_call_operand.vmem [shape: bf16[3,256,32], index: 3, kind: input, shape index: {}]   ;;  %s3461_s4 = inlined_call_operand.vmem [shape: f32[1,32], index: 4, kind: input, shape index: {}]   ;;  %s3462_s5 = inlined_call_operand.vmem [shape: f32[3,8,8], index: 5, kind: input, shape index: {}, may-alias: {2,5,10}]   ;;  %s3463_s6 = inlined_call_operand.vmem [shape: bf16[3,32,8], index: 6, kind: input, shape index: {}]   ;;  %s3464_s7 = inlined_call_operand.vmem [shape: f32[1,8], index: 7, kind: input, shape index: {}]   ;;  %s3465_s8 = inlined_call_operand.vmem [shape: bf16[8,32], index: 8, kind: input, shape index: {}]   ;;  %s3466_s9 = inlined_call_operand.vmem [shape: f32[1,32], index: 9, kind: input, shape index: {}]   ;;  %s3467_s10 = inlined_call_operand.vmem [shape: f32[3,8,8], index: 10, kind: input, shape index: {}, may-alias: {2,5,10}]   ;;  %s3468_s11 = inlined_call_operand.vmem [shape: bf16[3,32,8], index: 11, kind: input, shape index: {}]   ;;  %s3469_s12 = inlined_call_operand.vmem [shape: f32[1,8], index: 12, kind: input, shape index: {}]   ;;  %s3470_s13 = inlined_call_operand.vmem [shape: bf16[8,32], index: 13, kind: input, shape index: {}]   ;;  %s3471_s14 = inlined_call_operand.vmem [shape: f32[1,32], index: 14, kind: input, shape index: {}]   ;;  %s3472_s15 = inlined_call_operand.vmem [shape: f32[4,8,8], index: 15, kind: input, shape index: {}]   ;;  %s3473_s16 = inlined_call_operand.vmem [shape: bf16[4,32,32], index: 16, kind: input, shape index: {}]   ;;  %s3474_s17 = inlined_call_operand.vmem [shape: f32[1,32], index: 17, kind: input, shape index: {}]   ;;  %s3475_s18 = inlined_call_operand.vmem [shape: f32[4,16,8], index: 18, kind: input, shape index: {}]   ;;  %s3476_s19 = inlined_call_operand.vmem [shape: bf16[4,32,256], index: 19, kind: input, shape index: {}]   ;;  %s3477_s20 = inlined_call_operand.vmem [shape: f32[1,256], index: 20, kind: input, shape index: {}]   ;;  %s3478_s21 = inlined_call_operand.vmem [shape: f32[2,16,256], index: 21, kind: output, shape index: {0}]   ;;  %s3479_s22 = inlined_call_operand.vmem [shape: f32[2,1,128], index: 22, kind: output, shape index: {1}]  }
   0x1   :  { %3485 = sst [smem:[#allocation3_spill]] %s3457_s0 }
   0x2   :  { %3486 = sst [smem:[#allocation4_spill]] %s3458_s1 }
   0x3   :  { %3487 = sst [smem:[#allocation5_spill]] %s3459_s2 }
   0x4   :  { %3488 = sst [smem:[#allocation6_spill]] %s3460_s3  ;;  %s3008_s3 = smov 0  }
   0x5   :  { %3489 = sst [smem:[#allocation7_spill]] %s3461_s4 }
   0x6   :  { %3490 = sst [smem:[#allocation8_spill]] %s3462_s5 }
   0x7   :  { %3491 = sst [smem:[#allocation9_spill]] %s3463_s6 }
   0x8   :  { %3492 = sst [smem:[#allocation10_spill]] %s3478_s21 }
   0x9   :  { %3493 = sst [smem:[#allocation11_spill]] %s3479_s22 }
   0xa LB: > { %3494 = sst [smem:[#allocation2_spill]] %s2891_s3  ;;  %s2348_s28 = sadd.s32 4294967295, %s2891_s3   ;;  %s2891_s3 = sphi %s3008_s3, %s33_s3  }
   0xb   : > { %p2352_p0 = scmp.ge.s32.totalorder %s2891_s3, 1  ;;  %p625_p1 = scmp.lt.s32.totalorder %s2891_s3, 3 }
   0xd   : > { %p626_p2 = pnand %p2352_p0, %p625_p1 }
   0xe   : > { %p695_p3 = scmp.lt.s32.totalorder (!%p626_p2), %s2348_s28, 1  ;;  %s3495_s0 = sld [smem:[#allocation6_spill]] (!%p626_p2) }
   0xf   : > { %629 = sbr.rel (%p626_p2) target bundleno = 2345 (0x929), region = 104  ;;  %s3496_s6 = sld [smem:[#allocation3_spill]] (!%p626_p2) }
  0x10   : > { %s3497_s27 = sld [smem:[#allocation5_spill]] (!%p626_p2) }
  0x11   : > { %s3499_s30 = sld [smem:[#allocation9_spill]] (!%p626_p2) }
  0x12   : > { %s3500_s3 = sld [smem:[#allocation8_spill]] (!%p626_p2) }
  0x13   : > { %s3502_s5 = sld [smem:[#allocation10_spill]] (!%p626_p2) }
  0x14   : > { %s3507_s28 = smov (!%p695_p3, %s2348_s28), 1  ;;  %v2813_v0 = vld [vmem:[%s3495_s0 + $0x38] sm:$0xff]   ;;  %vm716_vm0 = vcmask 64512   ;;  %v2812_v12 = vld [vmem:[%s3495_s0 + $0x30] sm:$0xff]   ;;  %v2811_v20 = vld [vmem:[%s3495_s0 + $0x28] sm:$0xff]   ;;  %vm1238_vm1 = vcmask 261120  }
  0x15   : > { %s2532_s29 = sshll.u32 %s3507_s28, 4  ;;  %v2821_v1 = vld [vmem:[%s3495_s0 + $0x78] sm:$0xff]   ;;  %v2566_v8 = vunpack.c.h.bf16 %v2813_v0  ;;  %v2820_v13 = vld [vmem:[%s3495_s0 + $0x70] sm:$0xff]   ;;  %v2565_v14 = vunpack.c.l.bf16 %v2813_v0  ;;  %v2819_v21 = vld [vmem:[%s3495_s0 + $0x68] sm:$0xff]   ;;  %v2562_v22 = vunpack.c.h.bf16 %v2812_v12  ;;  %v2561_v26 = vunpack.c.l.bf16 %v2812_v12  ;;  %s2533_s22 = sshll.u32 %s3507_s28, 5 }
  0x16   : > { %s699_s25 = scalar_lea.vmem %s3496_s6, %s2532_s29  ;;  %v2361_v2 = vld [vmem:[%s3497_s27 + $0x8] sm:$0xff]  ;;  %v2829_v3 = vld [vmem:[%s3495_s0 + $0xb8] sm:$0xff]   ;;  %v715_v7 = vld [vmem:[%s3497_s27] sm:$0xff]  ;;  %v2598_v9 = vunpack.c.h.bf16 %v2821_v1  ;;  %v2597_v15 = vunpack.c.l.bf16 %v2821_v1  ;;  %v2594_v23 = vunpack.c.h.bf16 %v2820_v13  ;;  %v2593_v27 = vunpack.c.l.bf16 %v2820_v13  ;;  %s3503_s26 = sld [smem:[#allocation4_spill]] }
  0x17   : > { %v2837_v4 = vld [vmem:[%s3495_s0 + $0xf8] sm:$0xff]   ;;  %v3037_v5 = vld [vmem:[%s699_s25] sm:$0xff]  ;;  %v3039_v6 = vld [vmem:[%s699_s25 + $0x8] sm:$0xff]  ;;  %v2630_v10 = vunpack.c.h.bf16 %v2829_v3  ;;  %v2629_v18 = vunpack.c.l.bf16 %v2829_v3  ;;  %v2558_v32 = vunpack.c.h.bf16 %v2811_v20  ;;  %v2590_v33 = vunpack.c.h.bf16 %v2819_v21  ;;  %s3498_s25 = sld [smem:[#allocation7_spill]] }
  0x18   : > { %844 = vmatpush.msra.mxu2 %v3037_v5  ;;  %864 = vmatpush.msra.mxu3 %v3039_v6  ;;  %v2662_v11 = vunpack.c.h.bf16 %v2837_v4  ;;  %v2828_v16 = vld [vmem:[%s3495_s0 + $0xb0] sm:$0xff]   ;;  %v2661_v19 = vunpack.c.l.bf16 %v2837_v4  ;;  %v2827_v28 = vld [vmem:[%s3495_s0 + $0xa8] sm:$0xff]   ;;  %v2810_v36 = vld [vmem:[%s3495_s0 + $0x20] sm:$0xff]   ;;  %v2557_v38 = vunpack.c.l.bf16 %v2811_v20  ;;  %v2589_v39 = vunpack.c.l.bf16 %v2819_v21  ;;  %s3501_s23 = smov %s3500_s3  ;;  %s3504_s21 = sld [smem:[#allocation11_spill]] }
  0x19   : > { %2362 = vmatmul.msk.f32.vlgmr.msra.gmra.mxu2 %vm716_vm0, %v2361_v2  ;;  %2363 = vmatmul.msk.f32.vlgmr.msra.gmra.mxu3 %vm716_vm0, %v2361_v2  ;;  %v2836_v17 = vld [vmem:[%s3495_s0 + $0xf0] sm:$0xff]   ;;  %v2626_v24 = vunpack.c.h.bf16 %v2828_v16  ;;  %v2835_v29 = vld [vmem:[%s3495_s0 + $0xe8] sm:$0xff]   ;;  %v2625_v30 = vunpack.c.l.bf16 %v2828_v16  ;;  %v2622_v34 = vunpack.c.h.bf16 %v2827_v28  ;;  %v2818_v37 = vld [vmem:[%s3495_s0 + $0x60] sm:$0xff]   ;;  %v2621_v42 = vunpack.c.l.bf16 %v2827_v28  ;;  %s3441_s24 = scalar_lea.vmem %s3502_s5, %s2533_s22 }
  0x1a   : > { %735 = vmatpush.msra.mxu0 %v3037_v5  ;;  %755 = vmatpush.msra.mxu1 %v3039_v6  ;;  %v2658_v25 = vunpack.c.h.bf16 %v2836_v17  ;;  %v2657_v31 = vunpack.c.l.bf16 %v2836_v17  ;;  %v2654_v35 = vunpack.c.h.bf16 %v2835_v29  ;;  %v2826_v40 = vld [vmem:[%s3495_s0 + $0xa0] sm:$0xff]   ;;  %v2653_v43 = vunpack.c.l.bf16 %v2835_v29  ;;  %v2809_v48 = vld [vmem:[%s3495_s0 + $0x18] sm:$0xff]   ;;  %v2808_v60 = vld [vmem:[%s3495_s0 + $0x10] sm:$0xff]  }
  0x1b   : > { %2359 = vmatmul.msk.f32.vlgmr.msra.gmra.mxu0 %vm716_vm0, %v715_v7  ;;  %2360 = vmatmul.msk.f32.vlgmr.msra.gmra.mxu1 %vm716_vm0, %v715_v7  ;;  %v2834_v41 = vld [vmem:[%s3495_s0 + $0xe0] sm:$0xff]   ;;  %v2554_v44 = vunpack.c.h.bf16 %v2810_v36  ;;  %v2586_v45 = vunpack.c.h.bf16 %v2818_v37  ;;  %v2618_v46 = vunpack.c.h.bf16 %v2826_v40  ;;  %v2817_v49 = vld [vmem:[%s3495_s0 + $0x58] sm:$0xff]   ;;  %v2553_v50 = vunpack.c.l.bf16 %v2810_v36  ;;  %v2816_v61 = vld [vmem:[%s3495_s0 + $0x50] sm:$0xff]  }
  0x1c   : > { %974 = vmatpush.msrb.mxu2 %v2566_v8  ;;  %994 = vmatpush.msrb.mxu3 %v2598_v9  ;;  %v2650_v47 = vunpack.c.h.bf16 %v2834_v41  ;;  %v2585_v51 = vunpack.c.l.bf16 %v2818_v37  ;;  %v2825_v52 = vld [vmem:[%s3495_s0 + $0x98] sm:$0xff]   ;;  %v2617_v54 = vunpack.c.l.bf16 %v2826_v40  ;;  %v2649_v55 = vunpack.c.l.bf16 %v2834_v41  ;;  %v2824_v0 = vld [vmem:[%s3495_s0 + $0x90] sm:$0xff]   ;;  %s704_s2 = scalar_lea.vmem %s3503_s26, %s2533_s22 }
  0x1d   : > { %934 = vmatpush.msrb.mxu0 %v2630_v10  ;;  %954 = vmatpush.msrb.mxu1 %v2662_v11  ;;  %v2833_v53 = vld [vmem:[%s3495_s0 + $0xd8] sm:$0xff]   ;;  %v2550_v56 = vunpack.c.h.bf16 %v2809_v48  ;;  %v2582_v57 = vunpack.c.h.bf16 %v2817_v49  ;;  %v2614_v58 = vunpack.c.h.bf16 %v2825_v52  ;;  %v2549_v62 = vunpack.c.l.bf16 %v2809_v48  ;;  %v2832_v1 = vld [vmem:[%s3495_s0 + $0xd0] sm:$0xff]   ;;  %v2807_v10 = vld [vmem:[%s3495_s0 + $0x8] sm:$0xff]  }
  0x1e   : > { %975 = vmatpush.msrb.mxu2 %v2565_v14  ;;  %995 = vmatpush.msrb.mxu3 %v2597_v15  ;;  %v2646_v59 = vunpack.c.h.bf16 %v2833_v53  ;;  %v2581_v63 = vunpack.c.l.bf16 %v2817_v49  ;;  %v2613_v2 = vunpack.c.l.bf16 %v2825_v52  ;;  %v2645_v3 = vunpack.c.l.bf16 %v2833_v53  ;;  %v2815_v11 = vld [vmem:[%s3495_s0 + $0x48] sm:$0xff]   ;;  %v2844_v40 = vld [vmem:[%s3495_s0 + $0x130] sm:$0xff]   ;;  %v2842_v52 = vld [vmem:[%s3495_s0 + $0x120] sm:$0xff]   ;;  %s712_s22 = scalar_lea.vmem %s3504_s21, %s3507_s28 }
  0x1f   : > { %935 = vmatpush.msrb.mxu0 %v2629_v18  ;;  %955 = vmatpush.msrb.mxu1 %v2661_v19  ;;  %v2546_v4 = vunpack.c.h.bf16 %v2808_v60  ;;  %v2578_v7 = vunpack.c.h.bf16 %v2816_v61  ;;  %v2610_v8 = vunpack.c.h.bf16 %v2824_v0  ;;  %v2642_v9 = vunpack.c.h.bf16 %v2832_v1  ;;  %v2823_v14 = vld [vmem:[%s3495_s0 + $0x88] sm:$0xff]   ;;  %v2850_v53 = vld [vmem:[%s3495_s0 + $0x160] sm:$0xff]  }
  0x20   : > { %976 = vmatpush.msrb.mxu2 %v2562_v22  ;;  %996 = vmatpush.msrb.mxu3 %v2594_v23  ;;  %v2545_v12 = vunpack.c.l.bf16 %v2808_v60  ;;  %v2577_v13 = vunpack.c.l.bf16 %v2816_v61  ;;  %v2831_v15 = vld [vmem:[%s3495_s0 + $0xc8] sm:$0xff]   ;;  %v2609_v16 = vunpack.c.l.bf16 %v2824_v0  ;;  %v2641_v17 = vunpack.c.l.bf16 %v2832_v1  ;;  %v2536_v22 = vld [vmem:[%s3495_s0] sm:$0xff]   ;;  %v2840_v0 = vld [vmem:[%s3495_s0 + $0x110] sm:$0xff]  }
  0x21   : > { %936 = vmatpush.msrb.mxu0 %v2626_v24  ;;  %956 = vmatpush.msrb.mxu1 %v2658_v25  ;;  %v2542_v18 = vunpack.c.h.bf16 %v2807_v10  ;;  %v2574_v19 = vunpack.c.h.bf16 %v2815_v11  ;;  %v2606_v20 = vunpack.c.h.bf16 %v2823_v14  ;;  %v2638_v21 = vunpack.c.h.bf16 %v2831_v15  ;;  %v2848_v1 = vld [vmem:[%s3495_s0 + $0x150] sm:$0xff]  }
  0x22   : > { %977 = vmatpush.msrb.mxu2 %v2561_v26  ;;  %997 = vmatpush.msrb.mxu3 %v2593_v27  ;;  %v2541_v23 = vunpack.c.l.bf16 %v2807_v10  ;;  %v2573_v24 = vunpack.c.l.bf16 %v2815_v11  ;;  %v2538_v25 = vunpack.c.h.bf16 %v2536_v22  ;;  %v2814_v26 = vld [vmem:[%s3495_s0 + $0x40] sm:$0xff]   ;;  %v2605_v27 = vunpack.c.l.bf16 %v2823_v14 }
  0x23   : > { %937 = vmatpush.msrb.mxu0 %v2625_v30  ;;  %957 = vmatpush.msrb.mxu1 %v2657_v31  ;;  %v2637_v28 = vunpack.c.l.bf16 %v2831_v15  ;;  %v2537_v29 = vunpack.c.l.bf16 %v2536_v22  ;;  %v2570_v30 = vunpack.c.h.bf16 %v2814_v26  ;;  %v2822_v31 = vld [vmem:[%s3495_s0 + $0x80] sm:$0xff]   ;;  %v2689_v48 = vunpack.c.l.bf16 %v2844_v40  ;;  %v2839_v15 = vld [vmem:[%s3495_s0 + $0x108] sm:$0xff]  }
  0x24   : > { %978 = vmatpush.msrb.mxu2 %v2558_v32  ;;  %998 = vmatpush.msrb.mxu3 %v2590_v33  ;;  %v2830_v32 = vld [vmem:[%s3495_s0 + $0xc0] sm:$0xff]   ;;  %v2602_v33 = vunpack.c.h.bf16 %v2822_v31  ;;  %v2601_v36 = vunpack.c.l.bf16 %v2822_v31  ;;  %v2681_v60 = vunpack.c.l.bf16 %v2842_v52  ;;  %v2713_v61 = vunpack.c.l.bf16 %v2850_v53 }
  0x25   : > { %938 = vmatpush.msrb.mxu0 %v2622_v34  ;;  %958 = vmatpush.msrb.mxu1 %v2654_v35  ;;  %v2634_v34 = vunpack.c.h.bf16 %v2830_v32  ;;  %v2569_v35 = vunpack.c.l.bf16 %v2814_v26  ;;  %v2633_v37 = vunpack.c.l.bf16 %v2830_v32  ;;  %v2705_v14 = vunpack.c.l.bf16 %v2848_v1  ;;  %v2846_v22 = vld [vmem:[%s3495_s0 + $0x140] sm:$0xff]  }
  0x26   : > { %979 = vmatpush.msrb.mxu2 %v2557_v38  ;;  %999 = vmatpush.msrb.mxu3 %v2589_v39  ;;  %v2845_v38 = vld [vmem:[%s3495_s0 + $0x138] sm:$0xff]   ;;  %v2697_v26 = vunpack.c.l.bf16 %v2846_v22 }
  0x27   : > { %939 = vmatpush.msrb.mxu0 %v2621_v42  ;;  %959 = vmatpush.msrb.mxu1 %v2653_v43  ;;  %v2853_v39 = vld [vmem:[%s3495_s0 + $0x178] sm:$0xff]   ;;  %v2694_v41 = vunpack.c.h.bf16 %v2845_v38  ;;  %v2693_v43 = vunpack.c.l.bf16 %v2845_v38 }
  0x28   : > { %980 = vmatpush.msrb.mxu2 %v2554_v44  ;;  %1000 = vmatpush.msrb.mxu3 %v2586_v45  ;;  %v2726_v42 = vunpack.c.h.bf16 %v2853_v39  ;;  %v2725_v44 = vunpack.c.l.bf16 %v2853_v39  ;;  %v2879_v39 = vld [vmem:[%s3498_s25] ss:$0 sm:$0xff] }
  0x29   : > { %940 = vmatpush.msrb.mxu0 %v2618_v46  ;;  %960 = vmatpush.msrb.mxu1 %v2650_v47  ;;  %v2843_v46 = vld [vmem:[%s3495_s0 + $0x128] sm:$0xff]  }
  0x2a   : > { %981 = vmatpush.msrb.mxu2 %v2553_v50  ;;  %1001 = vmatpush.msrb.mxu3 %v2585_v51  ;;  %v2851_v47 = vld [vmem:[%s3495_s0 + $0x168] sm:$0xff]   ;;  %v2686_v50 = vunpack.c.h.bf16 %v2843_v46 }
  0x2b   : > { %941 = vmatpush.msrb.mxu0 %v2617_v54  ;;  %961 = vmatpush.msrb.mxu1 %v2649_v55  ;;  %v2718_v51 = vunpack.c.h.bf16 %v2851_v47  ;;  %v2685_v54 = vunpack.c.l.bf16 %v2843_v46  ;;  %v2717_v55 = vunpack.c.l.bf16 %v2851_v47 }
  0x2c   : > { %982 = vmatpush.msrb.mxu2 %v2550_v56  ;;  %1002 = vmatpush.msrb.mxu3 %v2582_v57  ;;  %v2682_v56 = vunpack.c.h.bf16 %v2842_v52  ;;  %v2714_v57 = vunpack.c.h.bf16 %v2850_v53 }
  0x2d   : > { %942 = vmatpush.msrb.mxu0 %v2614_v58  ;;  %962 = vmatpush.msrb.mxu1 %v2646_v59  ;;  %v2841_v58 = vld [vmem:[%s3495_s0 + $0x118] sm:$0xff]  }
  0x2e   : > { %983 = vmatpush.msrb.mxu2 %v2549_v62  ;;  %1003 = vmatpush.msrb.mxu3 %v2581_v63  ;;  %v2849_v59 = vld [vmem:[%s3495_s0 + $0x158] sm:$0xff]   ;;  %v2678_v62 = vunpack.c.h.bf16 %v2841_v58 }
  0x2f   : > { %943 = vmatpush.msrb.mxu0 %v2613_v2  ;;  %963 = vmatpush.msrb.mxu1 %v2645_v3  ;;  %v2710_v63 = vunpack.c.h.bf16 %v2849_v59  ;;  %v2677_v2 = vunpack.c.l.bf16 %v2841_v58  ;;  %v2709_v3 = vunpack.c.l.bf16 %v2849_v59  ;;  %v2440_v58 = vld [vmem:[%s3501_s23 + $0x10] sm:$0xff]  ;;  %v2858_v59 = vld [vmem:[%s3499_s30 + $0x28] sm:$0xff]  }
  0x30   : > { %984 = vmatpush.msrb.mxu2 %v2546_v4  ;;  %1004 = vmatpush.msrb.mxu3 %v2578_v7 }
  0x31   : > { %944 = vmatpush.msrb.mxu0 %v2610_v8  ;;  %964 = vmatpush.msrb.mxu1 %v2642_v9  ;;  %v2674_v8 = vunpack.c.h.bf16 %v2840_v0  ;;  %v2706_v9 = vunpack.c.h.bf16 %v2848_v1 }
  0x32   : > { %985 = vmatpush.msrb.mxu2 %v2545_v12  ;;  %1005 = vmatpush.msrb.mxu3 %v2577_v13  ;;  %v2396_v12 = vld [vmem:[%s3497_s27 + $0x10] sm:$0xff]  ;;  %v2673_v13 = vunpack.c.l.bf16 %v2840_v0 }
  0x33   : > { %945 = vmatpush.msrb.mxu0 %v2609_v16  ;;  %965 = vmatpush.msrb.mxu1 %v2641_v17  ;;  %v2847_v16 = vld [vmem:[%s3495_s0 + $0x148] sm:$0xff]   ;;  %v2670_v17 = vunpack.c.h.bf16 %v2839_v15 }
  0x34   : > { %986 = vmatpush.msrb.mxu2 %v2542_v18  ;;  %1006 = vmatpush.msrb.mxu3 %v2574_v19  ;;  %v2702_v18 = vunpack.c.h.bf16 %v2847_v16  ;;  %v2669_v19 = vunpack.c.l.bf16 %v2839_v15  ;;  %v2752_v15 = vld [vmem:[%s3468_s11] sm:$0xff]  }
  0x35   : > { %946 = vmatpush.msrb.mxu0 %v2606_v20  ;;  %966 = vmatpush.msrb.mxu1 %v2638_v21  ;;  %v2701_v20 = vunpack.c.l.bf16 %v2847_v16  ;;  %v2838_v21 = vld [vmem:[%s3495_s0 + $0x100] sm:$0xff]  }
  0x36   : > { %987 = vmatpush.msrb.mxu2 %v2541_v23  ;;  %1007 = vmatpush.msrb.mxu3 %v2573_v24  ;;  %v2666_v23 = vunpack.c.h.bf16 %v2838_v21  ;;  %v2698_v24 = vunpack.c.h.bf16 %v2846_v22 }
  0x37   : > { %947 = vmatpush.msrb.mxu0 %v2605_v27  ;;  %967 = vmatpush.msrb.mxu1 %v2637_v28 }
  0x38   : > { %988 = vmatpush.msrb.mxu2 %v2538_v25  ;;  %1008 = vmatpush.msrb.mxu3 %v2570_v30  ;;  %v2665_v25 = vunpack.c.l.bf16 %v2838_v21 }
  0x39   : > { %948 = vmatpush.msrb.mxu0 %v2602_v33  ;;  %968 = vmatpush.msrb.mxu1 %v2634_v34 }
  0x3a   : > { %989 = vmatpush.msrb.mxu2 %v2537_v29  ;;  %1009 = vmatpush.msrb.mxu3 %v2569_v35 }
  0x3b   : > { %949 = vmatpush.msrb.mxu0 %v2601_v36  ;;  %969 = vmatpush.msrb.mxu1 %v2633_v37 }
  0x3c   : > { %1124 = vmatpush.msra.mxu2 %v2694_v41  ;;  %1144 = vmatpush.msra.mxu3 %v2726_v42  ;;  %v2856_v42 = vld [vmem:[%s3499_s30 + $0x18] sm:$0xff]  }
  0x3d   : > { %1034 = vmatpush.msra.mxu0 %v3037_v5  ;;  %1054 = vmatpush.msra.mxu1 %v3039_v6  ;;  %v2852_v5 = vld [vmem:[%s3495_s0 + $0x170] sm:$0xff]   ;;  %v2690_v6 = vunpack.c.h.bf16 %v2844_v40  ;;  %v2742_v46 = vunpack.c.h.bf16 %v2856_v42 }
  0x3e   : > { %v2722_v45 = vunpack.c.h.bf16 %v2852_v5  ;;  %1125 = vmatpush.msra.mxu2 %v2693_v43  ;;  %1145 = vmatpush.msra.mxu3 %v2725_v44  ;;  %v2721_v49 = vunpack.c.l.bf16 %v2852_v5  ;;  %v2854_v43 = vld [vmem:[%s3499_s30 + $0x8] sm:$0xff]  }
  0x3f   : > { %v2734_v47 = vunpack.c.h.bf16 %v2854_v43 }
  0x40   : > { %1126 = vmatpush.msra.mxu2 %v2690_v6  ;;  %1146 = vmatpush.msra.mxu3 %v2722_v45  ;;  %v1172_v6 = vld [vmem:[%s3500_s3] sm:$0xff]  ;;  %v2432_v45 = vld [vmem:[%s3501_s23 + $0x8] sm:$0xff] }
  0x42   : > { %1127 = vmatpush.msra.mxu2 %v2689_v48  ;;  %1147 = vmatpush.msra.mxu3 %v2721_v49  ;;  %v2855_v48 = vld [vmem:[%s3499_s30 + $0x10] sm:$0xff]   ;;  %v2728_v49 = vld [vmem:[%s3499_s30] sm:$0xff]  }
  0x43   : > { %v2738_v52 = vunpack.c.h.bf16 %v2855_v48  ;;  %v2730_v53 = vunpack.c.h.bf16 %v2728_v49 }
  0x44   : > { %1128 = vmatpush.msra.mxu2 %v2686_v50  ;;  %1148 = vmatpush.msra.mxu3 %v2718_v51  ;;  %v2741_v50 = vunpack.c.l.bf16 %v2856_v42  ;;  %v2733_v51 = vunpack.c.l.bf16 %v2854_v43  ;;  %v1557_v43 = vld [vmem:[%s3470_s13] sm:$0xf] }
  0x46   : > { %1129 = vmatpush.msra.mxu2 %v2685_v54  ;;  %1149 = vmatpush.msra.mxu3 %v2717_v55  ;;  %v2737_v54 = vunpack.c.l.bf16 %v2855_v48  ;;  %v2729_v55 = vunpack.c.l.bf16 %v2728_v49  ;;  %v2882_v48 = vld [vmem:[%s3469_s12] ss:$0 sm:$0xff] }
  0x48   : > { %1130 = vmatpush.msra.mxu2 %v2682_v56  ;;  %1150 = vmatpush.msra.mxu3 %v2714_v57 }
  0x4a   : > { %1131 = vmatpush.msra.mxu2 %v2681_v60  ;;  %1151 = vmatpush.msra.mxu3 %v2713_v61  ;;  %v2750_v60 = vunpack.c.h.bf16 %v2858_v59  ;;  %v2749_v61 = vunpack.c.l.bf16 %v2858_v59 }
  0x4c   : > { %1132 = vmatpush.msra.mxu2 %v2678_v62  ;;  %1152 = vmatpush.msra.mxu3 %v2710_v63  ;;  %v2857_v62 = vld [vmem:[%s3499_s30 + $0x20] sm:$0xff]  }
  0x4d   : > { %v2746_v63 = vunpack.c.h.bf16 %v2857_v62  ;;  %v2745_v0 = vunpack.c.l.bf16 %v2857_v62  ;;  %v2883_v62 = vld [vmem:[%s3471_s14] ss:$0 sm:$0xff] }
  0x4e   : > { %1133 = vmatpush.msra.mxu2 %v2677_v2  ;;  %1153 = vmatpush.msra.mxu3 %v2709_v3  ;;  %v1349_v3 = vld [vmem:[%s3465_s8] sm:$0xf] }
  0x50   : > { %1134 = vmatpush.msra.mxu2 %v2674_v8  ;;  %1154 = vmatpush.msra.mxu3 %v2706_v9  ;;  %v2880_v9 = vld [vmem:[%s3464_s7] ss:$0 sm:$0xff] }
  0x52   : > { %1135 = vmatpush.msra.mxu2 %v2673_v13  ;;  %1155 = vmatpush.msra.mxu3 %v2705_v14  ;;  %v2859_v14 = vld [vmem:[%s3468_s11 + $0x8] sm:$0xff]  }
  0x53   : > { %v2758_v16 = vunpack.c.h.bf16 %v2859_v14 }
  0x54   : > { %1136 = vmatpush.msra.mxu2 %v2670_v17  ;;  %1156 = vmatpush.msra.mxu3 %v2702_v18  ;;  %v2757_v17 = vunpack.c.l.bf16 %v2859_v14  ;;  %v2754_v18 = vunpack.c.h.bf16 %v2752_v15 }
  0x56   : > { %1137 = vmatpush.msra.mxu2 %v2669_v19  ;;  %1157 = vmatpush.msra.mxu3 %v2701_v20  ;;  %v2881_v19 = vld [vmem:[%s3466_s9] ss:$0 sm:$0xff] }
  0x58   : > { %1138 = vmatpush.msra.mxu2 %v2666_v23  ;;  %1158 = vmatpush.msra.mxu3 %v2698_v24  ;;  %v1381_v24 = vld [vmem:[%s3467_s10] sm:$0xff] }
  0x5a   : > { %1139 = vmatpush.msra.mxu2 %v2665_v25  ;;  %1159 = vmatpush.msra.mxu3 %v2697_v26  ;;  %v2449_v25 = vld [vmem:[%s3467_s10 + $0x8] sm:$0xff]  ;;  %v2457_v26 = vld [vmem:[%s3467_s10 + $0x10] sm:$0xff] }
  0x98   : > { %v737_v4 = vpop.f32.mrf.mxu0  ;;  %v757_v7 = vpop.f32.mrf.mxu1 }
  0x99   : > { %990 = vmatmul.f32.vlgmr.msrb.gmra.mxu2 %v737_v4  ;;  %1010 = vmatmul.f32.vlgmr.msrb.gmra.mxu3 %v757_v7  ;;  %v1350_v4 = vunpack.c.l.bf16 %v1349_v3  ;;  %v2466_v3 = vld [vmem:[%s3472_s15 + $0x8] sm:$0xff] }
  0x9c   : > { %v846_v10 = vpop.f32.mrf.mxu2  ;;  %v866_v11 = vpop.f32.mrf.mxu3 }
  0x9d   : > { %950 = vmatmul.f32.vlgmr.msrb.gmra.mxu0 %v846_v10  ;;  %970 = vmatmul.f32.vlgmr.msrb.gmra.mxu1 %v866_v11 }
  0xa5   : > { %2397 = vmatmul.msk.f32.vlgmr.msra.gmra.mxu0 %vm716_vm0, %v2396_v12  ;;  %2398 = vmatmul.msk.f32.vlgmr.msra.gmra.mxu1 %vm716_vm0, %v2396_v12 }
 0x11a   : > { %v951_v27 = vpop.f32.mrf.mxu0  ;;  %v971_v28 = vpop.f32.mrf.mxu1 }
 0x11b   : > { %v972_v29 = vadd.f32 %v971_v28, %v951_v27  ;;  %v2861_v27 = vld [vmem:[%s3468_s11 + $0x18] sm:$0xff]  }
 0x11c   : > { %v991_v32 = vpop.f32.mrf.mxu2  ;;  %v1011_v33 = vpop.f32.mrf.mxu3  ;;  %v2766_v28 = vunpack.c.h.bf16 %v2861_v27 }
 0x11d   : > { %v992_v34 = vadd.f32 %v991_v32, %v972_v29  ;;  %v2753_v29 = vunpack.c.l.bf16 %v2752_v15 }
 0x11e   : > { %1462 = vmatpush.msrb.mxu3 %v2766_v28  ;;  %v2496_v28 = vld [vmem:[%s3476_s19 + $0x30] sm:$0xff] }
 0x11f   : > { %v1012_v37 = vadd.f32 %v1011_v33, %v992_v34  ;;  %v2860_v33 = vld [vmem:[%s3468_s11 + $0x10] sm:$0xff]  }
 0x122   : > { %v1036_v30 = vpop.f32.mrf.mxu0  ;;  %v1056_v31 = vpop.f32.mrf.mxu1 }
 0x123   : > { %1140 = vmatmul.f32.vlgmr.msra.gmra.mxu2 %v1036_v30  ;;  %1160 = vmatmul.f32.vlgmr.msra.gmra.mxu3 %v1056_v31  ;;  %v2863_v30 = vld [vmem:[%s3468_s11 + $0x28] sm:$0xff]   ;;  %v2765_v31 = vunpack.c.l.bf16 %v2861_v27 }
 0x124   : > { %v2774_v32 = vunpack.c.h.bf16 %v2863_v30  ;;  %v2773_v34 = vunpack.c.l.bf16 %v2863_v30  ;;  %v2495_v30 = vld [vmem:[%s3476_s19 + $0x28] sm:$0xff] }
 0x125   : > { %1463 = vmatpush.msrb.mxu3 %v2765_v31  ;;  %v1904_v31 = vunpack.c.l.bf16 %v2495_v30 }
 0x1a6   : > { %v1141_v35 = vpop.f32.mrf.mxu2  ;;  %v1161_v36 = vpop.f32.mrf.mxu3 }
 0x1a7   : > { %v1162_v38 = vadd.f32 %v1161_v36, %v1141_v35  ;;  %v2762_v35 = vunpack.c.h.bf16 %v2860_v33  ;;  %v2862_v36 = vld [vmem:[%s3468_s11 + $0x20] sm:$0xff]  }
 0x1a9   : > { %v1164_v40 = vadd.f32 %v1162_v38, %v1012_v37  ;;  %1464 = vmatpush.msrb.mxu3 %v2762_v35  ;;  %v2761_v37 = vunpack.c.l.bf16 %v2860_v33  ;;  %v2770_v38 = vunpack.c.h.bf16 %v2862_v36 }
 0x1ab   : > { %v3194_v41 = vadd.f32 %v2879_v39, %v1164_v40  ;;  %1465 = vmatpush.msrb.mxu3 %v2761_v37  ;;  %v2769_v39 = vunpack.c.l.bf16 %v2862_v36 }
 0x1ad   : > { %v1170_v44 = vmax.f32 %v3194_v41, 0.0 }
 0x1af   : > { %v1171_v5 = vmax.f32 %v1170_v44, 0.0 }
 0x1b1   : > { %1191 = vmatpush.msrb.mxu0 %v1171_v5  ;;  %1224 = vmatpush.msrb.mxu1 %v1171_v5 }
 0x1b2   : > { %2431 = vmatmul.msk.f32.vlgmr.msrb.gmra.mxu0 %vm716_vm0, %v1172_v6  ;;  %2433 = vmatmul.msk.f32.vlgmr.msrb.gmra.mxu1 %vm716_vm0, %v2432_v45 }
 0x1b3   : > { %1254 = vmatpush.msra.mxu0 %v2742_v46  ;;  %1277 = vmatpush.msra.mxu1 %v2734_v47 }
 0x1b5   : > { %1255 = vmatpush.msra.mxu0 %v2741_v50  ;;  %1278 = vmatpush.msra.mxu1 %v2733_v51 }
 0x1b7   : > { %1256 = vmatpush.msra.mxu0 %v2738_v52  ;;  %1279 = vmatpush.msra.mxu1 %v2730_v53 }
 0x1b9   : > { %1257 = vmatpush.msra.mxu0 %v2737_v54  ;;  %1280 = vmatpush.msra.mxu1 %v2729_v55  ;;  %v2865_v54 = vld [vmem:[%s3473_s16 + $0x10] sm:$0xff]  }
 0x1ba   : > { %v2786_v55 = vunpack.c.h.bf16 %v2865_v54 }
 0x1bb   : > { %1305 = vmatpush.msrb.mxu0 %v1171_v5  ;;  %1334 = vmatpush.msrb.mxu1 %v2750_v60  ;;  %v2866_v5 = vld [vmem:[%s3473_s16 + $0x18] sm:$0xff]  }
 0x1bc   : > { %v2790_v6 = vunpack.c.h.bf16 %v2866_v5  ;;  %v2789_v53 = vunpack.c.l.bf16 %v2866_v5  ;;  %v2490_v5 = vld [vmem:[%s3475_s18 + $0x10] sm:$0xff] }
 0x1bd   : > { %1335 = vmatpush.msrb.mxu1 %v2749_v61 }
 0x1bf   : > { %1336 = vmatpush.msrb.mxu1 %v2746_v63 }
 0x1c1   : > { %1337 = vmatpush.msrb.mxu1 %v2745_v0 }
 0x22f   : > { %v1193_v56 = vpop.f32.mrf.mxu0  ;;  %v1226_v57 = vpop.f32.mrf.mxu1 }
 0x230   : > { %2438 = vmatmul.msk.f32.vlgmr.msra.gmra.mxu0 %vm1238_vm1, %v1226_v57  ;;  %2439 = vmatmul.msk.f32.vlgmr.msra.gmra.mxu1 %vm1238_vm1, %v1193_v56  ;;  %v2785_v56 = vunpack.c.l.bf16 %v2865_v54  ;;  %v2864_v57 = vld [vmem:[%s3473_s16 + $0x8] sm:$0xff]   ;;  %v1907_v54 = vunpack.c.h.bf16 %v2496_v28 }
 0x231   : > { %1369 = vmatpush.msra.mxu0 %v1350_v4  ;;  %v2782_v59 = vunpack.c.h.bf16 %v2864_v57  ;;  %v2781_v60 = vunpack.c.l.bf16 %v2864_v57  ;;  %v2474_v4 = vld [vmem:[%s3472_s15 + $0x10] sm:$0xff] }
 0x238   : > { %2441 = vmatmul.msk.f32.vlgmr.msrb.gmra.mxu0 %vm716_vm0, %v2440_v58  ;;  %v2776_v58 = vld [vmem:[%s3473_s16] sm:$0xff]  }
 0x239   : > { %1485 = vmatpush.msrb.mxu0 %v2758_v16  ;;  %v2778_v61 = vunpack.c.h.bf16 %v2776_v58  ;;  %v2481_v16 = vld [vmem:[%s3472_s15 + $0x18] sm:$0xff] }
 0x23b   : > { %1486 = vmatpush.msrb.mxu0 %v2757_v17 }
 0x23d   : > { %1487 = vmatpush.msrb.mxu0 %v2754_v18  ;;  %v2870_v18 = vld [vmem:[%s3473_s16 + $0x38] sm:$0xff]  }
 0x23f   : > { %1488 = vmatpush.msrb.mxu0 %v2753_v29  ;;  %v1906_v29 = vunpack.c.l.bf16 %v2496_v28 }
 0x2ad   : > { %v1259_v1 = vpop.f32.mrf.mxu0  ;;  %v1282_v7 = vpop.f32.mrf.mxu1 }
 0x2ae   : > { %v1283_v8 = vadd.f32 %v1282_v7, %v1259_v1  ;;  %v2777_v7 = vunpack.c.l.bf16 %v2776_v58 }
 0x2b5   : > { %v1307_v2 = vpop.f32.mrf.mxu0 }
 0x2b6   : > { %2446 = vmatmul.msk.f32.vlgmr.msrb.gmra.mxu1 %vm1238_vm1, %v1307_v2  ;;  %v1588_v2 = vld [vmem:[%s3472_s15] sm:$0xff] }
 0x333   : > { %v1339_v10 = vpop.f32.mrf.mxu1 }
 0x334   : > { %v1342_v11 = vadd.f32 %v1339_v10, %v1283_v8  ;;  %v2868_v8 = vld [vmem:[%s3473_s16 + $0x28] sm:$0xff]  }
 0x335   : > { %v2797_v10 = vunpack.c.l.bf16 %v2868_v8 }
 0x336   : > { %v1347_v12 = vadd.f32 %v2880_v9, %v1342_v11  ;;  %v2798_v9 = vunpack.c.h.bf16 %v2868_v8  ;;  %v2867_v11 = vld [vmem:[%s3473_s16 + $0x20] sm:$0xff]  }
 0x338   : > { %v1348_v13 = vmax.f32 %v1347_v12, 0.0  ;;  %v2794_v12 = vunpack.c.h.bf16 %v2867_v11 }
 0x33a   : > { %2447 = vmatmul.msk.f32.vlgmr.msra.gmra.mxu0 %vm716_vm0, %v1348_v13  ;;  %v2793_v13 = vunpack.c.l.bf16 %v2867_v11  ;;  %v2525_v11 = vld [vmem:[%s3476_s19 + $0x78] sm:$0xff] }
 0x3b7   : > { %v1371_v20 = vpop.f32.mrf.mxu0 }
 0x3b8   : > { %v1374_v21 = vadd.f32 %v1371_v20, %v1170_v44  ;;  %v1558_v44 = vunpack.c.l.bf16 %v1557_v43  ;;  %v2805_v20 = vunpack.c.l.bf16 %v2870_v18  ;;  %v1855_v43 = vld [vmem:[%s3476_s19 + $0x10] sm:$0xff] }
 0x3b9   : > { %v1861_v58 = vunpack.c.l.bf16 %v1855_v43 }
 0x3ba   : > { %v3250_v22 = vadd.f32 %v2881_v19, %v1374_v21  ;;  %1577 = vmatpush.msra.mxu3 %v1558_v44  ;;  %v2806_v19 = vunpack.c.h.bf16 %v2870_v18  ;;  %v2869_v21 = vld [vmem:[%s3473_s16 + $0x30] sm:$0xff]  }
 0x3bc   : > { %v1380_v23 = vmax.f32 %v3250_v22, 0.0 }
 0x3be   : > { %1400 = vmatpush.msra.mxu1 %v1380_v23  ;;  %1433 = vmatpush.msrb.mxu2 %v1380_v23 }
 0x3bf   : > { %2448 = vmatmul.msk.f32.vlgmr.msra.gmra.mxu1 %vm716_vm0, %v1381_v24  ;;  %2450 = vmatmul.msk.f32.vlgmr.msrb.gmra.mxu2 %vm716_vm0, %v2449_v25 }
 0x3c0   : > { %1513 = vmatpush.msrb.mxu1 %v1380_v23  ;;  %1542 = vmatpush.msra.mxu2 %v2774_v32  ;;  %v2801_v23 = vunpack.c.l.bf16 %v2869_v21  ;;  %v2494_v32 = vld [vmem:[%s3476_s19 + $0x20] sm:$0xff] }
 0x3c1   : > { %v1902_v33 = vunpack.c.l.bf16 %v2494_v32 }
 0x3c2   : > { %1543 = vmatpush.msra.mxu2 %v2773_v34 }
 0x3c4   : > { %1544 = vmatpush.msra.mxu2 %v2770_v38  ;;  %v2884_v38 = vld [vmem:[%s3474_s17] ss:$0 sm:$0xff] }
 0x3c6   : > { %1545 = vmatpush.msra.mxu2 %v2769_v39 }
 0x3c7   : > { %2458 = vmatmul.msk.f32.vlgmr.msrb.gmra.mxu1 %vm716_vm0, %v2457_v26  ;;  %v2497_v26 = vld [vmem:[%s3476_s19 + $0x38] sm:$0xff] }
 0x3c8   : > { %1669 = vmatpush.msrb.mxu2 %v2790_v6  ;;  %v1908_v27 = vunpack.c.l.bf16 %v2497_v26 }
 0x3ca   : > { %1670 = vmatpush.msrb.mxu2 %v2789_v53  ;;  %v1909_v53 = vunpack.c.h.bf16 %v2497_v26 }
 0x3cc   : > { %1671 = vmatpush.msrb.mxu2 %v2786_v55  ;;  %v1905_v55 = vunpack.c.h.bf16 %v2495_v30 }
 0x3ce   : > { %1672 = vmatpush.msrb.mxu2 %v2785_v56  ;;  %v1903_v56 = vunpack.c.h.bf16 %v2494_v32 }
 0x43c   : > { %v1402_v40 = vpop.f32.mrf.mxu1 }
 0x43d   : > { %2456 = vmatmul.msk.f32.vlgmr.msrb.gmra.mxu0 %vm1238_vm1, %v1402_v40 }
 0x442   : > { %v1435_v41 = vpop.f32.mrf.mxu2 }
 0x443   : > { %2455 = vmatmul.msk.f32.vlgmr.msrb.gmra.mxu3 %vm1238_vm1, %v1435_v41  ;;  %v1856_v41 = vld [vmem:[%s3476_s19 + $0x18] sm:$0xff] }
 0x444   : > { %v1515_v42 = vpop.f32.mrf.mxu1  ;;  %1692 = vmatpush.msrb.mxu3 %v2782_v59  ;;  %v1864_v6 = vunpack.c.h.bf16 %v1856_v41  ;;  %v1863_v57 = vunpack.c.l.bf16 %v1856_v41 }
 0x445   : > { %2463 = vmatmul.msk.f32.vlgmr.msra.gmra.mxu2 %vm1238_vm1, %v1515_v42 }
 0x446   : > { %1693 = vmatpush.msrb.mxu3 %v2781_v60 }
 0x448   : > { %1694 = vmatpush.msrb.mxu3 %v2778_v61 }
 0x44a   : > { %1695 = vmatpush.msrb.mxu3 %v2777_v7  ;;  %v2513_v7 = vld [vmem:[%s3476_s19 + $0x58] sm:$0xff] }
 0x44b   : > { %v2057_v8 = vunpack.c.l.bf16 %v2513_v7 }
 0x4ba   : > { %v1490_v45 = vpop.f32.mrf.mxu0 }
 0x4c6   : > { %v1467_v46 = vpop.f32.mrf.mxu3 }
 0x4c7   : > { %v1491_v47 = vadd.f32 %v1490_v45, %v1467_v46  ;;  %v1854_v45 = vld [vmem:[%s3476_s19 + $0x8] sm:$0xff]  ;;  %v1822_v46 = vld [vmem:[%s3475_s18] sm:$0xff] }
 0x4c8   : > { %v1547_v49 = vpop.f32.mrf.mxu2  ;;  %v1859_v59 = vunpack.c.l.bf16 %v1854_v45 }
 0x4c9   : > { %v1550_v50 = vadd.f32 %v1547_v49, %v1491_v47  ;;  %v1862_v47 = vunpack.c.h.bf16 %v1855_v43  ;;  %v1860_v49 = vunpack.c.h.bf16 %v1854_v45  ;;  %v2216_v43 = vld [vmem:[%s3477_s20] sm:$0x3] }
 0x4ca   : > { %v2218_v45 = vperm.slane %v2216_v43, 0 }
 0x4cb   : > { %v1555_v51 = vadd.f32 %v2882_v48, %v1550_v50  ;;  %v1853_v48 = vld [vmem:[%s3476_s19] sm:$0xff] }
 0x4cc   : > { %v1858_v50 = vunpack.c.h.bf16 %v1853_v48  ;;  %v1857_v60 = vunpack.c.l.bf16 %v1853_v48 }
 0x4cd   : > { %v1556_v52 = vmax.f32 %v1555_v51, 0.0  ;;  %v2491_v51 = vld [vmem:[%s3475_s18 + $0x18] sm:$0xff] }
 0x4cf   : > { %2464 = vmatmul.msk.f32.vlgmr.msra.gmra.mxu3 %vm716_vm0, %v1556_v52  ;;  %v1823_v52 = vld [vmem:[%s3475_s18 + $0x8] sm:$0xff] }
 0x4d0   : > { %1807 = vmatpush.msra.mxu3 %v2806_v19 }
 0x4d2   : > { %1808 = vmatpush.msra.mxu3 %v2805_v20  ;;  %v2510_v20 = vld [vmem:[%s3476_s19 + $0x40] sm:$0xff] }
 0x552   : > { %v1579_v63 = vpop.f32.mrf.mxu3 }
 0x553   : > { %v1582_v0 = vadd.f32 %v1579_v63, %v3250_v22  ;;  %v2802_v22 = vunpack.c.h.bf16 %v2869_v21  ;;  %v2523_v21 = vld [vmem:[%s3476_s19 + $0x68] sm:$0xff] }
 0x554   : > { %v2155_v30 = vunpack.c.h.bf16 %v2523_v21 }
 0x555   : > { %v1587_v1 = vadd.f32 %v2883_v62, %v1582_v0  ;;  %1809 = vmatpush.msra.mxu3 %v2802_v22  ;;  %v2051_v22 = vunpack.c.l.bf16 %v2510_v20 }
 0x557   : > { %1607 = vmatpush.msra.mxu0 %v1587_v1  ;;  %1640 = vmatpush.msra.mxu1 %v1587_v1 }
 0x558   : > { %1778 = vmatpush.msra.mxu2 %v1587_v1  ;;  %2465 = vmatmul.msk.f32.vlgmr.msra.gmra.mxu0 %vm716_vm0, %v1588_v2  ;;  %v2518_v2 = vld [vmem:[%s3475_s18 + $0x30] sm:$0xff] }
 0x559   : > { %2467 = vmatmul.msk.f32.vlgmr.msra.gmra.mxu1 %vm716_vm0, %v2466_v3  ;;  %1720 = vmatpush.msrb.mxu0 %v1587_v1  ;;  %v2506_v1 = vld [vmem:[%s3475_s18 + $0x20] sm:$0xff]  ;;  %v2507_v3 = vld [vmem:[%s3475_s18 + $0x28] sm:$0xff] }
 0x55a   : > { %1749 = vmatpush.msrb.mxu1 %v2798_v9  ;;  %1810 = vmatpush.msra.mxu3 %v2801_v23  ;;  %v2058_v9 = vunpack.c.h.bf16 %v2513_v7  ;;  %v2052_v23 = vunpack.c.h.bf16 %v2510_v20 }
 0x55c   : > { %1750 = vmatpush.msrb.mxu1 %v2797_v10  ;;  %v2512_v10 = vld [vmem:[%s3476_s19 + $0x50] sm:$0xff] }
 0x55e   : > { %1751 = vmatpush.msrb.mxu1 %v2794_v12  ;;  %v2511_v12 = vld [vmem:[%s3476_s19 + $0x48] sm:$0xff] }
 0x55f   : > { %v2054_v18 = vunpack.c.h.bf16 %v2511_v12 }
 0x560   : > { %2475 = vmatmul.msk.f32.vlgmr.msrb.gmra.mxu0 %vm716_vm0, %v2474_v4  ;;  %1752 = vmatpush.msrb.mxu1 %v2793_v13  ;;  %v2519_v4 = vld [vmem:[%s3475_s18 + $0x38] sm:$0xff]  ;;  %v2055_v13 = vunpack.c.l.bf16 %v2512_v10 }
 0x5d5   : > { %v1609_v14 = vpop.f32.mrf.mxu0 }
 0x5d6   : > { %v1642_v15 = vpop.f32.mrf.mxu1  ;;  %2473 = vmatmul.msk.f32.vlgmr.msrb.gmra.mxu3 %vm1238_vm1, %v1609_v14  ;;  %v2056_v14 = vunpack.c.h.bf16 %v2512_v10  ;;  %v2232_v10 = vld [vmem:[%s704_s2 + $0x10] sm:$0xff] }
 0x5d7   : > { %2472 = vmatmul.msk.f32.vlgmr.msrb.gmra.mxu2 %vm1238_vm1, %v1642_v15  ;;  %1951 = vmatpush.msrb.mxu3 %v1909_v53  ;;  %v2158_v15 = vunpack.c.l.bf16 %v2525_v11 }
 0x5d8   : > { %1928 = vmatpush.msrb.mxu2 %v1908_v27  ;;  %v2159_v27 = vunpack.c.h.bf16 %v2525_v11 }
 0x5d9   : > { %1952 = vmatpush.msrb.mxu3 %v1907_v54 }
 0x5da   : > { %1929 = vmatpush.msrb.mxu2 %v1906_v29 }
 0x5db   : > { %1953 = vmatpush.msrb.mxu3 %v1905_v55 }
 0x5dc   : > { %1930 = vmatpush.msrb.mxu2 %v1904_v31 }
 0x5dd   : > { %v1722_v17 = vpop.f32.mrf.mxu0  ;;  %1954 = vmatpush.msrb.mxu3 %v1903_v56 }
 0x5de   : > { %2480 = vmatmul.msk.f32.vlgmr.msrb.gmra.mxu1 %vm1238_vm1, %v1722_v17  ;;  %1931 = vmatpush.msrb.mxu2 %v1902_v33  ;;  %v2053_v17 = vunpack.c.l.bf16 %v2511_v12 }
 0x5df   : > { %2482 = vmatmul.msk.f32.vlgmr.msra.gmra.mxu2 %vm716_vm0, %v2481_v16  ;;  %v2524_v16 = vld [vmem:[%s3476_s19 + $0x70] sm:$0xff] }
 0x5e0   : > { %v2156_v19 = vunpack.c.l.bf16 %v2524_v16  ;;  %v2157_v28 = vunpack.c.h.bf16 %v2524_v16 }
 0x659   : > { %v1697_v34 = vpop.f32.mrf.mxu3 }
 0x65a   : > { %v1674_v24 = vpop.f32.mrf.mxu2 }
 0x65b   : > { %v1698_v35 = vadd.f32 %v1697_v34, %v1674_v24  ;;  %v1754_v36 = vpop.f32.mrf.mxu1  ;;  %v2154_v24 = vunpack.c.l.bf16 %v2523_v21 }
 0x65d   : > { %v1757_v37 = vadd.f32 %v1754_v36, %v1698_v35 }
 0x662   : > { %v1780_v25 = vpop.f32.mrf.mxu2 }
 0x663   : > { %2487 = vmatmul.msk.f32.vlgmr.msra.gmra.mxu3 %vm1238_vm1, %v1780_v25  ;;  %v2522_v25 = vld [vmem:[%s3476_s19 + $0x60] sm:$0xff] }
 0x664   : > { %2077 = vmatpush.msra.mxu3 %v2057_v8  ;;  %v2152_v26 = vunpack.c.l.bf16 %v2522_v25  ;;  %v2153_v31 = vunpack.c.h.bf16 %v2522_v25 }
 0x666   : > { %2078 = vmatpush.msra.mxu3 %v2055_v13  ;;  %v2233_v13 = vld [vmem:[%s704_s2 + $0x18] sm:$0xff] }
 0x668   : > { %2079 = vmatpush.msra.mxu3 %v2053_v17 }
 0x66a   : > { %2080 = vmatpush.msra.mxu3 %v2051_v22 }
 0x6e6   : > { %v1812_v39 = vpop.f32.mrf.mxu3 }
 0x6e7   : > { %v1815_v40 = vadd.f32 %v1812_v39, %v1757_v37 }
 0x6e9   : > { %v1820_v42 = vadd.f32 %v2884_v38, %v1815_v40 }
 0x6eb   : > { %v1821_v44 = vmax.f32 %v1820_v42, 0.0 }
 0x6ed   : > { %1845 = vmatpush.msra.mxu0 %v1821_v44  ;;  %1889 = vmatpush.msra.mxu1 %v1821_v44 }
 0x6ee   : > { %2038 = vmatpush.msra.mxu2 %v1821_v44  ;;  %2492 = vmatmul.msk.f32.vlgmr.msra.gmra.mxu1 %vm716_vm0, %v2490_v5 }
 0x6ef   : > { %2003 = vmatpush.msrb.mxu1 %v1864_v6  ;;  %2488 = vmatmul.msk.f32.vlgmr.msra.gmra.mxu0 %vm716_vm0, %v1822_v46 }
 0x6f0   : > { %1980 = vmatpush.msrb.mxu0 %v1863_v57 }
 0x6f1   : > { %2004 = vmatpush.msrb.mxu1 %v1862_v47 }
 0x6f2   : > { %1981 = vmatpush.msrb.mxu0 %v1861_v58  ;;  %v2219_v58 = vperm.slane %v2216_v43, 1 }
 0x6f3   : > { %2005 = vmatpush.msrb.mxu1 %v1860_v49 }
 0x6f4   : > { %1982 = vmatpush.msrb.mxu0 %v1859_v59 }
 0x6f5   : > { %2006 = vmatpush.msrb.mxu1 %v1858_v50 }
 0x6f6   : > { %2493 = vmatmul.msk.f32.gmra.mxu1 %vm716_vm0, %v2491_v51  ;;  %1983 = vmatpush.msrb.mxu0 %v1857_v60  ;;  %v2230_v60 = vld [vmem:[%s704_s2] sm:$0xff] }
 0x6f7   : > { %2139 = vmatpush.msra.mxu1 %v1821_v44  ;;  %2489 = vmatmul.msk.f32.gmra.mxu0 %vm716_vm0, %v1823_v52 }
 0x6f8   : > { %2100 = vmatpush.msra.mxu0 %v2058_v9 }
 0x6fa   : > { %2101 = vmatpush.msra.mxu0 %v2056_v14 }
 0x6fc   : > { %2102 = vmatpush.msra.mxu0 %v2054_v18 }
 0x6fe   : > { %2103 = vmatpush.msra.mxu0 %v2052_v23 }
 0x76b   : > { %v1891_v61 = vpop.f32.mrf.mxu1 }
 0x76c   : > { %2498 = vmatmul.msk.f32.vlgmr.msrb.gmra.mxu2 %vm1238_vm1, %v1891_v61  ;;  %v1847_v62 = vpop.f32.mrf.mxu0  ;;  %2500 = vmatmul.msk.f32.vlgmr.msrb.gmra.mxu3 %vm1238_vm1, %v1891_v61 }
 0x76d   : > { %2504 = vmatmul.msk.f32.vlgmr.msrb.gmra.mxu1 %vm1238_vm1, %v1847_v62  ;;  %2502 = vmatmul.msk.f32.vlgmr.msrb.gmra.mxu0 %vm1238_vm1, %v1847_v62  ;;  %v2231_v62 = vld [vmem:[%s704_s2 + $0x8] sm:$0xff] }
 0x76e   : > { %2178 = vmatpush.msrb.mxu2 %v2158_v15  ;;  %2201 = vmatpush.msrb.mxu3 %v2159_v27 }
 0x770   : > { %2179 = vmatpush.msrb.mxu2 %v2156_v19  ;;  %2202 = vmatpush.msrb.mxu3 %v2157_v28 }
 0x772   : > { %2180 = vmatpush.msrb.mxu2 %v2154_v24  ;;  %2203 = vmatpush.msrb.mxu3 %v2155_v30 }
 0x773   : > { %v1894_v63 = vpop.f32.mrf.mxu1 }
 0x774   : > { %v1850_v0 = vpop.f32.mrf.mxu0  ;;  %2499 = vmatmul.msk.f32.gmra.mxu2 %vm1238_vm1, %v1894_v63  ;;  %2501 = vmatmul.msk.f32.gmra.mxu3 %vm1238_vm1, %v1894_v63 }
 0x775   : > { %2505 = vmatmul.msk.f32.gmra.mxu1 %vm1238_vm1, %v1850_v0  ;;  %2503 = vmatmul.msk.f32.gmra.mxu0 %vm1238_vm1, %v1850_v0 }
 0x776   : > { %2181 = vmatpush.msrb.mxu2 %v2152_v26  ;;  %2204 = vmatpush.msrb.mxu3 %v2153_v31 }
 0x77c   : > { %2508 = vmatmul.msk.f32.vlgmr.msra.gmra.mxu2 %vm716_vm0, %v2506_v1 }
 0x77d   : > { %2520 = vmatmul.msk.f32.vlgmr.msra.gmra.mxu1 %vm716_vm0, %v2518_v2 }
 0x784   : > { %2509 = vmatmul.msk.f32.gmra.mxu2 %vm716_vm0, %v2507_v3 }
 0x785   : > { %2521 = vmatmul.msk.f32.gmra.mxu1 %vm716_vm0, %v2519_v4 }
 0x7ea   : > { %v2008_v29 = vpop.f32.mrf.mxu1  ;;  %v1985_v40 = vpop.f32.mrf.mxu0 }
 0x7ef   : > { %v1933_v32 = vpop.f32.mrf.mxu2  ;;  %v1956_v39 = vpop.f32.mrf.mxu3 }
 0x7f0   : > { %v1986_v44 = vadd.f32 %v1985_v40, %v1933_v32  ;;  %v2009_v55 = vadd.f32 %v2008_v29, %v1956_v39 }
 0x7f2   : > { %v2011_v33 = vpop.f32.mrf.mxu1  ;;  %v1988_v46 = vpop.f32.mrf.mxu0 }
 0x7f7   : > { %v1936_v34 = vpop.f32.mrf.mxu2  ;;  %v1959_v41 = vpop.f32.mrf.mxu3 }
 0x7f8   : > { %v1989_v49 = vadd.f32 %v1988_v46, %v1936_v34  ;;  %v2012_v2 = vadd.f32 %v2011_v33, %v1959_v41 }
 0x7fa   : > { %v2141_v35 = vpop.f32.mrf.mxu1 }
 0x7fb   : > { %2526 = vmatmul.msk.f32.vlgmr.msrb.gmra.mxu2 %vm1238_vm1, %v2141_v35 }
 0x7ff   : > { %v2040_v36 = vpop.f32.mrf.mxu2 }
 0x800   : > { %2514 = vmatmul.msk.f32.vlgmr.msra.gmra.mxu3 %vm1238_vm1, %v2040_v36  ;;  %2516 = vmatmul.msk.f32.vlgmr.msra.gmra.mxu0 %vm1238_vm1, %v2040_v36 }
 0x802   : > { %v2144_v37 = vpop.f32.mrf.mxu1 }
 0x803   : > { %2527 = vmatmul.msk.f32.gmra.mxu2 %vm1238_vm1, %v2144_v37 }
 0x807   : > { %v2043_v38 = vpop.f32.mrf.mxu2 }
 0x808   : > { %2515 = vmatmul.msk.f32.gmra.mxu3 %vm1238_vm1, %v2043_v38  ;;  %2517 = vmatmul.msk.f32.gmra.mxu0 %vm1238_vm1, %v2043_v38 }
 0x810   : > { %2528 = vmatmul.msk.f32.vlgmr.msrb.gmra.mxu3 %vm1238_vm1, %v2141_v35 }
 0x818   : > { %2529 = vmatmul.msk.f32.gmra.mxu3 %vm1238_vm1, %v2144_v37 }
 0x87d   : > { %v2105_v53 = vpop.f32.mrf.mxu0 }
 0x87e   : > { %v2183_v42 = vpop.f32.mrf.mxu2  ;;  %v2112_v57 = vadd.f32 %v2105_v53, %v2009_v55 }
 0x883   : > { %v2082_v5 = vpop.f32.mrf.mxu3 }
 0x884   : > { %v2111_v6 = vadd.f32 %v2082_v5, %v1986_v44 }
 0x885   : > { %v2108_v1 = vpop.f32.mrf.mxu0 }
 0x886   : > { %v2212_v47 = vadd.f32 %v2183_v42, %v2111_v6  ;;  %v2186_v51 = vpop.f32.mrf.mxu2  ;;  %v2114_v4 = vadd.f32 %v2108_v1, %v2012_v2 }
 0x888   : > { %v2222_v48 = vadd.f32 %v2218_v45, %v2212_v47 }
 0x88a   : > { %2226 = vst [vmem:[%s3441_s24] sm:$0xff] %v2222_v48  ;;  %v2234_v0 = vsub.f32 %v2222_v48, %v2230_v60 }
 0x88b   : > { %v2085_v50 = vpop.f32.mrf.mxu3 }
 0x88c   : > { %v2113_v52 = vadd.f32 %v2085_v50, %v1989_v49  ;;  %v2238_v7 = vmul.f32 %v2234_v0, %v2234_v0 }
 0x88e   : > { %v2214_v54 = vadd.f32 %v2186_v51, %v2113_v52 }
 0x890   : > { %v2224_v56 = vadd.f32 %v2218_v45, %v2214_v54 }
 0x892   : > { %2228 = vst [vmem:[%s3441_s24 + $0x10] sm:$0xff] %v2224_v56  ;;  %v2236_v15 = vsub.f32 %v2224_v56, %v2232_v10 }
 0x893   : > { %v2206_v59 = vpop.f32.mrf.mxu3 }
 0x894   : > { %v2213_v61 = vadd.f32 %v2206_v59, %v2112_v57  ;;  %v2240_v17 = vmul.f32 %v2236_v15, %v2236_v15 }
 0x896   : > { %v2223_v63 = vadd.f32 %v2219_v58, %v2213_v61 }
 0x898   : > { %2227 = vst [vmem:[%s3441_s24 + $0x8] sm:$0xff] %v2223_v63  ;;  %v2235_v3 = vsub.f32 %v2223_v63, %v2231_v62 }
 0x89a   : > { %v2239_v8 = vmul.f32 %v2235_v3, %v2235_v3 }
 0x89b   : > { %v2209_v9 = vpop.f32.mrf.mxu3 }
 0x89c   : > { %v2215_v11 = vadd.f32 %v2209_v9, %v2114_v4  ;;  %v2242_v12 = vadd.f32 %v2239_v8, %v2238_v7 }
 0x89e   : > { %v2225_v14 = vadd.f32 %v2219_v58, %v2215_v11  ;;  %2243 = vadd.xlane.f32.xlu0 %v2242_v12 }
 0x8a0   : > { %2229 = vst [vmem:[%s3441_s24 + $0x18] sm:$0xff] %v2225_v14  ;;  %v2237_v16 = vsub.f32 %v2225_v14, %v2233_v13 }
 0x8a2   : > { %v2241_v18 = vmul.f32 %v2237_v16, %v2237_v16 }
 0x8a4   : > { %v2245_v19 = vadd.f32 %v2241_v18, %v2240_v17 }
 0x8a6   : > { %2246 = vadd.xlane.f32.xlu0 %v2245_v19 }
 0x911   : > { %v2244_v20 = vpop.xlane.xlu0 %2243 }
 0x919   : > { %v2247_v21 = vpop.xlane.xlu0 %2246 }
 0x91a   : > { %v2248_v22 = vadd.f32 %v2247_v21, %v2244_v20 }
 0x91c   : > { %v2249_v23 = vrot.slane %v2248_v22, 4 }
 0x91e   : > { %v2250_v24 = vadd.f32 %v2249_v23, %v2248_v22 }
 0x920   : > { %v2251_v25 = vrot.slane %v2250_v24, 2 }
 0x922   : > { %v2252_v26 = vadd.f32 %v2251_v25, %v2250_v24 }
 0x924   : > { %v2253_v27 = vrot.slane %v2252_v26, 1 }
 0x926   : > { %v2254_v28 = vadd.f32 %v2253_v27, %v2252_v26 }
 0x928   : > { %2255 = vst [vmem:[%s712_s22] sm:$0x1] %v2254_v28 }
 0x929 PF: > { %s3505_s3 = sld [smem:[#allocation2_spill]] }
 0x92f   : > { %s33_s3 = sadd.s32 1, %s3505_s3  }
 0x930   : > { %p30_p4 = scmp.ge.s32.totalorder %s33_s3, 4  }
 0x932   :  { %32 = sbr.rel (!%p30_p4) target bundleno = 10 (0xa), region = 173 }

</bundles_post_ra>
